<compile_context>
chip_gen: v7x
topology: tpu7x:2x2x1
jax: 0.10.0
libtpu: 0.0.40
codegen_flags: <defaults>
</compile_context>

<pallas_src>
import functools
import math

import numpy as np

import jax
import jax.numpy as jnp
from jax import lax
from jax.experimental import pallas as pl
from jax.experimental.pallas import tpu as pltpu

_INV_SQRT2 = 1.0 / math.sqrt(2.0)


# ----------------------------- host-side static helpers ------------------------------

def _conv_pad_masks(H, W):
    """Per-lane zero-pad validity masks for the 9 taps of a 'SAME' 3x3 conv, flattened."""
    pos = np.arange(H * W)
    row, col = pos // W, pos % W
    masks = []
    for dy in (-1, 0, 1):
        for dx in (-1, 0, 1):
            ok = (row + dy >= 0) & (row + dy < H) & (col + dx >= 0) & (col + dx < W)
            masks.append(ok.astype(np.float32))
    return jnp.asarray(np.stack(masks, axis=0))                       # (9, H*W)


def _fold_masks(kernel, length, H, W, stride):
    """Static reflection-fold indicators for a K-tap strip along an axis of length `length`.

    Returns S of shape (K, K, H*W): S[d + p, t, lane] = 1 iff the output at flattened
    position `lane` takes tap t from relative flat offset d*stride after reflection
    padding (d in [-p, p]).  In-kernel: G[d] = filt @ S[d] gives the per-lane coefficient
    of roll(x, offset=d*stride), which handles the reflection exactly with zero padding
    buffers and only K rolls per strip.
    """
    assert kernel % 2 == 1
    p = kernel // 2
    assert length > p, "reflection pad requires dim > kernel//2"
    hw = H * W
    pos = np.arange(hw)
    coord = (pos // stride) % length
    S = np.zeros((kernel, kernel, hw), np.float32)
    for t in range(kernel):
        a = coord + t - p
        r = np.where(a < 0, -a, np.where(a >= length, 2 * (length - 1) - a, a))
        d = r - coord                                                 # always in [-p, p]
        S[d + p, t, pos] = 1.0
    return jnp.asarray(S)


# -------------------------------- fused ResBlock kernel ------------------------------

def _resblock_kernel(*refs, H, W, k1, k2, use_filter, approx_gelu):
    if use_filter:
        (x_ref, w1_ref, w2_ref, pv_ref, cm_ref, sw_ref,
         sa1_ref, sb1_ref, sa2_ref, sb2_ref, o_ref) = refs
    else:
        x_ref, w1_ref, w2_ref, pv_ref, cm_ref, o_ref = refs

    HW = H * W
    x = x_ref[0]                                   # (C, H*W)  C-major, lane-dense
    C = x.shape[0]

    conv_offsets = [dy * W + dx for dy in (-1, 0, 1) for dx in (-1, 0, 1)]

    def shift_view(v, off):
        # shifted[:, lane] = v[:, lane + off] (cyclic; out-of-range lanes masked by caller)
        s = (-off) % HW
        return pltpu.roll(v, shift=s, axis=1) if s else v

    def conv3x3(v, w_ref, b):
        # zero-pad 'SAME' 3x3 conv: 9 masked rolled views stacked along sublanes, one
        # transposed im2col matmul (Cout, 9Cin) @ (9Cin, H*W) -> lane-dense C-major out.
        taps = [shift_view(v, off) * cm_ref[i:i + 1, :]
                for i, off in enumerate(conv_offsets)]
        patches = jnp.concatenate(taps, axis=0)                       # (9*Cin, H*W)
        out = jnp.dot(w_ref[...], patches, preferred_element_type=jnp.float32)
        return out + b

    def gelu(v):
        if approx_gelu:
            return 0.5 * v * (1.0 + jnp.tanh(0.7978845608028654 * (v + 0.044715 * v * v * v)))
        return 0.5 * v * (1.0 + lax.erf(v * _INV_SQRT2))              # nn.GELU() default

    b1 = pv_ref[:, 0:1]                                               # (C, 1)
    b2 = pv_ref[:, 1:2]
    y = gelu(conv3x3(x, w1_ref, b1))

    if use_filter:
        half = C // 2
        gamma = pv_ref[:, 2:3]
        beta = pv_ref[:, 3:4]
        sw = sw_ref[...]                                              # (half, 2*k1+2*k2)

        def strip(v, wc, s_ref, kernel, stride):
            # spatial_strip_att (group=1): AdaptiveAvgPool -> 1x1 conv -> sigmoid gives K
            # shared tap weights; reflection-padded K-tap filtering applied as K rolls with
            # folded per-lane coefficient planes.
            p = kernel // 2
            mean = jnp.sum(v, axis=1, keepdims=True) * (1.0 / HW)     # (half, 1)
            logits = jnp.sum(mean * wc, axis=0, keepdims=True)        # (1, K)
            filt = jax.nn.sigmoid(logits)
            acc = jnp.zeros_like(v)
            for dp in range(kernel):
                g = jnp.dot(filt, s_ref[dp],
                            preferred_element_type=jnp.float32)       # (1, H*W) coeff plane
                acc = acc + shift_view(v, (dp - p) * stride) * g
            return acc

        def cubic(v, wc_a, wc_b, sa_ref, sb_ref, kernel, g_, b_):
            y1 = strip(v, wc_a, sa_ref, kernel, 1)                    # H=True: slides along W
            y2 = strip(y1, wc_b, sb_ref, kernel, W)                   # H=False: slides along H
            return g_ * y2 + b_ * v

        z1 = cubic(y[:half], sw[:, 0:k1], sw[:, k1:2 * k1],
                   sa1_ref, sb1_ref, k1, gamma[:half], beta[:half])
        z2 = cubic(y[half:], sw[:, 2 * k1:2 * k1 + k2], sw[:, 2 * k1 + k2:2 * k1 + 2 * k2],
                   sa2_ref, sb2_ref, k2, gamma[half:], beta[half:])
        y = jnp.concatenate([z1, z2], axis=0)                         # chunk/concat in VMEM

    o_ref[0] = conv3x3(y, w2_ref, b2) + x                             # conv2 + residual


def _const_spec(a):
    nd = a.ndim
    return pl.BlockSpec(tuple(a.shape), lambda n, _nd=nd: (0,) * _nd)


def resblock_forward(x_nchw, params, *, use_filter=True, approx_gelu=False):
    N, C, H, W = x_nchw.shape
    HW = H * W
    Cout = params['w1'].shape[-1]
    assert params['w1'].shape == (3, 3, C, Cout)
    assert Cout == C, "residual add requires in_channel == out_channel"

    x = x_nchw.reshape(N, C, HW)                       # free reshape; stays C-major
    w1t = params['w1'].reshape(9 * C, Cout).T          # (Cout, 9*Cin) transposed im2col
    w2t = params['w2'].reshape(9 * Cout, Cout).T
    cmask = _conv_pad_masks(H, W)

    if use_filter:
        c11, c7 = params['cubic11'], params['cubic7']
        half = Cout // 2
        k1, g1 = c11['kernel'], c11['group']
        k2, g2 = c7['kernel'], c7['group']
        assert g1 == 1 and g2 == 1, "fused kernel specialises the group=1 case used by ResBlock"
        assert min(H, W) > max(k1, k2) // 2, "reflection pad needs H, W > kernel//2"
        pv = jnp.stack(
            [params['b1'], params['b2'],
             jnp.concatenate([c11['gamma'].reshape(half), c7['gamma'].reshape(half)]),
             jnp.concatenate([c11['beta'].reshape(half), c7['beta'].reshape(half)])],
            axis=1)                                                    # (C, 4) packed scalars
        sw = jnp.concatenate([c11['w_h'], c11['w_w'], c7['w_h'], c7['w_w']],
                             axis=1)                                   # (half, 2*k1+2*k2)
        sa1 = _fold_masks(k1, W, H, W, 1)                              # strip along W
        sb1 = _fold_masks(k1, H, H, W, W)                              # strip along H
        sa2 = _fold_masks(k2, W, H, W, 1)
        sb2 = _fold_masks(k2, H, H, W, W)
        args = [x, w1t, w2t, pv, cmask, sw, sa1, sb1, sa2, sb2]
    else:
        k1 = k2 = 0
        pv = jnp.stack([params['b1'], params['b2']], axis=1)           # (C, 2)
        args = [x, w1t, w2t, pv, cmask]

    in_specs = ([pl.BlockSpec((1, C, HW), lambda n: (n, 0, 0))]
                + [_const_spec(a) for a in args[1:]])

    kernel = functools.partial(_resblock_kernel, H=H, W=W, k1=k1, k2=k2,
                               use_filter=use_filter, approx_gelu=approx_gelu)

    out = pl.pallas_call(
        kernel,
        out_shape=jax.ShapeDtypeStruct((N, Cout, HW), jnp.float32),
        grid=(N,),
        in_specs=in_specs,
        out_specs=pl.BlockSpec((1, Cout, HW), lambda n: (n, 0, 0)),
        compiler_params=pltpu.CompilerParams(
            dimension_semantics=("parallel",),        # both TCs on v7x; no-op on v5e/v6e
            vmem_limit_bytes=32 * 1024 * 1024),
    )(*args)
    return out.reshape(N, Cout, H, W)


# --------------------------------- pure-JAX reference --------------------------------

def _gelu_ref(x, approx=False):
    if approx:
        return 0.5 * x * (1.0 + jnp.tanh(0.7978845608028654 * (x + 0.044715 * x ** 3)))
    return 0.5 * x * (1.0 + lax.erf(x * _INV_SQRT2))


def _conv3x3_ref(x, w, b):
    y = lax.conv_general_dilated(x, w, (1, 1), 'SAME',
                                 dimension_numbers=('NHWC', 'HWIO', 'NHWC'))
    return y + b


def _strip_ref(x, wconv, kernel, group, horizontal):
    if not horizontal:
        x = jnp.transpose(x, (0, 2, 1, 3))
    N, H, W, C = x.shape
    pad = kernel // 2
    m = jnp.mean(x, axis=(1, 2))                                       # (N, C)
    f = jax.nn.sigmoid(m @ wconv).reshape(N, group, 1, kernel)
    wt = jnp.broadcast_to(f, (N, group, C // group, kernel)).reshape(N, C, kernel)
    xp = jnp.pad(x, ((0, 0), (0, 0), (pad, pad), (0, 0)), mode='reflect')
    patches = jnp.stack([xp[:, :, t:t + W, :] for t in range(kernel)], axis=-1)
    out = jnp.einsum('nhwck,nck->nhwc', patches, wt)
    if not horizontal:
        out = jnp.transpose(out, (0, 2, 1, 3))
    return out


def _cubic_ref(x, p):
    y = _strip_ref(x, p['w_h'], p['kernel'], p['group'], True)
    y = _strip_ref(y, p['w_w'], p['kernel'], p['group'], False)
    return p['gamma'] * y + p['beta'] * x


def resblock_ref(x_nchw, params, *, use_filter=True, approx_gelu=False):
    x = jnp.transpose(x_nchw, (0, 2, 3, 1))
    out = _gelu_ref(_conv3x3_ref(x, params['w1'], params['b1']), approx_gelu)
    if use_filter:
        c = out.shape[-1]
        o1 = _cubic_ref(out[..., :c // 2], params['cubic11'])
        o2 = _cubic_ref(out[..., c // 2:], params['cubic7'])
        out = jnp.concatenate([o1, o2], axis=-1)
    out = _conv3x3_ref(out, params['w2'], params['b2']) + x
    return jnp.transpose(out, (0, 3, 1, 2))


# -------------------------------------- params ---------------------------------------

def init_params(key, in_ch, out_ch):
    ks = jax.random.split(key, 12)

    def rn(k, shape, scale):
        return scale * jax.random.normal(k, shape, jnp.float32)

    def cubic_params(k1, k2, k3, k4, dim, kernel, group):
        return {
            'w_h': rn(k1, (dim, group * kernel), 0.2),
            'w_w': rn(k2, (dim, group * kernel), 0.2),
            'gamma': rn(k3, (1, 1, 1, dim), 1.0),       # torch init is 0 (identity);
            'beta': 1.0 + rn(k4, (1, 1, 1, dim), 0.1),  # randomized so the branch is exercised
            'kernel': kernel,
            'group': group,
        }

    half = in_ch // 2
    return {
        'w1': rn(ks[0], (3, 3, in_ch, out_ch), 0.2),
        'b1': rn(ks[1], (out_ch,), 0.1),
        'w2': rn(ks[2], (3, 3, out_ch, out_ch), 0.2),
        'b2': rn(ks[3], (out_ch,), 0.1),
        'cubic11': cubic_params(ks[4], ks[5], ks[6], ks[7], half, 11, 1),
        'cubic7': cubic_params(ks[8], ks[9], ks[10], ks[11], half, 7, 1),
    }


if __name__ == "__main__":
    key = jax.random.PRNGKey(0)
    kx, kp = jax.random.split(key)
    N, C, H, W = 2, 8, 16, 16                      # NCHW, in_channel == out_channel
    x = jax.random.normal(kx, (N, C, H, W), jnp.float32)
    params = init_params(kp, C, C)

    out = jax.block_until_ready(resblock_forward(x, params))
    ref = jax.block_until_ready(resblock_ref(x, params))

    assert out.shape == (N, C, H, W)
    if not jnp.allclose(out, ref, atol=1e-3, rtol=1e-3):
        err = float(jnp.max(jnp.abs(out - ref)))
        raise AssertionError(f"Pallas ResBlock output mismatch vs JAX reference (max err {err})")
    print("KERNEL_OK")
</pallas_src>

<mosaic_0001>
module attributes {stable_mosaic.version = 11 : i64} {
  func.func @_resblock_kernel(%arg0: i32, %arg1: memref<1x8x256xf32, #tpu.memory_space<vmem>>, %arg2: memref<8x72xf32, #tpu.memory_space<vmem>>, %arg3: memref<8x72xf32, #tpu.memory_space<vmem>>, %arg4: memref<8x4xf32, #tpu.memory_space<vmem>>, %arg5: memref<9x256xf32, #tpu.memory_space<vmem>>, %arg6: memref<4x36xf32, #tpu.memory_space<vmem>>, %arg7: memref<11x11x256xf32, #tpu.memory_space<vmem>>, %arg8: memref<11x11x256xf32, #tpu.memory_space<vmem>>, %arg9: memref<7x7x256xf32, #tpu.memory_space<vmem>>, %arg10: memref<7x7x256xf32, #tpu.memory_space<vmem>>, %arg11: memref<1x8x256xf32, #tpu.memory_space<vmem>>) attributes {dimension_semantics = [#tpu.dimension_semantics<parallel>], iteration_bounds = array<i64: 2>, scalar_prefetch = 0 : i64, scratch_operands = 0 : i64, tpu.core_type = #tpu.core_type<tc>, window_params = [{transform_indices = @transform_0, window_bounds = array<i64: 1, 8, 256>}, {pipeline_mode = #tpu.pipeline_mode<synchronous>, transform_indices = @transform_1, window_bounds = array<i64: 8, 72>}, {pipeline_mode = #tpu.pipeline_mode<synchronous>, transform_indices = @transform_2, window_bounds = array<i64: 8, 72>}, {pipeline_mode = #tpu.pipeline_mode<synchronous>, transform_indices = @transform_3, window_bounds = array<i64: 8, 4>}, {pipeline_mode = #tpu.pipeline_mode<synchronous>, transform_indices = @transform_4, window_bounds = array<i64: 9, 256>}, {pipeline_mode = #tpu.pipeline_mode<synchronous>, transform_indices = @transform_5, window_bounds = array<i64: 4, 36>}, {pipeline_mode = #tpu.pipeline_mode<synchronous>, transform_indices = @transform_6, window_bounds = array<i64: 11, 11, 256>}, {pipeline_mode = #tpu.pipeline_mode<synchronous>, transform_indices = @transform_7, window_bounds = array<i64: 11, 11, 256>}, {pipeline_mode = #tpu.pipeline_mode<synchronous>, transform_indices = @transform_8, window_bounds = array<i64: 7, 7, 256>}, {pipeline_mode = #tpu.pipeline_mode<synchronous>, transform_indices = @transform_9, window_bounds = array<i64: 7, 7, 256>}, {transform_indices = @transform_10, window_bounds = array<i64: 1, 8, 256>}]} {
    %c0 = arith.constant 0 : index
    %c0_0 = arith.constant 0 : index
    %c0_1 = arith.constant 0 : index
    %0 = vector.load %arg1[%c0, %c0_0, %c0_1] : memref<1x8x256xf32, #tpu.memory_space<vmem>>, vector<1x8x256xf32>
    %1 = vector.shape_cast %0 : vector<1x8x256xf32> to vector<8x256xf32>
    %c0_2 = arith.constant 0 : index
    %c0_3 = arith.constant 0 : index
    %2 = vector.load %arg4[%c0_2, %c0_3] : memref<8x4xf32, #tpu.memory_space<vmem>>, vector<8x1xf32>
    %c0_4 = arith.constant 0 : index
    %c1 = arith.constant 1 : index
    %3 = vector.load %arg4[%c0_4, %c1] : memref<8x4xf32, #tpu.memory_space<vmem>>, vector<8x1xf32>
    %c17_i32 = arith.constant 17 : i32
    %4 = tpu.dynamic_rotate %1 by %c17_i32 dim 1 : vector<8x256xf32>, i32 -> vector<8x256xf32>
    %c0_5 = arith.constant 0 : index
    %c0_6 = arith.constant 0 : index
    %5 = vector.load %arg5[%c0_5, %c0_6] : memref<9x256xf32, #tpu.memory_space<vmem>>, vector<1x256xf32>
    %6 = vector.broadcast %5 : vector<1x256xf32> to vector<8x256xf32>
    %7 = arith.mulf %4, %6 : vector<8x256xf32>
    %c16_i32 = arith.constant 16 : i32
    %8 = tpu.dynamic_rotate %1 by %c16_i32 dim 1 : vector<8x256xf32>, i32 -> vector<8x256xf32>
    %c1_7 = arith.constant 1 : index
    %c0_8 = arith.constant 0 : index
    %9 = vector.load %arg5[%c1_7, %c0_8] : memref<9x256xf32, #tpu.memory_space<vmem>>, vector<1x256xf32>
    %10 = vector.broadcast %9 : vector<1x256xf32> to vector<8x256xf32>
    %11 = arith.mulf %8, %10 : vector<8x256xf32>
    %c15_i32 = arith.constant 15 : i32
    %12 = tpu.dynamic_rotate %1 by %c15_i32 dim 1 : vector<8x256xf32>, i32 -> vector<8x256xf32>
    %c2 = arith.constant 2 : index
    %c0_9 = arith.constant 0 : index
    %13 = vector.load %arg5[%c2, %c0_9] : memref<9x256xf32, #tpu.memory_space<vmem>>, vector<1x256xf32>
    %14 = vector.broadcast %13 : vector<1x256xf32> to vector<8x256xf32>
    %15 = arith.mulf %12, %14 : vector<8x256xf32>
    %c1_i32 = arith.constant 1 : i32
    %16 = tpu.dynamic_rotate %1 by %c1_i32 dim 1 : vector<8x256xf32>, i32 -> vector<8x256xf32>
    %c3 = arith.constant 3 : index
    %c0_10 = arith.constant 0 : index
    %17 = vector.load %arg5[%c3, %c0_10] : memref<9x256xf32, #tpu.memory_space<vmem>>, vector<1x256xf32>
    %18 = vector.broadcast %17 : vector<1x256xf32> to vector<8x256xf32>
    %19 = arith.mulf %16, %18 : vector<8x256xf32>
    %c4 = arith.constant 4 : index
    %c0_11 = arith.constant 0 : index
    %20 = vector.load %arg5[%c4, %c0_11] : memref<9x256xf32, #tpu.memory_space<vmem>>, vector<1x256xf32>
    %21 = vector.broadcast %20 : vector<1x256xf32> to vector<8x256xf32>
    %22 = arith.mulf %1, %21 : vector<8x256xf32>
    %c255_i32 = arith.constant 255 : i32
    %23 = tpu.dynamic_rotate %1 by %c255_i32 dim 1 : vector<8x256xf32>, i32 -> vector<8x256xf32>
    %c5 = arith.constant 5 : index
    %c0_12 = arith.constant 0 : index
    %24 = vector.load %arg5[%c5, %c0_12] : memref<9x256xf32, #tpu.memory_space<vmem>>, vector<1x256xf32>
    %25 = vector.broadcast %24 : vector<1x256xf32> to vector<8x256xf32>
    %26 = arith.mulf %23, %25 : vector<8x256xf32>
    %c241_i32 = arith.constant 241 : i32
    %27 = tpu.dynamic_rotate %1 by %c241_i32 dim 1 : vector<8x256xf32>, i32 -> vector<8x256xf32>
    %c6 = arith.constant 6 : index
    %c0_13 = arith.constant 0 : index
    %28 = vector.load %arg5[%c6, %c0_13] : memref<9x256xf32, #tpu.memory_space<vmem>>, vector<1x256xf32>
    %29 = vector.broadcast %28 : vector<1x256xf32> to vector<8x256xf32>
    %30 = arith.mulf %27, %29 : vector<8x256xf32>
    %c240_i32 = arith.constant 240 : i32
    %31 = tpu.dynamic_rotate %1 by %c240_i32 dim 1 : vector<8x256xf32>, i32 -> vector<8x256xf32>
    %c7 = arith.constant 7 : index
    %c0_14 = arith.constant 0 : index
    %32 = vector.load %arg5[%c7, %c0_14] : memref<9x256xf32, #tpu.memory_space<vmem>>, vector<1x256xf32>
    %33 = vector.broadcast %32 : vector<1x256xf32> to vector<8x256xf32>
    %34 = arith.mulf %31, %33 : vector<8x256xf32>
    %c239_i32 = arith.constant 239 : i32
    %35 = tpu.dynamic_rotate %1 by %c239_i32 dim 1 : vector<8x256xf32>, i32 -> vector<8x256xf32>
    %c8 = arith.constant 8 : index
    %c0_15 = arith.constant 0 : index
    %36 = vector.load %arg5[%c8, %c0_15] : memref<9x256xf32, #tpu.memory_space<vmem>>, vector<1x256xf32>
    %37 = vector.broadcast %36 : vector<1x256xf32> to vector<8x256xf32>
    %38 = arith.mulf %35, %37 : vector<8x256xf32>
    %39 = tpu.concatenate %7, %11, %15, %19, %22, %26, %30, %34, %38 in 0 : vector<8x256xf32>, vector<8x256xf32>, vector<8x256xf32>, vector<8x256xf32>, vector<8x256xf32>, vector<8x256xf32>, vector<8x256xf32>, vector<8x256xf32>, vector<8x256xf32> -> vector<72x256xf32>
    %c0_16 = arith.constant 0 : index
    %c0_17 = arith.constant 0 : index
    %40 = vector.load %arg2[%c0_16, %c0_17] : memref<8x72xf32, #tpu.memory_space<vmem>>, vector<8x72xf32>
    %cst = arith.constant dense<0.000000e+00> : vector<8x256xf32>
    %41 = tpu.matmul %40, %39, %cst {dimension_numbers = #tpu.dot_dimension_numbers<[1], [0], [0], [1], [0, 0, 1, 1], [], []>} : vector<8x72xf32>, vector<72x256xf32>, vector<8x256xf32> -> vector<8x256xf32>
    %42 = vector.broadcast %2 : vector<8x1xf32> to vector<8x256xf32>
    %43 = arith.addf %41, %42 : vector<8x256xf32>
    %cst_18 = arith.constant 5.000000e-01 : f32
    %44 = vector.broadcast %cst_18 : f32 to vector<8x256xf32>
    %45 = arith.mulf %44, %43 : vector<8x256xf32>
    %cst_19 = arith.constant 0.707106769 : f32
    %46 = vector.broadcast %cst_19 : f32 to vector<8x256xf32>
    %47 = arith.mulf %43, %46 : vector<8x256xf32>
    %48 = math.erf %47 : vector<8x256xf32>
    %cst_20 = arith.constant 1.000000e+00 : f32
    %49 = vector.broadcast %cst_20 : f32 to vector<8x256xf32>
    %50 = arith.addf %49, %48 : vector<8x256xf32>
    %51 = arith.mulf %45, %50 : vector<8x256xf32>
    %c0_21 = arith.constant 0 : index
    %c2_22 = arith.constant 2 : index
    %52 = vector.load %arg4[%c0_21, %c2_22] : memref<8x4xf32, #tpu.memory_space<vmem>>, vector<8x1xf32>
    %c0_23 = arith.constant 0 : index
    %c3_24 = arith.constant 3 : index
    %53 = vector.load %arg4[%c0_23, %c3_24] : memref<8x4xf32, #tpu.memory_space<vmem>>, vector<8x1xf32>
    %c0_25 = arith.constant 0 : index
    %c0_26 = arith.constant 0 : index
    %54 = vector.load %arg6[%c0_25, %c0_26] : memref<4x36xf32, #tpu.memory_space<vmem>>, vector<4x36xf32>
    %55 = vector.extract_strided_slice %51 {offsets = [0, 0], sizes = [4, 256], strides = [1, 1]} : vector<8x256xf32> to vector<4x256xf32>
    %56 = vector.extract_strided_slice %54 {offsets = [0, 0], sizes = [4, 11], strides = [1, 1]} : vector<4x36xf32> to vector<4x11xf32>
    %57 = vector.extract_strided_slice %54 {offsets = [0, 11], sizes = [4, 11], strides = [1, 1]} : vector<4x36xf32> to vector<4x11xf32>
    %58 = vector.extract_strided_slice %52 {offsets = [0, 0], sizes = [4, 1], strides = [1, 1]} : vector<8x1xf32> to vector<4x1xf32>
    %59 = vector.extract_strided_slice %53 {offsets = [0, 0], sizes = [4, 1], strides = [1, 1]} : vector<8x1xf32> to vector<4x1xf32>
    %cst_27 = arith.constant dense<0.000000e+00> : vector<4xf32>
    %60 = vector.multi_reduction <add>, %55, %cst_27 [1] : vector<4x256xf32> to vector<4xf32>
    %61 = vector.shape_cast %60 : vector<4xf32> to vector<4x1xf32>
    %cst_28 = arith.constant 3.906250e-03 : f32
    %62 = vector.broadcast %cst_28 : f32 to vector<4x1xf32>
    %63 = arith.mulf %61, %62 : vector<4x1xf32>
    %64 = vector.broadcast %63 : vector<4x1xf32> to vector<4x11xf32>
    %65 = arith.mulf %64, %56 : vector<4x11xf32>
    %cst_29 = arith.constant dense<0.000000e+00> : vector<11xf32>
    %66 = vector.multi_reduction <add>, %65, %cst_29 [0] : vector<4x11xf32> to vector<11xf32>
    %67 = vector.shape_cast %66 : vector<11xf32> to vector<1x11xf32>
    %68 = arith.negf %67 : vector<1x11xf32>
    %69 = math.exp %68 : vector<1x11xf32>
    %cst_30 = arith.constant 1.000000e+00 : f32
    %70 = vector.broadcast %cst_30 : f32 to vector<1x11xf32>
    %71 = arith.addf %70, %69 : vector<1x11xf32>
    %72 = arith.divf %70, %71 : vector<1x11xf32>
    %cst_31 = arith.constant 0.000000e+00 : f32
    %73 = vector.broadcast %cst_31 : f32 to vector<4x256xf32>
    %c0_32 = arith.constant 0 : index
    %c0_33 = arith.constant 0 : index
    %c0_34 = arith.constant 0 : index
    %74 = vector.load %arg7[%c0_32, %c0_33, %c0_34] : memref<11x11x256xf32, #tpu.memory_space<vmem>>, vector<1x11x256xf32>
    %75 = vector.shape_cast %74 : vector<1x11x256xf32> to vector<11x256xf32>
    %cst_35 = arith.constant dense<0.000000e+00> : vector<1x256xf32>
    %76 = tpu.matmul %72, %75, %cst_35 {dimension_numbers = #tpu.dot_dimension_numbers<[1], [0], [0], [1], [0, 0, 1, 1], [], []>} : vector<1x11xf32>, vector<11x256xf32>, vector<1x256xf32> -> vector<1x256xf32>
    %c5_i32 = arith.constant 5 : i32
    %77 = tpu.dynamic_rotate %55 by %c5_i32 dim 1 : vector<4x256xf32>, i32 -> vector<4x256xf32>
    %78 = vector.broadcast %76 : vector<1x256xf32> to vector<4x256xf32>
    %79 = arith.mulf %77, %78 : vector<4x256xf32>
    %80 = arith.addf %73, %79 : vector<4x256xf32>
    %c1_36 = arith.constant 1 : index
    %c0_37 = arith.constant 0 : index
    %c0_38 = arith.constant 0 : index
    %81 = vector.load %arg7[%c1_36, %c0_37, %c0_38] : memref<11x11x256xf32, #tpu.memory_space<vmem>>, vector<1x11x256xf32>
    %82 = vector.shape_cast %81 : vector<1x11x256xf32> to vector<11x256xf32>
    %cst_39 = arith.constant dense<0.000000e+00> : vector<1x256xf32>
    %83 = tpu.matmul %72, %82, %cst_39 {dimension_numbers = #tpu.dot_dimension_numbers<[1], [0], [0], [1], [0, 0, 1, 1], [], []>} : vector<1x11xf32>, vector<11x256xf32>, vector<1x256xf32> -> vector<1x256xf32>
    %c4_i32 = arith.constant 4 : i32
    %84 = tpu.dynamic_rotate %55 by %c4_i32 dim 1 : vector<4x256xf32>, i32 -> vector<4x256xf32>
    %85 = vector.broadcast %83 : vector<1x256xf32> to vector<4x256xf32>
    %86 = arith.mulf %84, %85 : vector<4x256xf32>
    %87 = arith.addf %80, %86 : vector<4x256xf32>
    %c2_40 = arith.constant 2 : index
    %c0_41 = arith.constant 0 : index
    %c0_42 = arith.constant 0 : index
    %88 = vector.load %arg7[%c2_40, %c0_41, %c0_42] : memref<11x11x256xf32, #tpu.memory_space<vmem>>, vector<1x11x256xf32>
    %89 = vector.shape_cast %88 : vector<1x11x256xf32> to vector<11x256xf32>
    %cst_43 = arith.constant dense<0.000000e+00> : vector<1x256xf32>
    %90 = tpu.matmul %72, %89, %cst_43 {dimension_numbers = #tpu.dot_dimension_numbers<[1], [0], [0], [1], [0, 0, 1, 1], [], []>} : vector<1x11xf32>, vector<11x256xf32>, vector<1x256xf32> -> vector<1x256xf32>
    %c3_i32 = arith.constant 3 : i32
    %91 = tpu.dynamic_rotate %55 by %c3_i32 dim 1 : vector<4x256xf32>, i32 -> vector<4x256xf32>
    %92 = vector.broadcast %90 : vector<1x256xf32> to vector<4x256xf32>
    %93 = arith.mulf %91, %92 : vector<4x256xf32>
    %94 = arith.addf %87, %93 : vector<4x256xf32>
    %c3_44 = arith.constant 3 : index
    %c0_45 = arith.constant 0 : index
    %c0_46 = arith.constant 0 : index
    %95 = vector.load %arg7[%c3_44, %c0_45, %c0_46] : memref<11x11x256xf32, #tpu.memory_space<vmem>>, vector<1x11x256xf32>
    %96 = vector.shape_cast %95 : vector<1x11x256xf32> to vector<11x256xf32>
    %cst_47 = arith.constant dense<0.000000e+00> : vector<1x256xf32>
    %97 = tpu.matmul %72, %96, %cst_47 {dimension_numbers = #tpu.dot_dimension_numbers<[1], [0], [0], [1], [0, 0, 1, 1], [], []>} : vector<1x11xf32>, vector<11x256xf32>, vector<1x256xf32> -> vector<1x256xf32>
    %c2_i32 = arith.constant 2 : i32
    %98 = tpu.dynamic_rotate %55 by %c2_i32 dim 1 : vector<4x256xf32>, i32 -> vector<4x256xf32>
    %99 = vector.broadcast %97 : vector<1x256xf32> to vector<4x256xf32>
    %100 = arith.mulf %98, %99 : vector<4x256xf32>
    %101 = arith.addf %94, %100 : vector<4x256xf32>
    %c4_48 = arith.constant 4 : index
    %c0_49 = arith.constant 0 : index
    %c0_50 = arith.constant 0 : index
    %102 = vector.load %arg7[%c4_48, %c0_49, %c0_50] : memref<11x11x256xf32, #tpu.memory_space<vmem>>, vector<1x11x256xf32>
    %103 = vector.shape_cast %102 : vector<1x11x256xf32> to vector<11x256xf32>
    %cst_51 = arith.constant dense<0.000000e+00> : vector<1x256xf32>
    %104 = tpu.matmul %72, %103, %cst_51 {dimension_numbers = #tpu.dot_dimension_numbers<[1], [0], [0], [1], [0, 0, 1, 1], [], []>} : vector<1x11xf32>, vector<11x256xf32>, vector<1x256xf32> -> vector<1x256xf32>
    %c1_i32_52 = arith.constant 1 : i32
    %105 = tpu.dynamic_rotate %55 by %c1_i32_52 dim 1 : vector<4x256xf32>, i32 -> vector<4x256xf32>
    %106 = vector.broadcast %104 : vector<1x256xf32> to vector<4x256xf32>
    %107 = arith.mulf %105, %106 : vector<4x256xf32>
    %108 = arith.addf %101, %107 : vector<4x256xf32>
    %c5_53 = arith.constant 5 : index
    %c0_54 = arith.constant 0 : index
    %c0_55 = arith.constant 0 : index
    %109 = vector.load %arg7[%c5_53, %c0_54, %c0_55] : memref<11x11x256xf32, #tpu.memory_space<vmem>>, vector<1x11x256xf32>
    %110 = vector.shape_cast %109 : vector<1x11x256xf32> to vector<11x256xf32>
    %cst_56 = arith.constant dense<0.000000e+00> : vector<1x256xf32>
    %111 = tpu.matmul %72, %110, %cst_56 {dimension_numbers = #tpu.dot_dimension_numbers<[1], [0], [0], [1], [0, 0, 1, 1], [], []>} : vector<1x11xf32>, vector<11x256xf32>, vector<1x256xf32> -> vector<1x256xf32>
    %112 = vector.broadcast %111 : vector<1x256xf32> to vector<4x256xf32>
    %113 = arith.mulf %55, %112 : vector<4x256xf32>
    %114 = arith.addf %108, %113 : vector<4x256xf32>
    %c6_57 = arith.constant 6 : index
    %c0_58 = arith.constant 0 : index
    %c0_59 = arith.constant 0 : index
    %115 = vector.load %arg7[%c6_57, %c0_58, %c0_59] : memref<11x11x256xf32, #tpu.memory_space<vmem>>, vector<1x11x256xf32>
    %116 = vector.shape_cast %115 : vector<1x11x256xf32> to vector<11x256xf32>
    %cst_60 = arith.constant dense<0.000000e+00> : vector<1x256xf32>
    %117 = tpu.matmul %72, %116, %cst_60 {dimension_numbers = #tpu.dot_dimension_numbers<[1], [0], [0], [1], [0, 0, 1, 1], [], []>} : vector<1x11xf32>, vector<11x256xf32>, vector<1x256xf32> -> vector<1x256xf32>
    %c255_i32_61 = arith.constant 255 : i32
    %118 = tpu.dynamic_rotate %55 by %c255_i32_61 dim 1 : vector<4x256xf32>, i32 -> vector<4x256xf32>
    %119 = vector.broadcast %117 : vector<1x256xf32> to vector<4x256xf32>
    %120 = arith.mulf %118, %119 : vector<4x256xf32>
    %121 = arith.addf %114, %120 : vector<4x256xf32>
    %c7_62 = arith.constant 7 : index
    %c0_63 = arith.constant 0 : index
    %c0_64 = arith.constant 0 : index
    %122 = vector.load %arg7[%c7_62, %c0_63, %c0_64] : memref<11x11x256xf32, #tpu.memory_space<vmem>>, vector<1x11x256xf32>
    %123 = vector.shape_cast %122 : vector<1x11x256xf32> to vector<11x256xf32>
    %cst_65 = arith.constant dense<0.000000e+00> : vector<1x256xf32>
    %124 = tpu.matmul %72, %123, %cst_65 {dimension_numbers = #tpu.dot_dimension_numbers<[1], [0], [0], [1], [0, 0, 1, 1], [], []>} : vector<1x11xf32>, vector<11x256xf32>, vector<1x256xf32> -> vector<1x256xf32>
    %c254_i32 = arith.constant 254 : i32
    %125 = tpu.dynamic_rotate %55 by %c254_i32 dim 1 : vector<4x256xf32>, i32 -> vector<4x256xf32>
    %126 = vector.broadcast %124 : vector<1x256xf32> to vector<4x256xf32>
    %127 = arith.mulf %125, %126 : vector<4x256xf32>
    %128 = arith.addf %121, %127 : vector<4x256xf32>
    %c8_66 = arith.constant 8 : index
    %c0_67 = arith.constant 0 : index
    %c0_68 = arith.constant 0 : index
    %129 = vector.load %arg7[%c8_66, %c0_67, %c0_68] : memref<11x11x256xf32, #tpu.memory_space<vmem>>, vector<1x11x256xf32>
    %130 = vector.shape_cast %129 : vector<1x11x256xf32> to vector<11x256xf32>
    %cst_69 = arith.constant dense<0.000000e+00> : vector<1x256xf32>
    %131 = tpu.matmul %72, %130, %cst_69 {dimension_numbers = #tpu.dot_dimension_numbers<[1], [0], [0], [1], [0, 0, 1, 1], [], []>} : vector<1x11xf32>, vector<11x256xf32>, vector<1x256xf32> -> vector<1x256xf32>
    %c253_i32 = arith.constant 253 : i32
    %132 = tpu.dynamic_rotate %55 by %c253_i32 dim 1 : vector<4x256xf32>, i32 -> vector<4x256xf32>
    %133 = vector.broadcast %131 : vector<1x256xf32> to vector<4x256xf32>
    %134 = arith.mulf %132, %133 : vector<4x256xf32>
    %135 = arith.addf %128, %134 : vector<4x256xf32>
    %c9 = arith.constant 9 : index
    %c0_70 = arith.constant 0 : index
    %c0_71 = arith.constant 0 : index
    %136 = vector.load %arg7[%c9, %c0_70, %c0_71] : memref<11x11x256xf32, #tpu.memory_space<vmem>>, vector<1x11x256xf32>
    %137 = vector.shape_cast %136 : vector<1x11x256xf32> to vector<11x256xf32>
    %cst_72 = arith.constant dense<0.000000e+00> : vector<1x256xf32>
    %138 = tpu.matmul %72, %137, %cst_72 {dimension_numbers = #tpu.dot_dimension_numbers<[1], [0], [0], [1], [0, 0, 1, 1], [], []>} : vector<1x11xf32>, vector<11x256xf32>, vector<1x256xf32> -> vector<1x256xf32>
    %c252_i32 = arith.constant 252 : i32
    %139 = tpu.dynamic_rotate %55 by %c252_i32 dim 1 : vector<4x256xf32>, i32 -> vector<4x256xf32>
    %140 = vector.broadcast %138 : vector<1x256xf32> to vector<4x256xf32>
    %141 = arith.mulf %139, %140 : vector<4x256xf32>
    %142 = arith.addf %135, %141 : vector<4x256xf32>
    %c10 = arith.constant 10 : index
    %c0_73 = arith.constant 0 : index
    %c0_74 = arith.constant 0 : index
    %143 = vector.load %arg7[%c10, %c0_73, %c0_74] : memref<11x11x256xf32, #tpu.memory_space<vmem>>, vector<1x11x256xf32>
    %144 = vector.shape_cast %143 : vector<1x11x256xf32> to vector<11x256xf32>
    %cst_75 = arith.constant dense<0.000000e+00> : vector<1x256xf32>
    %145 = tpu.matmul %72, %144, %cst_75 {dimension_numbers = #tpu.dot_dimension_numbers<[1], [0], [0], [1], [0, 0, 1, 1], [], []>} : vector<1x11xf32>, vector<11x256xf32>, vector<1x256xf32> -> vector<1x256xf32>
    %c251_i32 = arith.constant 251 : i32
    %146 = tpu.dynamic_rotate %55 by %c251_i32 dim 1 : vector<4x256xf32>, i32 -> vector<4x256xf32>
    %147 = vector.broadcast %145 : vector<1x256xf32> to vector<4x256xf32>
    %148 = arith.mulf %146, %147 : vector<4x256xf32>
    %149 = arith.addf %142, %148 : vector<4x256xf32>
    %cst_76 = arith.constant dense<0.000000e+00> : vector<4xf32>
    %150 = vector.multi_reduction <add>, %149, %cst_76 [1] : vector<4x256xf32> to vector<4xf32>
    %151 = vector.shape_cast %150 : vector<4xf32> to vector<4x1xf32>
    %cst_77 = arith.constant 3.906250e-03 : f32
    %152 = vector.broadcast %cst_77 : f32 to vector<4x1xf32>
    %153 = arith.mulf %151, %152 : vector<4x1xf32>
    %154 = vector.broadcast %153 : vector<4x1xf32> to vector<4x11xf32>
    %155 = arith.mulf %154, %57 : vector<4x11xf32>
    %cst_78 = arith.constant dense<0.000000e+00> : vector<11xf32>
    %156 = vector.multi_reduction <add>, %155, %cst_78 [0] : vector<4x11xf32> to vector<11xf32>
    %157 = vector.shape_cast %156 : vector<11xf32> to vector<1x11xf32>
    %158 = arith.negf %157 : vector<1x11xf32>
    %159 = math.exp %158 : vector<1x11xf32>
    %cst_79 = arith.constant 1.000000e+00 : f32
    %160 = vector.broadcast %cst_79 : f32 to vector<1x11xf32>
    %161 = arith.addf %160, %159 : vector<1x11xf32>
    %162 = arith.divf %160, %161 : vector<1x11xf32>
    %cst_80 = arith.constant 0.000000e+00 : f32
    %163 = vector.broadcast %cst_80 : f32 to vector<4x256xf32>
    %c0_81 = arith.constant 0 : index
    %c0_82 = arith.constant 0 : index
    %c0_83 = arith.constant 0 : index
    %164 = vector.load %arg8[%c0_81, %c0_82, %c0_83] : memref<11x11x256xf32, #tpu.memory_space<vmem>>, vector<1x11x256xf32>
    %165 = vector.shape_cast %164 : vector<1x11x256xf32> to vector<11x256xf32>
    %cst_84 = arith.constant dense<0.000000e+00> : vector<1x256xf32>
    %166 = tpu.matmul %162, %165, %cst_84 {dimension_numbers = #tpu.dot_dimension_numbers<[1], [0], [0], [1], [0, 0, 1, 1], [], []>} : vector<1x11xf32>, vector<11x256xf32>, vector<1x256xf32> -> vector<1x256xf32>
    %c80_i32 = arith.constant 80 : i32
    %167 = tpu.dynamic_rotate %149 by %c80_i32 dim 1 : vector<4x256xf32>, i32 -> vector<4x256xf32>
    %168 = vector.broadcast %166 : vector<1x256xf32> to vector<4x256xf32>
    %169 = arith.mulf %167, %168 : vector<4x256xf32>
    %170 = arith.addf %163, %169 : vector<4x256xf32>
    %c1_85 = arith.constant 1 : index
    %c0_86 = arith.constant 0 : index
    %c0_87 = arith.constant 0 : index
    %171 = vector.load %arg8[%c1_85, %c0_86, %c0_87] : memref<11x11x256xf32, #tpu.memory_space<vmem>>, vector<1x11x256xf32>
    %172 = vector.shape_cast %171 : vector<1x11x256xf32> to vector<11x256xf32>
    %cst_88 = arith.constant dense<0.000000e+00> : vector<1x256xf32>
    %173 = tpu.matmul %162, %172, %cst_88 {dimension_numbers = #tpu.dot_dimension_numbers<[1], [0], [0], [1], [0, 0, 1, 1], [], []>} : vector<1x11xf32>, vector<11x256xf32>, vector<1x256xf32> -> vector<1x256xf32>
    %c64_i32 = arith.constant 64 : i32
    %174 = tpu.dynamic_rotate %149 by %c64_i32 dim 1 : vector<4x256xf32>, i32 -> vector<4x256xf32>
    %175 = vector.broadcast %173 : vector<1x256xf32> to vector<4x256xf32>
    %176 = arith.mulf %174, %175 : vector<4x256xf32>
    %177 = arith.addf %170, %176 : vector<4x256xf32>
    %c2_89 = arith.constant 2 : index
    %c0_90 = arith.constant 0 : index
    %c0_91 = arith.constant 0 : index
    %178 = vector.load %arg8[%c2_89, %c0_90, %c0_91] : memref<11x11x256xf32, #tpu.memory_space<vmem>>, vector<1x11x256xf32>
    %179 = vector.shape_cast %178 : vector<1x11x256xf32> to vector<11x256xf32>
    %cst_92 = arith.constant dense<0.000000e+00> : vector<1x256xf32>
    %180 = tpu.matmul %162, %179, %cst_92 {dimension_numbers = #tpu.dot_dimension_numbers<[1], [0], [0], [1], [0, 0, 1, 1], [], []>} : vector<1x11xf32>, vector<11x256xf32>, vector<1x256xf32> -> vector<1x256xf32>
    %c48_i32 = arith.constant 48 : i32
    %181 = tpu.dynamic_rotate %149 by %c48_i32 dim 1 : vector<4x256xf32>, i32 -> vector<4x256xf32>
    %182 = vector.broadcast %180 : vector<1x256xf32> to vector<4x256xf32>
    %183 = arith.mulf %181, %182 : vector<4x256xf32>
    %184 = arith.addf %177, %183 : vector<4x256xf32>
    %c3_93 = arith.constant 3 : index
    %c0_94 = arith.constant 0 : index
    %c0_95 = arith.constant 0 : index
    %185 = vector.load %arg8[%c3_93, %c0_94, %c0_95] : memref<11x11x256xf32, #tpu.memory_space<vmem>>, vector<1x11x256xf32>
    %186 = vector.shape_cast %185 : vector<1x11x256xf32> to vector<11x256xf32>
    %cst_96 = arith.constant dense<0.000000e+00> : vector<1x256xf32>
    %187 = tpu.matmul %162, %186, %cst_96 {dimension_numbers = #tpu.dot_dimension_numbers<[1], [0], [0], [1], [0, 0, 1, 1], [], []>} : vector<1x11xf32>, vector<11x256xf32>, vector<1x256xf32> -> vector<1x256xf32>
    %c32_i32 = arith.constant 32 : i32
    %188 = tpu.dynamic_rotate %149 by %c32_i32 dim 1 : vector<4x256xf32>, i32 -> vector<4x256xf32>
    %189 = vector.broadcast %187 : vector<1x256xf32> to vector<4x256xf32>
    %190 = arith.mulf %188, %189 : vector<4x256xf32>
    %191 = arith.addf %184, %190 : vector<4x256xf32>
    %c4_97 = arith.constant 4 : index
    %c0_98 = arith.constant 0 : index
    %c0_99 = arith.constant 0 : index
    %192 = vector.load %arg8[%c4_97, %c0_98, %c0_99] : memref<11x11x256xf32, #tpu.memory_space<vmem>>, vector<1x11x256xf32>
    %193 = vector.shape_cast %192 : vector<1x11x256xf32> to vector<11x256xf32>
    %cst_100 = arith.constant dense<0.000000e+00> : vector<1x256xf32>
    %194 = tpu.matmul %162, %193, %cst_100 {dimension_numbers = #tpu.dot_dimension_numbers<[1], [0], [0], [1], [0, 0, 1, 1], [], []>} : vector<1x11xf32>, vector<11x256xf32>, vector<1x256xf32> -> vector<1x256xf32>
    %c16_i32_101 = arith.constant 16 : i32
    %195 = tpu.dynamic_rotate %149 by %c16_i32_101 dim 1 : vector<4x256xf32>, i32 -> vector<4x256xf32>
    %196 = vector.broadcast %194 : vector<1x256xf32> to vector<4x256xf32>
    %197 = arith.mulf %195, %196 : vector<4x256xf32>
    %198 = arith.addf %191, %197 : vector<4x256xf32>
    %c5_102 = arith.constant 5 : index
    %c0_103 = arith.constant 0 : index
    %c0_104 = arith.constant 0 : index
    %199 = vector.load %arg8[%c5_102, %c0_103, %c0_104] : memref<11x11x256xf32, #tpu.memory_space<vmem>>, vector<1x11x256xf32>
    %200 = vector.shape_cast %199 : vector<1x11x256xf32> to vector<11x256xf32>
    %cst_105 = arith.constant dense<0.000000e+00> : vector<1x256xf32>
    %201 = tpu.matmul %162, %200, %cst_105 {dimension_numbers = #tpu.dot_dimension_numbers<[1], [0], [0], [1], [0, 0, 1, 1], [], []>} : vector<1x11xf32>, vector<11x256xf32>, vector<1x256xf32> -> vector<1x256xf32>
    %202 = vector.broadcast %201 : vector<1x256xf32> to vector<4x256xf32>
    %203 = arith.mulf %149, %202 : vector<4x256xf32>
    %204 = arith.addf %198, %203 : vector<4x256xf32>
    %c6_106 = arith.constant 6 : index
    %c0_107 = arith.constant 0 : index
    %c0_108 = arith.constant 0 : index
    %205 = vector.load %arg8[%c6_106, %c0_107, %c0_108] : memref<11x11x256xf32, #tpu.memory_space<vmem>>, vector<1x11x256xf32>
    %206 = vector.shape_cast %205 : vector<1x11x256xf32> to vector<11x256xf32>
    %cst_109 = arith.constant dense<0.000000e+00> : vector<1x256xf32>
    %207 = tpu.matmul %162, %206, %cst_109 {dimension_numbers = #tpu.dot_dimension_numbers<[1], [0], [0], [1], [0, 0, 1, 1], [], []>} : vector<1x11xf32>, vector<11x256xf32>, vector<1x256xf32> -> vector<1x256xf32>
    %c240_i32_110 = arith.constant 240 : i32
    %208 = tpu.dynamic_rotate %149 by %c240_i32_110 dim 1 : vector<4x256xf32>, i32 -> vector<4x256xf32>
    %209 = vector.broadcast %207 : vector<1x256xf32> to vector<4x256xf32>
    %210 = arith.mulf %208, %209 : vector<4x256xf32>
    %211 = arith.addf %204, %210 : vector<4x256xf32>
    %c7_111 = arith.constant 7 : index
    %c0_112 = arith.constant 0 : index
    %c0_113 = arith.constant 0 : index
    %212 = vector.load %arg8[%c7_111, %c0_112, %c0_113] : memref<11x11x256xf32, #tpu.memory_space<vmem>>, vector<1x11x256xf32>
    %213 = vector.shape_cast %212 : vector<1x11x256xf32> to vector<11x256xf32>
    %cst_114 = arith.constant dense<0.000000e+00> : vector<1x256xf32>
    %214 = tpu.matmul %162, %213, %cst_114 {dimension_numbers = #tpu.dot_dimension_numbers<[1], [0], [0], [1], [0, 0, 1, 1], [], []>} : vector<1x11xf32>, vector<11x256xf32>, vector<1x256xf32> -> vector<1x256xf32>
    %c224_i32 = arith.constant 224 : i32
    %215 = tpu.dynamic_rotate %149 by %c224_i32 dim 1 : vector<4x256xf32>, i32 -> vector<4x256xf32>
    %216 = vector.broadcast %214 : vector<1x256xf32> to vector<4x256xf32>
    %217 = arith.mulf %215, %216 : vector<4x256xf32>
    %218 = arith.addf %211, %217 : vector<4x256xf32>
    %c8_115 = arith.constant 8 : index
    %c0_116 = arith.constant 0 : index
    %c0_117 = arith.constant 0 : index
    %219 = vector.load %arg8[%c8_115, %c0_116, %c0_117] : memref<11x11x256xf32, #tpu.memory_space<vmem>>, vector<1x11x256xf32>
    %220 = vector.shape_cast %219 : vector<1x11x256xf32> to vector<11x256xf32>
    %cst_118 = arith.constant dense<0.000000e+00> : vector<1x256xf32>
    %221 = tpu.matmul %162, %220, %cst_118 {dimension_numbers = #tpu.dot_dimension_numbers<[1], [0], [0], [1], [0, 0, 1, 1], [], []>} : vector<1x11xf32>, vector<11x256xf32>, vector<1x256xf32> -> vector<1x256xf32>
    %c208_i32 = arith.constant 208 : i32
    %222 = tpu.dynamic_rotate %149 by %c208_i32 dim 1 : vector<4x256xf32>, i32 -> vector<4x256xf32>
    %223 = vector.broadcast %221 : vector<1x256xf32> to vector<4x256xf32>
    %224 = arith.mulf %222, %223 : vector<4x256xf32>
    %225 = arith.addf %218, %224 : vector<4x256xf32>
    %c9_119 = arith.constant 9 : index
    %c0_120 = arith.constant 0 : index
    %c0_121 = arith.constant 0 : index
    %226 = vector.load %arg8[%c9_119, %c0_120, %c0_121] : memref<11x11x256xf32, #tpu.memory_space<vmem>>, vector<1x11x256xf32>
    %227 = vector.shape_cast %226 : vector<1x11x256xf32> to vector<11x256xf32>
    %cst_122 = arith.constant dense<0.000000e+00> : vector<1x256xf32>
    %228 = tpu.matmul %162, %227, %cst_122 {dimension_numbers = #tpu.dot_dimension_numbers<[1], [0], [0], [1], [0, 0, 1, 1], [], []>} : vector<1x11xf32>, vector<11x256xf32>, vector<1x256xf32> -> vector<1x256xf32>
    %c192_i32 = arith.constant 192 : i32
    %229 = tpu.dynamic_rotate %149 by %c192_i32 dim 1 : vector<4x256xf32>, i32 -> vector<4x256xf32>
    %230 = vector.broadcast %228 : vector<1x256xf32> to vector<4x256xf32>
    %231 = arith.mulf %229, %230 : vector<4x256xf32>
    %232 = arith.addf %225, %231 : vector<4x256xf32>
    %c10_123 = arith.constant 10 : index
    %c0_124 = arith.constant 0 : index
    %c0_125 = arith.constant 0 : index
    %233 = vector.load %arg8[%c10_123, %c0_124, %c0_125] : memref<11x11x256xf32, #tpu.memory_space<vmem>>, vector<1x11x256xf32>
    %234 = vector.shape_cast %233 : vector<1x11x256xf32> to vector<11x256xf32>
    %cst_126 = arith.constant dense<0.000000e+00> : vector<1x256xf32>
    %235 = tpu.matmul %162, %234, %cst_126 {dimension_numbers = #tpu.dot_dimension_numbers<[1], [0], [0], [1], [0, 0, 1, 1], [], []>} : vector<1x11xf32>, vector<11x256xf32>, vector<1x256xf32> -> vector<1x256xf32>
    %c176_i32 = arith.constant 176 : i32
    %236 = tpu.dynamic_rotate %149 by %c176_i32 dim 1 : vector<4x256xf32>, i32 -> vector<4x256xf32>
    %237 = vector.broadcast %235 : vector<1x256xf32> to vector<4x256xf32>
    %238 = arith.mulf %236, %237 : vector<4x256xf32>
    %239 = arith.addf %232, %238 : vector<4x256xf32>
    %240 = vector.broadcast %58 : vector<4x1xf32> to vector<4x256xf32>
    %241 = arith.mulf %240, %239 : vector<4x256xf32>
    %242 = vector.broadcast %59 : vector<4x1xf32> to vector<4x256xf32>
    %243 = arith.mulf %242, %55 : vector<4x256xf32>
    %244 = arith.addf %241, %243 : vector<4x256xf32>
    %245 = vector.extract_strided_slice %51 {offsets = [4, 0], sizes = [4, 256], strides = [1, 1]} : vector<8x256xf32> to vector<4x256xf32>
    %246 = vector.extract_strided_slice %54 {offsets = [0, 22], sizes = [4, 7], strides = [1, 1]} : vector<4x36xf32> to vector<4x7xf32>
    %247 = vector.extract_strided_slice %54 {offsets = [0, 29], sizes = [4, 7], strides = [1, 1]} : vector<4x36xf32> to vector<4x7xf32>
    %248 = vector.extract_strided_slice %52 {offsets = [4, 0], sizes = [4, 1], strides = [1, 1]} : vector<8x1xf32> to vector<4x1xf32>
    %249 = vector.extract_strided_slice %53 {offsets = [4, 0], sizes = [4, 1], strides = [1, 1]} : vector<8x1xf32> to vector<4x1xf32>
    %cst_127 = arith.constant dense<0.000000e+00> : vector<4xf32>
    %250 = vector.multi_reduction <add>, %245, %cst_127 [1] : vector<4x256xf32> to vector<4xf32>
    %251 = vector.shape_cast %250 : vector<4xf32> to vector<4x1xf32>
    %cst_128 = arith.constant 3.906250e-03 : f32
    %252 = vector.broadcast %cst_128 : f32 to vector<4x1xf32>
    %253 = arith.mulf %251, %252 : vector<4x1xf32>
    %254 = vector.broadcast %253 : vector<4x1xf32> to vector<4x7xf32>
    %255 = arith.mulf %254, %246 : vector<4x7xf32>
    %cst_129 = arith.constant dense<0.000000e+00> : vector<7xf32>
    %256 = vector.multi_reduction <add>, %255, %cst_129 [0] : vector<4x7xf32> to vector<7xf32>
    %257 = vector.shape_cast %256 : vector<7xf32> to vector<1x7xf32>
    %258 = arith.negf %257 : vector<1x7xf32>
    %259 = math.exp %258 : vector<1x7xf32>
    %cst_130 = arith.constant 1.000000e+00 : f32
    %260 = vector.broadcast %cst_130 : f32 to vector<1x7xf32>
    %261 = arith.addf %260, %259 : vector<1x7xf32>
    %262 = arith.divf %260, %261 : vector<1x7xf32>
    %cst_131 = arith.constant 0.000000e+00 : f32
    %263 = vector.broadcast %cst_131 : f32 to vector<4x256xf32>
    %c0_132 = arith.constant 0 : index
    %c0_133 = arith.constant 0 : index
    %c0_134 = arith.constant 0 : index
    %264 = vector.load %arg9[%c0_132, %c0_133, %c0_134] : memref<7x7x256xf32, #tpu.memory_space<vmem>>, vector<1x7x256xf32>
    %265 = vector.shape_cast %264 : vector<1x7x256xf32> to vector<7x256xf32>
    %cst_135 = arith.constant dense<0.000000e+00> : vector<1x256xf32>
    %266 = tpu.matmul %262, %265, %cst_135 {dimension_numbers = #tpu.dot_dimension_numbers<[1], [0], [0], [1], [0, 0, 1, 1], [], []>} : vector<1x7xf32>, vector<7x256xf32>, vector<1x256xf32> -> vector<1x256xf32>
    %c3_i32_136 = arith.constant 3 : i32
    %267 = tpu.dynamic_rotate %245 by %c3_i32_136 dim 1 : vector<4x256xf32>, i32 -> vector<4x256xf32>
    %268 = vector.broadcast %266 : vector<1x256xf32> to vector<4x256xf32>
    %269 = arith.mulf %267, %268 : vector<4x256xf32>
    %270 = arith.addf %263, %269 : vector<4x256xf32>
    %c1_137 = arith.constant 1 : index
    %c0_138 = arith.constant 0 : index
    %c0_139 = arith.constant 0 : index
    %271 = vector.load %arg9[%c1_137, %c0_138, %c0_139] : memref<7x7x256xf32, #tpu.memory_space<vmem>>, vector<1x7x256xf32>
    %272 = vector.shape_cast %271 : vector<1x7x256xf32> to vector<7x256xf32>
    %cst_140 = arith.constant dense<0.000000e+00> : vector<1x256xf32>
    %273 = tpu.matmul %262, %272, %cst_140 {dimension_numbers = #tpu.dot_dimension_numbers<[1], [0], [0], [1], [0, 0, 1, 1], [], []>} : vector<1x7xf32>, vector<7x256xf32>, vector<1x256xf32> -> vector<1x256xf32>
    %c2_i32_141 = arith.constant 2 : i32
    %274 = tpu.dynamic_rotate %245 by %c2_i32_141 dim 1 : vector<4x256xf32>, i32 -> vector<4x256xf32>
    %275 = vector.broadcast %273 : vector<1x256xf32> to vector<4x256xf32>
    %276 = arith.mulf %274, %275 : vector<4x256xf32>
    %277 = arith.addf %270, %276 : vector<4x256xf32>
    %c2_142 = arith.constant 2 : index
    %c0_143 = arith.constant 0 : index
    %c0_144 = arith.constant 0 : index
    %278 = vector.load %arg9[%c2_142, %c0_143, %c0_144] : memref<7x7x256xf32, #tpu.memory_space<vmem>>, vector<1x7x256xf32>
    %279 = vector.shape_cast %278 : vector<1x7x256xf32> to vector<7x256xf32>
    %cst_145 = arith.constant dense<0.000000e+00> : vector<1x256xf32>
    %280 = tpu.matmul %262, %279, %cst_145 {dimension_numbers = #tpu.dot_dimension_numbers<[1], [0], [0], [1], [0, 0, 1, 1], [], []>} : vector<1x7xf32>, vector<7x256xf32>, vector<1x256xf32> -> vector<1x256xf32>
    %c1_i32_146 = arith.constant 1 : i32
    %281 = tpu.dynamic_rotate %245 by %c1_i32_146 dim 1 : vector<4x256xf32>, i32 -> vector<4x256xf32>
    %282 = vector.broadcast %280 : vector<1x256xf32> to vector<4x256xf32>
    %283 = arith.mulf %281, %282 : vector<4x256xf32>
    %284 = arith.addf %277, %283 : vector<4x256xf32>
    %c3_147 = arith.constant 3 : index
    %c0_148 = arith.constant 0 : index
    %c0_149 = arith.constant 0 : index
    %285 = vector.load %arg9[%c3_147, %c0_148, %c0_149] : memref<7x7x256xf32, #tpu.memory_space<vmem>>, vector<1x7x256xf32>
    %286 = vector.shape_cast %285 : vector<1x7x256xf32> to vector<7x256xf32>
    %cst_150 = arith.constant dense<0.000000e+00> : vector<1x256xf32>
    %287 = tpu.matmul %262, %286, %cst_150 {dimension_numbers = #tpu.dot_dimension_numbers<[1], [0], [0], [1], [0, 0, 1, 1], [], []>} : vector<1x7xf32>, vector<7x256xf32>, vector<1x256xf32> -> vector<1x256xf32>
    %288 = vector.broadcast %287 : vector<1x256xf32> to vector<4x256xf32>
    %289 = arith.mulf %245, %288 : vector<4x256xf32>
    %290 = arith.addf %284, %289 : vector<4x256xf32>
    %c4_151 = arith.constant 4 : index
    %c0_152 = arith.constant 0 : index
    %c0_153 = arith.constant 0 : index
    %291 = vector.load %arg9[%c4_151, %c0_152, %c0_153] : memref<7x7x256xf32, #tpu.memory_space<vmem>>, vector<1x7x256xf32>
    %292 = vector.shape_cast %291 : vector<1x7x256xf32> to vector<7x256xf32>
    %cst_154 = arith.constant dense<0.000000e+00> : vector<1x256xf32>
    %293 = tpu.matmul %262, %292, %cst_154 {dimension_numbers = #tpu.dot_dimension_numbers<[1], [0], [0], [1], [0, 0, 1, 1], [], []>} : vector<1x7xf32>, vector<7x256xf32>, vector<1x256xf32> -> vector<1x256xf32>
    %c255_i32_155 = arith.constant 255 : i32
    %294 = tpu.dynamic_rotate %245 by %c255_i32_155 dim 1 : vector<4x256xf32>, i32 -> vector<4x256xf32>
    %295 = vector.broadcast %293 : vector<1x256xf32> to vector<4x256xf32>
    %296 = arith.mulf %294, %295 : vector<4x256xf32>
    %297 = arith.addf %290, %296 : vector<4x256xf32>
    %c5_156 = arith.constant 5 : index
    %c0_157 = arith.constant 0 : index
    %c0_158 = arith.constant 0 : index
    %298 = vector.load %arg9[%c5_156, %c0_157, %c0_158] : memref<7x7x256xf32, #tpu.memory_space<vmem>>, vector<1x7x256xf32>
    %299 = vector.shape_cast %298 : vector<1x7x256xf32> to vector<7x256xf32>
    %cst_159 = arith.constant dense<0.000000e+00> : vector<1x256xf32>
    %300 = tpu.matmul %262, %299, %cst_159 {dimension_numbers = #tpu.dot_dimension_numbers<[1], [0], [0], [1], [0, 0, 1, 1], [], []>} : vector<1x7xf32>, vector<7x256xf32>, vector<1x256xf32> -> vector<1x256xf32>
    %c254_i32_160 = arith.constant 254 : i32
    %301 = tpu.dynamic_rotate %245 by %c254_i32_160 dim 1 : vector<4x256xf32>, i32 -> vector<4x256xf32>
    %302 = vector.broadcast %300 : vector<1x256xf32> to vector<4x256xf32>
    %303 = arith.mulf %301, %302 : vector<4x256xf32>
    %304 = arith.addf %297, %303 : vector<4x256xf32>
    %c6_161 = arith.constant 6 : index
    %c0_162 = arith.constant 0 : index
    %c0_163 = arith.constant 0 : index
    %305 = vector.load %arg9[%c6_161, %c0_162, %c0_163] : memref<7x7x256xf32, #tpu.memory_space<vmem>>, vector<1x7x256xf32>
    %306 = vector.shape_cast %305 : vector<1x7x256xf32> to vector<7x256xf32>
    %cst_164 = arith.constant dense<0.000000e+00> : vector<1x256xf32>
    %307 = tpu.matmul %262, %306, %cst_164 {dimension_numbers = #tpu.dot_dimension_numbers<[1], [0], [0], [1], [0, 0, 1, 1], [], []>} : vector<1x7xf32>, vector<7x256xf32>, vector<1x256xf32> -> vector<1x256xf32>
    %c253_i32_165 = arith.constant 253 : i32
    %308 = tpu.dynamic_rotate %245 by %c253_i32_165 dim 1 : vector<4x256xf32>, i32 -> vector<4x256xf32>
    %309 = vector.broadcast %307 : vector<1x256xf32> to vector<4x256xf32>
    %310 = arith.mulf %308, %309 : vector<4x256xf32>
    %311 = arith.addf %304, %310 : vector<4x256xf32>
    %cst_166 = arith.constant dense<0.000000e+00> : vector<4xf32>
    %312 = vector.multi_reduction <add>, %311, %cst_166 [1] : vector<4x256xf32> to vector<4xf32>
    %313 = vector.shape_cast %312 : vector<4xf32> to vector<4x1xf32>
    %cst_167 = arith.constant 3.906250e-03 : f32
    %314 = vector.broadcast %cst_167 : f32 to vector<4x1xf32>
    %315 = arith.mulf %313, %314 : vector<4x1xf32>
    %316 = vector.broadcast %315 : vector<4x1xf32> to vector<4x7xf32>
    %317 = arith.mulf %316, %247 : vector<4x7xf32>
    %cst_168 = arith.constant dense<0.000000e+00> : vector<7xf32>
    %318 = vector.multi_reduction <add>, %317, %cst_168 [0] : vector<4x7xf32> to vector<7xf32>
    %319 = vector.shape_cast %318 : vector<7xf32> to vector<1x7xf32>
    %320 = arith.negf %319 : vector<1x7xf32>
    %321 = math.exp %320 : vector<1x7xf32>
    %cst_169 = arith.constant 1.000000e+00 : f32
    %322 = vector.broadcast %cst_169 : f32 to vector<1x7xf32>
    %323 = arith.addf %322, %321 : vector<1x7xf32>
    %324 = arith.divf %322, %323 : vector<1x7xf32>
    %cst_170 = arith.constant 0.000000e+00 : f32
    %325 = vector.broadcast %cst_170 : f32 to vector<4x256xf32>
    %c0_171 = arith.constant 0 : index
    %c0_172 = arith.constant 0 : index
    %c0_173 = arith.constant 0 : index
    %326 = vector.load %arg10[%c0_171, %c0_172, %c0_173] : memref<7x7x256xf32, #tpu.memory_space<vmem>>, vector<1x7x256xf32>
    %327 = vector.shape_cast %326 : vector<1x7x256xf32> to vector<7x256xf32>
    %cst_174 = arith.constant dense<0.000000e+00> : vector<1x256xf32>
    %328 = tpu.matmul %324, %327, %cst_174 {dimension_numbers = #tpu.dot_dimension_numbers<[1], [0], [0], [1], [0, 0, 1, 1], [], []>} : vector<1x7xf32>, vector<7x256xf32>, vector<1x256xf32> -> vector<1x256xf32>
    %c48_i32_175 = arith.constant 48 : i32
    %329 = tpu.dynamic_rotate %311 by %c48_i32_175 dim 1 : vector<4x256xf32>, i32 -> vector<4x256xf32>
    %330 = vector.broadcast %328 : vector<1x256xf32> to vector<4x256xf32>
    %331 = arith.mulf %329, %330 : vector<4x256xf32>
    %332 = arith.addf %325, %331 : vector<4x256xf32>
    %c1_176 = arith.constant 1 : index
    %c0_177 = arith.constant 0 : index
    %c0_178 = arith.constant 0 : index
    %333 = vector.load %arg10[%c1_176, %c0_177, %c0_178] : memref<7x7x256xf32, #tpu.memory_space<vmem>>, vector<1x7x256xf32>
    %334 = vector.shape_cast %333 : vector<1x7x256xf32> to vector<7x256xf32>
    %cst_179 = arith.constant dense<0.000000e+00> : vector<1x256xf32>
    %335 = tpu.matmul %324, %334, %cst_179 {dimension_numbers = #tpu.dot_dimension_numbers<[1], [0], [0], [1], [0, 0, 1, 1], [], []>} : vector<1x7xf32>, vector<7x256xf32>, vector<1x256xf32> -> vector<1x256xf32>
    %c32_i32_180 = arith.constant 32 : i32
    %336 = tpu.dynamic_rotate %311 by %c32_i32_180 dim 1 : vector<4x256xf32>, i32 -> vector<4x256xf32>
    %337 = vector.broadcast %335 : vector<1x256xf32> to vector<4x256xf32>
    %338 = arith.mulf %336, %337 : vector<4x256xf32>
    %339 = arith.addf %332, %338 : vector<4x256xf32>
    %c2_181 = arith.constant 2 : index
    %c0_182 = arith.constant 0 : index
    %c0_183 = arith.constant 0 : index
    %340 = vector.load %arg10[%c2_181, %c0_182, %c0_183] : memref<7x7x256xf32, #tpu.memory_space<vmem>>, vector<1x7x256xf32>
    %341 = vector.shape_cast %340 : vector<1x7x256xf32> to vector<7x256xf32>
    %cst_184 = arith.constant dense<0.000000e+00> : vector<1x256xf32>
    %342 = tpu.matmul %324, %341, %cst_184 {dimension_numbers = #tpu.dot_dimension_numbers<[1], [0], [0], [1], [0, 0, 1, 1], [], []>} : vector<1x7xf32>, vector<7x256xf32>, vector<1x256xf32> -> vector<1x256xf32>
    %c16_i32_185 = arith.constant 16 : i32
    %343 = tpu.dynamic_rotate %311 by %c16_i32_185 dim 1 : vector<4x256xf32>, i32 -> vector<4x256xf32>
    %344 = vector.broadcast %342 : vector<1x256xf32> to vector<4x256xf32>
    %345 = arith.mulf %343, %344 : vector<4x256xf32>
    %346 = arith.addf %339, %345 : vector<4x256xf32>
    %c3_186 = arith.constant 3 : index
    %c0_187 = arith.constant 0 : index
    %c0_188 = arith.constant 0 : index
    %347 = vector.load %arg10[%c3_186, %c0_187, %c0_188] : memref<7x7x256xf32, #tpu.memory_space<vmem>>, vector<1x7x256xf32>
    %348 = vector.shape_cast %347 : vector<1x7x256xf32> to vector<7x256xf32>
    %cst_189 = arith.constant dense<0.000000e+00> : vector<1x256xf32>
    %349 = tpu.matmul %324, %348, %cst_189 {dimension_numbers = #tpu.dot_dimension_numbers<[1], [0], [0], [1], [0, 0, 1, 1], [], []>} : vector<1x7xf32>, vector<7x256xf32>, vector<1x256xf32> -> vector<1x256xf32>
    %350 = vector.broadcast %349 : vector<1x256xf32> to vector<4x256xf32>
    %351 = arith.mulf %311, %350 : vector<4x256xf32>
    %352 = arith.addf %346, %351 : vector<4x256xf32>
    %c4_190 = arith.constant 4 : index
    %c0_191 = arith.constant 0 : index
    %c0_192 = arith.constant 0 : index
    %353 = vector.load %arg10[%c4_190, %c0_191, %c0_192] : memref<7x7x256xf32, #tpu.memory_space<vmem>>, vector<1x7x256xf32>
    %354 = vector.shape_cast %353 : vector<1x7x256xf32> to vector<7x256xf32>
    %cst_193 = arith.constant dense<0.000000e+00> : vector<1x256xf32>
    %355 = tpu.matmul %324, %354, %cst_193 {dimension_numbers = #tpu.dot_dimension_numbers<[1], [0], [0], [1], [0, 0, 1, 1], [], []>} : vector<1x7xf32>, vector<7x256xf32>, vector<1x256xf32> -> vector<1x256xf32>
    %c240_i32_194 = arith.constant 240 : i32
    %356 = tpu.dynamic_rotate %311 by %c240_i32_194 dim 1 : vector<4x256xf32>, i32 -> vector<4x256xf32>
    %357 = vector.broadcast %355 : vector<1x256xf32> to vector<4x256xf32>
    %358 = arith.mulf %356, %357 : vector<4x256xf32>
    %359 = arith.addf %352, %358 : vector<4x256xf32>
    %c5_195 = arith.constant 5 : index
    %c0_196 = arith.constant 0 : index
    %c0_197 = arith.constant 0 : index
    %360 = vector.load %arg10[%c5_195, %c0_196, %c0_197] : memref<7x7x256xf32, #tpu.memory_space<vmem>>, vector<1x7x256xf32>
    %361 = vector.shape_cast %360 : vector<1x7x256xf32> to vector<7x256xf32>
    %cst_198 = arith.constant dense<0.000000e+00> : vector<1x256xf32>
    %362 = tpu.matmul %324, %361, %cst_198 {dimension_numbers = #tpu.dot_dimension_numbers<[1], [0], [0], [1], [0, 0, 1, 1], [], []>} : vector<1x7xf32>, vector<7x256xf32>, vector<1x256xf32> -> vector<1x256xf32>
    %c224_i32_199 = arith.constant 224 : i32
    %363 = tpu.dynamic_rotate %311 by %c224_i32_199 dim 1 : vector<4x256xf32>, i32 -> vector<4x256xf32>
    %364 = vector.broadcast %362 : vector<1x256xf32> to vector<4x256xf32>
    %365 = arith.mulf %363, %364 : vector<4x256xf32>
    %366 = arith.addf %359, %365 : vector<4x256xf32>
    %c6_200 = arith.constant 6 : index
    %c0_201 = arith.constant 0 : index
    %c0_202 = arith.constant 0 : index
    %367 = vector.load %arg10[%c6_200, %c0_201, %c0_202] : memref<7x7x256xf32, #tpu.memory_space<vmem>>, vector<1x7x256xf32>
    %368 = vector.shape_cast %367 : vector<1x7x256xf32> to vector<7x256xf32>
    %cst_203 = arith.constant dense<0.000000e+00> : vector<1x256xf32>
    %369 = tpu.matmul %324, %368, %cst_203 {dimension_numbers = #tpu.dot_dimension_numbers<[1], [0], [0], [1], [0, 0, 1, 1], [], []>} : vector<1x7xf32>, vector<7x256xf32>, vector<1x256xf32> -> vector<1x256xf32>
    %c208_i32_204 = arith.constant 208 : i32
    %370 = tpu.dynamic_rotate %311 by %c208_i32_204 dim 1 : vector<4x256xf32>, i32 -> vector<4x256xf32>
    %371 = vector.broadcast %369 : vector<1x256xf32> to vector<4x256xf32>
    %372 = arith.mulf %370, %371 : vector<4x256xf32>
    %373 = arith.addf %366, %372 : vector<4x256xf32>
    %374 = vector.broadcast %248 : vector<4x1xf32> to vector<4x256xf32>
    %375 = arith.mulf %374, %373 : vector<4x256xf32>
    %376 = vector.broadcast %249 : vector<4x1xf32> to vector<4x256xf32>
    %377 = arith.mulf %376, %245 : vector<4x256xf32>
    %378 = arith.addf %375, %377 : vector<4x256xf32>
    %379 = tpu.concatenate %244, %378 in 0 : vector<4x256xf32>, vector<4x256xf32> -> vector<8x256xf32>
    %c17_i32_205 = arith.constant 17 : i32
    %380 = tpu.dynamic_rotate %379 by %c17_i32_205 dim 1 : vector<8x256xf32>, i32 -> vector<8x256xf32>
    %c0_206 = arith.constant 0 : index
    %c0_207 = arith.constant 0 : index
    %381 = vector.load %arg5[%c0_206, %c0_207] : memref<9x256xf32, #tpu.memory_space<vmem>>, vector<1x256xf32>
    %382 = vector.broadcast %381 : vector<1x256xf32> to vector<8x256xf32>
    %383 = arith.mulf %380, %382 : vector<8x256xf32>
    %c16_i32_208 = arith.constant 16 : i32
    %384 = tpu.dynamic_rotate %379 by %c16_i32_208 dim 1 : vector<8x256xf32>, i32 -> vector<8x256xf32>
    %c1_209 = arith.constant 1 : index
    %c0_210 = arith.constant 0 : index
    %385 = vector.load %arg5[%c1_209, %c0_210] : memref<9x256xf32, #tpu.memory_space<vmem>>, vector<1x256xf32>
    %386 = vector.broadcast %385 : vector<1x256xf32> to vector<8x256xf32>
    %387 = arith.mulf %384, %386 : vector<8x256xf32>
    %c15_i32_211 = arith.constant 15 : i32
    %388 = tpu.dynamic_rotate %379 by %c15_i32_211 dim 1 : vector<8x256xf32>, i32 -> vector<8x256xf32>
    %c2_212 = arith.constant 2 : index
    %c0_213 = arith.constant 0 : index
    %389 = vector.load %arg5[%c2_212, %c0_213] : memref<9x256xf32, #tpu.memory_space<vmem>>, vector<1x256xf32>
    %390 = vector.broadcast %389 : vector<1x256xf32> to vector<8x256xf32>
    %391 = arith.mulf %388, %390 : vector<8x256xf32>
    %c1_i32_214 = arith.constant 1 : i32
    %392 = tpu.dynamic_rotate %379 by %c1_i32_214 dim 1 : vector<8x256xf32>, i32 -> vector<8x256xf32>
    %c3_215 = arith.constant 3 : index
    %c0_216 = arith.constant 0 : index
    %393 = vector.load %arg5[%c3_215, %c0_216] : memref<9x256xf32, #tpu.memory_space<vmem>>, vector<1x256xf32>
    %394 = vector.broadcast %393 : vector<1x256xf32> to vector<8x256xf32>
    %395 = arith.mulf %392, %394 : vector<8x256xf32>
    %c4_217 = arith.constant 4 : index
    %c0_218 = arith.constant 0 : index
    %396 = vector.load %arg5[%c4_217, %c0_218] : memref<9x256xf32, #tpu.memory_space<vmem>>, vector<1x256xf32>
    %397 = vector.broadcast %396 : vector<1x256xf32> to vector<8x256xf32>
    %398 = arith.mulf %379, %397 : vector<8x256xf32>
    %c255_i32_219 = arith.constant 255 : i32
    %399 = tpu.dynamic_rotate %379 by %c255_i32_219 dim 1 : vector<8x256xf32>, i32 -> vector<8x256xf32>
    %c5_220 = arith.constant 5 : index
    %c0_221 = arith.constant 0 : index
    %400 = vector.load %arg5[%c5_220, %c0_221] : memref<9x256xf32, #tpu.memory_space<vmem>>, vector<1x256xf32>
    %401 = vector.broadcast %400 : vector<1x256xf32> to vector<8x256xf32>
    %402 = arith.mulf %399, %401 : vector<8x256xf32>
    %c241_i32_222 = arith.constant 241 : i32
    %403 = tpu.dynamic_rotate %379 by %c241_i32_222 dim 1 : vector<8x256xf32>, i32 -> vector<8x256xf32>
    %c6_223 = arith.constant 6 : index
    %c0_224 = arith.constant 0 : index
    %404 = vector.load %arg5[%c6_223, %c0_224] : memref<9x256xf32, #tpu.memory_space<vmem>>, vector<1x256xf32>
    %405 = vector.broadcast %404 : vector<1x256xf32> to vector<8x256xf32>
    %406 = arith.mulf %403, %405 : vector<8x256xf32>
    %c240_i32_225 = arith.constant 240 : i32
    %407 = tpu.dynamic_rotate %379 by %c240_i32_225 dim 1 : vector<8x256xf32>, i32 -> vector<8x256xf32>
    %c7_226 = arith.constant 7 : index
    %c0_227 = arith.constant 0 : index
    %408 = vector.load %arg5[%c7_226, %c0_227] : memref<9x256xf32, #tpu.memory_space<vmem>>, vector<1x256xf32>
    %409 = vector.broadcast %408 : vector<1x256xf32> to vector<8x256xf32>
    %410 = arith.mulf %407, %409 : vector<8x256xf32>
    %c239_i32_228 = arith.constant 239 : i32
    %411 = tpu.dynamic_rotate %379 by %c239_i32_228 dim 1 : vector<8x256xf32>, i32 -> vector<8x256xf32>
    %c8_229 = arith.constant 8 : index
    %c0_230 = arith.constant 0 : index
    %412 = vector.load %arg5[%c8_229, %c0_230] : memref<9x256xf32, #tpu.memory_space<vmem>>, vector<1x256xf32>
    %413 = vector.broadcast %412 : vector<1x256xf32> to vector<8x256xf32>
    %414 = arith.mulf %411, %413 : vector<8x256xf32>
    %415 = tpu.concatenate %383, %387, %391, %395, %398, %402, %406, %410, %414 in 0 : vector<8x256xf32>, vector<8x256xf32>, vector<8x256xf32>, vector<8x256xf32>, vector<8x256xf32>, vector<8x256xf32>, vector<8x256xf32>, vector<8x256xf32>, vector<8x256xf32> -> vector<72x256xf32>
    %c0_231 = arith.constant 0 : index
    %c0_232 = arith.constant 0 : index
    %416 = vector.load %arg3[%c0_231, %c0_232] : memref<8x72xf32, #tpu.memory_space<vmem>>, vector<8x72xf32>
    %cst_233 = arith.constant dense<0.000000e+00> : vector<8x256xf32>
    %417 = tpu.matmul %416, %415, %cst_233 {dimension_numbers = #tpu.dot_dimension_numbers<[1], [0], [0], [1], [0, 0, 1, 1], [], []>} : vector<8x72xf32>, vector<72x256xf32>, vector<8x256xf32> -> vector<8x256xf32>
    %418 = vector.broadcast %3 : vector<8x1xf32> to vector<8x256xf32>
    %419 = arith.addf %417, %418 : vector<8x256xf32>
    %420 = arith.addf %419, %1 : vector<8x256xf32>
    %c0_234 = arith.constant 0 : index
    %c0_235 = arith.constant 0 : index
    %c0_236 = arith.constant 0 : index
    %421 = vector.load %arg11[%c0_234, %c0_235, %c0_236] : memref<1x8x256xf32, #tpu.memory_space<vmem>>, vector<1x8x256xf32>
    %422 = vector.shape_cast %421 : vector<1x8x256xf32> to vector<8x256xf32>
    %423 = vector.shape_cast %420 : vector<8x256xf32> to vector<1x8x256xf32>
    tpu.vector_store %arg11[%c0_234, %c0_235, %c0_236], %423 {strides = array<i32>} : memref<1x8x256xf32, #tpu.memory_space<vmem>>, vector<1x8x256xf32>,
    return
  }
  func.func @transform_0(%arg0: i32) -> (i32, i32, i32) {
    %c0_i32 = arith.constant 0 : i32
    %c0_i32_0 = arith.constant 0 : i32
    %c0_i32_1 = arith.constant 0 : i32
    return %arg0, %c0_i32, %c0_i32_0 : i32, i32, i32
  }
  func.func @transform_1(%arg0: i32) -> (i32, i32) {
    %c0_i32 = arith.constant 0 : i32
    %c0_i32_0 = arith.constant 0 : i32
    %c0_i32_1 = arith.constant 0 : i32
    return %c0_i32, %c0_i32_0 : i32, i32
  }
  func.func @transform_2(%arg0: i32) -> (i32, i32) {
    %c0_i32 = arith.constant 0 : i32
    %c0_i32_0 = arith.constant 0 : i32
    %c0_i32_1 = arith.constant 0 : i32
    return %c0_i32, %c0_i32_0 : i32, i32
  }
  func.func @transform_3(%arg0: i32) -> (i32, i32) {
    %c0_i32 = arith.constant 0 : i32
    %c0_i32_0 = arith.constant 0 : i32
    %c0_i32_1 = arith.constant 0 : i32
    return %c0_i32, %c0_i32_0 : i32, i32
  }
  func.func @transform_4(%arg0: i32) -> (i32, i32) {
    %c0_i32 = arith.constant 0 : i32
    %c0_i32_0 = arith.constant 0 : i32
    %c0_i32_1 = arith.constant 0 : i32
    return %c0_i32, %c0_i32_0 : i32, i32
  }
  func.func @transform_5(%arg0: i32) -> (i32, i32) {
    %c0_i32 = arith.constant 0 : i32
    %c0_i32_0 = arith.constant 0 : i32
    %c0_i32_1 = arith.constant 0 : i32
    return %c0_i32, %c0_i32_0 : i32, i32
  }
  func.func @transform_6(%arg0: i32) -> (i32, i32, i32) {
    %c0_i32 = arith.constant 0 : i32
    %c0_i32_0 = arith.constant 0 : i32
    %c0_i32_1 = arith.constant 0 : i32
    %c0_i32_2 = arith.constant 0 : i32
    return %c0_i32, %c0_i32_0, %c0_i32_1 : i32, i32, i32
  }
  func.func @transform_7(%arg0: i32) -> (i32, i32, i32) {
    %c0_i32 = arith.constant 0 : i32
    %c0_i32_0 = arith.constant 0 : i32
    %c0_i32_1 = arith.constant 0 : i32
    %c0_i32_2 = arith.constant 0 : i32
    return %c0_i32, %c0_i32_0, %c0_i32_1 : i32, i32, i32
  }
  func.func @transform_8(%arg0: i32) -> (i32, i32, i32) {
    %c0_i32 = arith.constant 0 : i32
    %c0_i32_0 = arith.constant 0 : i32
    %c0_i32_1 = arith.constant 0 : i32
    %c0_i32_2 = arith.constant 0 : i32
    return %c0_i32, %c0_i32_0, %c0_i32_1 : i32, i32, i32
  }
  func.func @transform_9(%arg0: i32) -> (i32, i32, i32) {
    %c0_i32 = arith.constant 0 : i32
    %c0_i32_0 = arith.constant 0 : i32
    %c0_i32_1 = arith.constant 0 : i32
    %c0_i32_2 = arith.constant 0 : i32
    return %c0_i32, %c0_i32_0, %c0_i32_1 : i32, i32, i32
  }
  func.func @transform_10(%arg0: i32) -> (i32, i32, i32) {
    %c0_i32 = arith.constant 0 : i32
    %c0_i32_0 = arith.constant 0 : i32
    %c0_i32_1 = arith.constant 0 : i32
    return %arg0, %c0_i32, %c0_i32_0 : i32, i32, i32
  }
}

</mosaic_0001>

<bundles_post_ra>
// kernel: tpu_custom_call.1
= control target key start
LH: loop header
LB: loop body
LE: loop exit
PB: predicated region body
PF: predicated region fallthrough
CT: control target
= control target key end

     0   :  { %s6760_s0 = inlined_call_operand.hbm [shape: f32[2,8,256], index: 0, kind: input, shape index: {}]   ;;  %s6761_s1 = inlined_call_operand.vmem [shape: f32[8,72], index: 1, kind: input, shape index: {}]   ;;  %s6762_s2 = inlined_call_operand.vmem [shape: f32[8,72], index: 2, kind: input, shape index: {}]   ;;  %s6763_s3 = inlined_call_operand.vmem [shape: f32[8,4], index: 3, kind: input, shape index: {}]   ;;  %s6764_s4 = inlined_call_operand.hbm [shape: f32[9,256], index: 4, kind: input, shape index: {}]   ;;  %s6765_s5 = inlined_call_operand.vmem [shape: f32[4,36], index: 5, kind: input, shape index: {}]   ;;  %s6766_s6 = inlined_call_operand.hbm [shape: f32[11,11,256], index: 6, kind: input, shape index: {}]   ;;  %s6767_s7 = inlined_call_operand.hbm [shape: f32[11,11,256], index: 7, kind: input, shape index: {}]   ;;  %s6768_s8 = inlined_call_operand.hbm [shape: f32[7,7,256], index: 8, kind: input, shape index: {}]   ;;  %s6769_s9 = inlined_call_operand.hbm [shape: f32[7,7,256], index: 9, kind: input, shape index: {}]   ;;  %s6770_s10 = inlined_call_operand.hbm [shape: f32[2,8,256], index: 10, kind: output, shape index: {}]  }
   0x1   :  { %6796 = sst [smem:[#allocation31_spill]] %s6762_s2 }
   0x2   :  { %6797 = sst [smem:[#allocation32_spill]] %s6764_s4 }
   0x3   :  { %6798 = sst [smem:[#allocation33_spill]] %s6770_s10 }
   0x4   :  { %15 = vsyncpa [#allocation3], 0 }
   0x5   :  { %17 = vsyncpa [#allocation3 + $0x1], 0 }
   0x6   :  { %18 = vsyncpa [#allocation6], 0 }
   0x7   :  { %19 = vsyncpa [#allocation9], 0 }
   0x8   :  { %20 = vsyncpa [#allocation12], 0 }
   0x9   :  { %21 = vsyncpa [#allocation4], 0 }
   0xa   :  { %23 = vsyncpa [#allocation4 + $0x1], 0  ;;  %s5514_s13 = smov 0   ;;  %s5516_s14 = smov 0  }
   0xb   :  { %s5518_s15 = smov 0   ;;  %s5520_s16 = smov 0  }
   0xc LB: > { %s5420_s17 = smov [#allocation5]   ;;  %s5535_s19 = sadd.s32 4294967295, %s5418_s16   ;;  %s5418_s16 = sphi %s5520_s16, %s6856_s16   ;;  %s5414_s15 = sphi %s5518_s15, %s6855_s15   ;;  %s5410_s14 = sphi %s5516_s14, %s6854_s14   ;;  %s5406_s13 = sphi %s5514_s13, %s6853_s13  }
   0xd   : > { %s296_s18 = sshll.u32 %s5420_s17, 4  ;;  %p4710_p0 = scmp.ge.s32.totalorder %s5418_s16, 1  ;;  %s5540_s18 = int_to_ptr.vmem [resolvable:$true] %s296_s18 }
   0xe   : > { %p6772_p1 = scmp.eq.s32.totalorder %s5535_s19, 0  ;;  %p275_p2 = scmp.lt.s32.totalorder %s5418_s16, 3 }
   0xf   : > { %s5421_s21 = smov [#allocation8]   ;;  %s5422_s24 = smov [#allocation7]  }
  0x10   : > { %p5542_p3 = pnand %p4710_p0, %p275_p2  ;;  %s325_s22 = sshll.u32 %s5421_s21, 4  ;;  %s5555_s22 = int_to_ptr.vmem [resolvable:$true] %s325_s22 }
  0x11   : > { %s312_s25 = sshll.u32 %s5422_s24, 4  ;;  %s6801_s4 = sld [smem:[#allocation32_spill]]  ;;  %s5557_s25 = int_to_ptr.vmem [resolvable:$true] %s312_s25 }
  0x12   : > { %s6799_s20 = scalar_select %p5542_p3, 1, 0 }
  0x13   : > { %p5037_p5 = pneg %p5542_p3 }
  0x15   : > { %p5551_p6 = pnand %p5037_p5, %p6772_p1 }
  0x17   : > { %s5170_s28 = scalar_lea.hbm %s6801_s4, 512  ;;  %p5567_p8 = pneg %p5551_p6 }
  0x18   : > { %p5171_p7 = scmp.ne.s32.totalorder %s6801_s4, %s5170_s28  ;;  %p5177_p11 = scmp.lt.u32.totalorder %s5170_s28, %s6801_s4 }
  0x1a   : > { %p5173_p9 = pnand %p5567_p8, %p5171_p7 }
  0x1c   : > { %p5174_p10 = pneg %p5173_p9 }
  0x1e   : > { %p5179_p12 = pnand %p5177_p11, %p5174_p10 }
  0x20   : > { %5182 = shalt.err (!%p5179_p12)
}
  0x21   : > { %s5183_s21 = scalar_lea.vmem %s5540_s18, 512  ;;  %p5191_p5 = scmp.lt.s32.totalorder %s5540_s18, %s5540_s18 }
  0x22   : > { %p5184_p13 = scmp.ne.s32.totalorder %s5540_s18, %s5183_s21  ;;  %p5192_p4 = scmp.lt.s32.totalorder %s5183_s21, %s5183_s21 }
  0x24   : > { %p5186_p0 = pnand %p5184_p13, %p5567_p8  ;;  %p5193_p7 = por %p5192_p4, %p5191_p5 }
  0x26   : > { %p5187_p2 = pneg %p5186_p0 }
  0x28   : > { %p5194_p9 = pnand %p5193_p7, %p5187_p2 }
  0x2a   : > { %5197 = shalt.err (!%p5194_p9)
}
  0x2b   : > { %s5423_s24 = smov 256   ;;  %s5424_s26 = smov 16  }
  0x2c   : > { %5040 = dma.hbm_to_vmem [thread:$0]  (!%p5551_p6), %s6801_s4, 512, %s5540_s18, [#allocation6], %s5423_s24, %s5423_s24, %s5424_s26  }
  0x2d   : > { %s5198_s12 = scalar_lea.hbm %s6767_s7, 5632 }
  0x2e   : > { %p5199_p4 = scmp.ne.s32.totalorder %s6767_s7, %s5198_s12  ;;  %p5205_p12 = scmp.lt.u32.totalorder %s5198_s12, %s6767_s7 }
  0x30   : > { %p5201_p10 = pnand %p5199_p4, %p5567_p8 }
  0x32   : > { %p5202_p11 = pneg %p5201_p10 }
  0x34   : > { %p5207_p13 = pnand %p5205_p12, %p5202_p11 }
  0x36   : > { %5210 = shalt.err (!%p5207_p13)
}
  0x37   : > { %s5211_s18 = scalar_lea.vmem %s5555_s22, 5632  ;;  %p5219_p7 = scmp.lt.s32.totalorder %s5555_s22, %s5555_s22 }
  0x38   : > { %p5212_p0 = scmp.ne.s32.totalorder %s5555_s22, %s5211_s18  ;;  %p5220_p9 = scmp.lt.s32.totalorder %s5211_s18, %s5211_s18 }
  0x3a   : > { %p5214_p2 = pnand %p5212_p0, %p5567_p8  ;;  %p5221_p4 = por %p5220_p9, %p5219_p7 }
  0x3c   : > { %p5215_p5 = pneg %p5214_p2 }
  0x3e   : > { %p5222_p10 = pnand %p5221_p4, %p5215_p5 }
  0x40   : > { %5225 = shalt.err (!%p5222_p10)
}
  0x41   : > { %5046 = dma.hbm_to_vmem [thread:$0]  (!%p5551_p6), %s6767_s7, 5632, %s5555_s22, [#allocation9], %s5423_s24, %s5423_s24, %s5424_s26  }
  0x42   : > { %s5226_s29 = scalar_lea.hbm %s6766_s6, 5632 }
  0x43   : > { %p5227_p11 = scmp.ne.s32.totalorder %s6766_s6, %s5226_s29  ;;  %p5233_p0 = scmp.lt.u32.totalorder %s5226_s29, %s6766_s6 }
  0x45   : > { %p5229_p12 = pnand %p5227_p11, %p5567_p8 }
  0x47   : > { %p5230_p13 = pneg %p5229_p12 }
  0x49   : > { %p5235_p2 = pnand %p5233_p0, %p5230_p13 }
  0x4b   : > { %5238 = shalt.err (!%p5235_p2)
}
  0x4c   : > { %s5239_s22 = scalar_lea.vmem %s5557_s25, 5632  ;;  %p5247_p4 = scmp.lt.s32.totalorder %s5557_s25, %s5557_s25 }
  0x4d   : > { %p5240_p5 = scmp.ne.s32.totalorder %s5557_s25, %s5239_s22  ;;  %p5248_p10 = scmp.lt.s32.totalorder %s5239_s22, %s5239_s22 }
  0x4f   : > { %p5242_p7 = pnand %p5240_p5, %p5567_p8  ;;  %p5249_p11 = por %p5248_p10, %p5247_p4 }
  0x51   : > { %p5243_p9 = pneg %p5242_p7 }
  0x53   : > { %p5250_p12 = pnand %p5249_p11, %p5243_p9 }
  0x55   : > { %5253 = shalt.err (!%p5250_p12)
}
  0x56   : > { %5043 = dma.hbm_to_vmem [thread:$0]  (!%p5551_p6), %s6766_s6, 5632, %s5557_s25, [#allocation6], %s5423_s24, %s5423_s24, %s5424_s26  }
  0x57   : > { %s5425_s10 = smov [#allocation10]   ;;  %s5426_s28 = smov [#allocation11]  }
  0x58   : > { %s338_s27 = sshll.u32 %s5425_s10, 4  ;;  %s351_s29 = sshll.u32 %s5426_s28, 4  ;;  %s339_s27 = int_to_ptr.vmem [resolvable:$true] %s338_s27  ;;  %s352_s29 = int_to_ptr.vmem [resolvable:$true] %s351_s29 }
  0x59   : > { %s5254_s17 = scalar_lea.hbm %s6768_s8, 1792 }
  0x5a   : > { %p5255_p13 = scmp.ne.s32.totalorder %s6768_s8, %s5254_s17  ;;  %p5261_p5 = scmp.lt.u32.totalorder %s5254_s17, %s6768_s8 }
  0x5c   : > { %p5257_p0 = pnand %p5255_p13, %p5567_p8 }
  0x5e   : > { %p5258_p2 = pneg %p5257_p0 }
  0x60   : > { %p5263_p7 = pnand %p5261_p5, %p5258_p2 }
  0x62   : > { %5266 = shalt.err (!%p5263_p7)
}
  0x63   : > { %s5267_s25 = scalar_lea.vmem %s339_s27, 1792  ;;  %p5275_p11 = scmp.lt.s32.totalorder %s339_s27, %s339_s27 }
  0x64   : > { %p5268_p9 = scmp.ne.s32.totalorder %s339_s27, %s5267_s25  ;;  %p5276_p12 = scmp.lt.s32.totalorder %s5267_s25, %s5267_s25 }
  0x66   : > { %p5270_p4 = pnand %p5268_p9, %p5567_p8  ;;  %p5277_p1 = por %p5276_p12, %p5275_p11 }
  0x68   : > { %p5271_p10 = pneg %p5270_p4 }
  0x6a   : > { %p5278_p3 = pnand %p5277_p1, %p5271_p10 }
  0x6c   : > { %5281 = shalt.err (!%p5278_p3)
}
  0x6d   : > { %5049 = dma.hbm_to_vmem [thread:$0]  (!%p5551_p6), %s6768_s8, 1792, %s339_s27, [#allocation9], %s5423_s24, %s5423_s24, %s5424_s26  }
  0x6e   : > { %s5282_s30 = scalar_lea.hbm %s6769_s9, 1792 }
  0x6f   : > { %p5283_p1 = scmp.ne.s32.totalorder %s6769_s9, %s5282_s30  ;;  %p5289_p0 = scmp.lt.u32.totalorder %s5282_s30, %s6769_s9 }
  0x71   : > { %p5285_p3 = pnand %p5283_p1, %p5567_p8 }
  0x73   : > { %p5286_p13 = pneg %p5285_p3 }
  0x75   : > { %p5291_p2 = pnand %p5289_p0, %p5286_p13 }
  0x77   : > { %5294 = shalt.err (!%p5291_p2)
}
  0x78   : > { %s5295_s18 = scalar_lea.vmem %s352_s29, 1792  ;;  %p5303_p4 = scmp.lt.s32.totalorder %s352_s29, %s352_s29 }
  0x79   : > { %p5296_p5 = scmp.ne.s32.totalorder %s352_s29, %s5295_s18  ;;  %p5304_p10 = scmp.lt.s32.totalorder %s5295_s18, %s5295_s18 }
  0x7b   : > { %p5298_p7 = pnand %p5296_p5, %p5567_p8  ;;  %p5305_p11 = por %p5304_p10, %p5303_p4 }
  0x7d   : > { %p5299_p9 = pneg %p5298_p7 }
  0x7f   : > { %p5306_p12 = pnand %p5305_p11, %p5299_p9 }
  0x81   : > { %5309 = shalt.err (!%p5306_p12)
}
  0x82   : > { %5052 = dma.hbm_to_vmem [thread:$0]  (!%p5551_p6), %s6769_s9, 1792, %s352_s29, [#allocation12], %s5423_s24, %s5423_s24, %s5424_s26  }
  0x83   : > { %s4709_s23 = sadd.s32 4294967294, %s5418_s16   ;;  %s5687_s11 = sadd.s32 1, %s5418_s16  }
  0x84   : > { %s36_s4 = sadd.s32 1, %s5414_s15  ;;  %s33_s2 = ssub.s32 %s5418_s16, %s5687_s11 }
  0x85   : > { %p43_p8 = scmp.ne.s32.totalorder %s5414_s15, %s5410_s14  ;;  %p34_p1 = scmp.eq.s32.totalorder %s33_s2, 0 }
  0x86   : > { %p44_p3 = scmp.eq.s32.totalorder %s5418_s16, 0  ;;  %p49_p13 = scmp.ne.s32.totalorder %s5410_s14, %s5406_s13 }
  0x87   : > { %p262_p0 = scmp.eq.s32.totalorder %s5535_s19, 1  ;;  %p6803_p5 = scmp.eq.s32.totalorder %s5535_s19, 0 }
  0x88   : > { %s5699_s10 = scalar_select %p34_p1, %s5414_s15, %s36_s4  }
  0x89   : > { %p45_p2 = por %p44_p3, %p43_p8  ;;  %p5703_p7 = por %p6803_p5, %p49_p13 }
  0x8a   : > { %p5707_p6 = por %p262_p0, %p43_p8  ;;  %p268_p9 = scmp.eq.s32.totalorder %s4709_s23, 1 }
  0x8b   : > { %p5066_p4 = scmp.lt.s32.totalorder %s5418_s16, 2  ;;  %s365_s26 = sand.u32 1, %s5414_s15  }
  0x8c   : > { %s6805_s24 = scalar_select %p5707_p6, 1, 0 }
  0x8d   : > { %p5713_p10 = por %p268_p9, %p49_p13  ;;  %s4717_s30 = sshll.u32 %s365_s26, 4 }
  0x8e   : > { %s4847_s12 = sshll.u32 %s5418_s16, 8  ;;  %s369_s18 = scalar_lea.vmem [#allocation2], %s4717_s30 }
  0x8f   : > { %s6806_s29 = scalar_select %p5713_p10, 1, 0 }
  0x90   : > { %s5721_s22 = scalar_lea.hbm %s6760_s0, %s4847_s12  ;;  %s377_s27 = sshll.u32 %s369_s18, 4  ;;  %s5727_s27 = int_to_ptr.vmem [resolvable:$true] %s377_s27 }
  0x91   : > { %p5723_p11 = pnand %p5066_p4, %p45_p2  ;;  %s366_s23 = scalar_lea.sflag [#allocation3], %s365_s26 }
  0x92   : > { %s5310_s4 = scalar_lea.hbm %s5721_s22, 256  ;;  %s5315_s12 = scalar_lea.hbm %s6760_s0, 512 }
  0x93   : > { %p5311_p12 = scmp.ne.s32.totalorder %s5721_s22, %s5310_s4  ;;  %p5312_p8 = pneg %p5723_p11 }
  0x94   : > { %p5316_p13 = scmp.lt.u32.totalorder %s5721_s22, %s6760_s0  ;;  %p5317_p0 = scmp.lt.u32.totalorder %s5315_s12, %s5310_s4 }
  0x95   : > { %p5313_p1 = pnand %p5312_p8, %p5311_p12  ;;  %p5319_p5 = scmp.lt.u32.totalorder %s5310_s4, %s5721_s22 }
  0x96   : > { %p5318_p2 = por %p5317_p0, %p5316_p13 }
  0x97   : > { %p5314_p3 = pneg %p5313_p1 }
  0x98   : > { %p5320_p9 = por %p5319_p5, %p5318_p2 }
  0x9a   : > { %p5321_p4 = pnand %p5320_p9, %p5314_p3 }
  0x9c   : > { %5324 = shalt.err (!%p5321_p4)
}
  0x9d   : > { %s5325_s26 = scalar_lea.vmem %s5727_s27, 256  ;;  %s5427_s18 = smov [#allocation2]  }
  0x9e   : > { %p5326_p12 = scmp.ne.s32.totalorder %s5727_s27, %s5325_s26  ;;  %s5330_s2 = sshll.u32 %s5427_s18, 4  ;;  %s5331_s2 = int_to_ptr.vmem [resolvable:$false] %s5330_s2 }
  0x9f   : > { %s5332_s30 = scalar_lea.vmem %s5331_s2, 512  ;;  %p5333_p6 = scmp.lt.s32.totalorder %s5727_s27, %s5331_s2 }
  0xa0   : > { %p5328_p1 = pnand %p5326_p12, %p5312_p8  ;;  %p5334_p13 = scmp.lt.s32.totalorder %s5332_s30, %s5325_s26 }
  0xa2   : > { %p5329_p10 = pneg %p5328_p1  ;;  %p5335_p0 = por %p5334_p13, %p5333_p6 }
  0xa4   : > { %p5336_p2 = pnand %p5335_p0, %p5329_p10 }
  0xa6   : > { %5339 = shalt.err (!%p5336_p2)
}
  0xa7   : > { %5056 = dma.hbm_to_vmem [thread:$0]  (!%p5723_p11), %s5721_s22, 256, %s5727_s27, %s366_s23  }
  0xa8   : > { %p6808_p3 = scmp.ne.s32.totalorder %s6799_s20, 0 }
  0xaa   : > { %386 = sbr.rel (%p6808_p3) target bundleno = 2482 (0x9b2), region = 60 }
  0xb1   : > { %s5757_s4 = sand.u32 1, %s5410_s14  }
  0xb2   : > { %s6775_s12 = sshll.u32 %s5757_s4, 4  ;;  %s389_s17 = scalar_lea.sflag [#allocation3], %s5757_s4 }
  0xb3   : > { %s5763_s21 = scalar_lea.vmem [#allocation2], %s6775_s12 }
  0xb4   : > { %5385 = dma.done.wait (%p5703_p7), %s389_s17, 256  }
  0xb5   : > { %5387 = vsyncadd (%p5703_p7), %s389_s17, 4294967040  ;;  %p6809_p6 = scmp.eq.s32.totalorder %s5535_s19, 0 }
  0xb7   : > { %5389 = dma.done.wait (%p6809_p6), [#allocation6], 6144   ;;  %p6810_p10 = pmov %p6809_p6 }
  0xb8   : > { %p6811_p11 = pmov %p6809_p6 }
  0xb9   : > { %5391 = vsyncadd (%p6810_p10), [#allocation6], 4294961152 }
  0xba   : > { %5393 = dma.done.wait (%p6811_p11), [#allocation9], 7424   ;;  %p6812_p8 = pmov %p6809_p6 }
  0xbb   : > { %p6813_p5 = pmov %p6809_p6 }
  0xbc   : > { %5395 = vsyncadd (%p6812_p8), [#allocation9], 4294959872 }
  0xbd   : > { %5397 = dma.done.wait (%p6813_p5), [#allocation12], 1792   ;;  %p6814_p9 = pmov %p6813_p5 }
  0xbe   : > { %v5782_v0 = vld [vmem:[%s5763_s21] sm:$0xff]  ;;  %s5428_s20 = smov 16   ;;  %s5429_s28 = smov 17   ;;  %v5789_v1 = vld [vmem:[%s5763_s21 + $0x8] sm:$0xff]  ;;  %v6782_v2 = vmov 0.0   ;;  %v5435_v3 = vmov 0   ;;  %v456_v5 = vlaneseq }
  0xbf   : > { %5399 = vsyncadd (%p6814_p9), [#allocation12], 4294965504  ;;  %475 = vrot.lane.b32.xlu1 %v5782_v0, %s5428_s20  ;;  %452 = vrot.lane.b32.xlu0 %v5782_v0, %s5429_s28  ;;  %s5430_s22 = smov 15   ;;  %s5431_s27 = smov 1   ;;  %v451_v4 = vld [vmem:[%s6763_s3] sm:$0xff]  ;;  %vm6780_vm8 = vcmask 588800  }
  0xc0   : > { %s5432_s25 = smov 127   ;;  %s6778_s23 = smov 113   ;;  %718 = vmatprep.mubr.f32.mxu0 %v6782_v2  ;;  %1039 = vmatprep.mubr.f32.mxu1 %v6782_v2  ;;  %v464_v6 = vshrl.u32 %v456_v5, 7  ;;  %v5824_v7 = vand.u32 127, %v456_v5  ;;  %vm736_vm9 = vcmask 1043456   ;;  %vm766_vm10 = vcmask 1042432  }
  0xc1   : > { %5142 = vset.pattern.permute.xlu0 %v5435_v3  ;;  %s5436_s26 = smov 112   ;;  %s6776_s18 = smov 111   ;;  %v461_v10 = vld [vmem:[#allocation5] ss:$8 sm:$0x3]  ;;  %vm5446_vm11 = vmmov 1  }
  0xc2   : > { %v5826_v8 = vsub.s32 0, %v464_v6  ;;  %v5828_v9 = vsub.s32 1, %v464_v6  ;;  %v483_v11 = vld [vmem:[#allocation5 + $0x1] ss:$8 sm:$0x3]  ;;  %vm479_vm0 = vcmp.lt.s32.totalorder %v5824_v7, 16  ;;  %vm5987_vm12 = vmpackc.low %vm766_vm10, %vm5446_vm11 }
  0xc3   : > { %477 = vrot.lane.b32.xlu1 %v5789_v1, %s5428_s20  ;;  %454 = vrot.lane.b32.xlu0 %v5789_v1, %s5429_s28  ;;  %vm458_vm1 = vcmp.lt.s32.totalorder %v5824_v7, 17  ;;  %v505_v28 = vld [vmem:[#allocation5 + $0x2] ss:$8 sm:$0x3]  ;;  %vm501_vm2 = vcmp.lt.s32.totalorder %v5824_v7, 15  ;;  %vm523_vm3 = vcmp.lt.s32.totalorder %v5824_v7, 1 }
  0xc4   : > { %v5833_v14 = vrot.slane %v461_v10, %v5826_v8  ;;  %v5836_v15 = vrot.slane %v461_v10, %v5828_v9  ;;  %v5839_v16 = vrot.slane %v483_v11, %v5828_v9  ;;  %v5842_v17 = vrot.slane %v483_v11, %v5826_v8  ;;  %v527_v29 = vld [vmem:[#allocation5 + $0x3] ss:$8 sm:$0x3]  ;;  %v542_v34 = vld [vmem:[#allocation5 + $0x4] ss:$8 sm:$0x3] }
  0xc5   : > { %v5859_v35 = vrot.slane %v505_v28, %v5826_v8  ;;  %v5862_v36 = vrot.slane %v505_v28, %v5828_v9  ;;  %v5865_v37 = vrot.slane %v527_v29, %v5826_v8  ;;  %v5868_v38 = vrot.slane %v527_v29, %v5828_v9  ;;  %v564_v39 = vld [vmem:[#allocation5 + $0x5] ss:$8 sm:$0x3]  ;;  %v586_v3 = vld [vmem:[#allocation5 + $0x6] ss:$8 sm:$0x3] }
  0xc6   : > { %vm560_vm4 = vcmp.lt.s32.totalorder %v5824_v7, 127  ;;  %v5876_v44 = vrot.slane %v542_v34, %v5828_v9  ;;  %v5879_v45 = vrot.slane %v542_v34, %v5826_v8  ;;  %v5886_v48 = vrot.slane %v564_v39, %v5826_v8  ;;  %s5438_s30 = smov 5   ;;  %s5439_s17 = smov 4  }
  0xc7   : > { %499 = vrot.lane.b32.xlu1 %v5789_v1, %s5430_s22  ;;  %497 = vrot.lane.b32.xlu0 %v5782_v0, %s5430_s22  ;;  %6815 = vst [vmem:[#allocation19_spill] sm:$0xff] %v5865_v37  ;;  %6816 = vst [vmem:[#allocation20_spill] sm:$0xff] %v5868_v38  ;;  %v5889_v49 = vrot.slane %v564_v39, %v5828_v9  ;;  %vm582_vm5 = vcmp.lt.s32.totalorder %v5824_v7, 113  ;;  %v5907_v10 = vrot.slane %v586_v3, %v5826_v8  ;;  %s5440_s2 = smov 3   ;;  %s5441_s12 = smov 2   ;;  %vm2984_vm13 = vcmask 1047556  }
  0xc8   : > { %6817 = vst [vmem:[#allocation21_spill] sm:$0xff] %v5876_v44  ;;  %6818 = vst [vmem:[#allocation22_spill] sm:$0xff] %v5879_v45  ;;  %v555_v58 = vmul.f32 %v5876_v44, %v5789_v1  ;;  %v554_v59 = vmul.f32 %v5879_v45, %v5782_v0  ;;  %v5910_v11 = vrot.slane %v586_v3, %v5828_v9  ;;  %vm604_vm6 = vcmp.lt.s32.totalorder %v5824_v7, 112  ;;  %p6850_p4 = scmp.ne.s32.totalorder %s6805_s24, 0 }
  0xc9   : > { %6819 = vst [vmem:[#allocation23_spill] sm:$0xff] %v5886_v48  ;;  %6820 = vst [vmem:[#allocation24_spill] sm:$0xff] %v5889_v49  ;;  %vm6781_vm7 = vcmp.lt.s32.totalorder %v5824_v7, 111  ;;  %vm744_vm14 = vcmask 84992   ;;  %vm762_vm15 = vcmask 89088   ;;  %vm848_vm10 = vcmp.lt.s32.totalorder %v5824_v7, 5 }
  0xca   : > { %6821 = vst [vmem:[#allocation25_spill] sm:$0xff] %v5907_v10  ;;  %6822 = vst [vmem:[#allocation26_spill] sm:$0xff] %v5910_v11  ;;  %vm949_vm11 = vcmp.lt.s32.totalorder %v5824_v7, 4 }
  0xcb   : > { %521 = vrot.lane.b32.xlu1 %v5789_v1, %s5431_s27  ;;  %519 = vrot.lane.b32.xlu0 %v5782_v0, %s5431_s27 }
  0xcf   : > { %558 = vrot.lane.b32.xlu1 %v5789_v1, %s5432_s25  ;;  %556 = vrot.lane.b32.xlu0 %v5782_v0, %s5432_s25 }
  0xd3   : > { %580 = vrot.lane.b32.xlu1 %v5789_v1, %s6778_s23  ;;  %578 = vrot.lane.b32.xlu0 %v5782_v0, %s6778_s23  ;;  %s5445_s23 = smov 123  }
  0xd7   : > { %602 = vrot.lane.b32.xlu1 %v5789_v1, %s5436_s26  ;;  %600 = vrot.lane.b32.xlu0 %v5782_v0, %s5436_s26 }
  0xdb   : > { %624 = vrot.lane.b32.xlu1 %v5789_v1, %s6776_s18  ;;  %622 = vrot.lane.b32.xlu0 %v5782_v0, %s6776_s18  ;;  %s5444_s18 = smov 124  }
  0xdf   : > { %647 = vperm.xlu0 %5142, %v451_v4   ;;  %v608_v4 = vld [vmem:[#allocation5 + $0x7] ss:$8 sm:$0x3] }
 0x131   : > { %v476_v12 = vpop.permute.xlu1 %475  ;;  %v453_v13 = vpop.permute.xlu0 %452 }
 0x135   : > { %v478_v18 = vpop.permute.xlu1 %477  ;;  %v455_v19 = vpop.permute.xlu0 %454 }
 0x136   : > { %v481_v20 = vsel %vm479_vm0, %v478_v18, %v476_v12  ;;  %v459_v21 = vsel %vm458_vm1, %v453_v13, %v455_v19  ;;  %v460_v22 = vsel %vm458_vm1, %v455_v19, %v453_v13  ;;  %v480_v23 = vsel %vm479_vm0, %v476_v12, %v478_v18  ;;  %v630_v18 = vld [vmem:[#allocation5 + $0x10] ss:$8 sm:$0x3] }
 0x137   : > { %v473_v24 = vmul.f32 %v5833_v14, %v460_v22  ;;  %v474_v25 = vmul.f32 %v5836_v15, %v459_v21  ;;  %v496_v26 = vmul.f32 %v5839_v16, %v480_v23  ;;  %v495_v27 = vmul.f32 %v5842_v17, %v481_v20 }
 0x138   : > { %v5914_v12 = vrot.slane %v608_v4, %v5826_v8  ;;  %v5917_v13 = vrot.slane %v608_v4, %v5828_v9  ;;  %v759_v4 = vld [vmem:[#allocation7 + $0x8] sm:$0xff] }
 0x139   : > { %v500_v30 = vpop.permute.xlu1 %499  ;;  %v498_v31 = vpop.permute.xlu0 %497  ;;  %v4849_v32 = vpack.c.bf16 %v496_v26, %v474_v25  ;;  %v4851_v33 = vpack.c.bf16 %v495_v27, %v473_v24  ;;  %v5929_v25 = vrot.slane %v630_v18, %v5828_v9 }
 0x13a   : > { %v502_v40 = vsel %vm501_vm2, %v498_v31, %v500_v30  ;;  %v503_v41 = vsel %vm501_vm2, %v500_v30, %v498_v31  ;;  %6823 = vst [vmem:[#allocation27_spill] sm:$0xff] %v5914_v12  ;;  %6824 = vst [vmem:[#allocation28_spill] sm:$0xff] %v5917_v13  ;;  %v5936_v30 = vrot.slane %v630_v18, %v5826_v8  ;;  %v760_v18 = vld [vmem:[#allocation7 + $0x10] sm:$0x7] }
 0x13b   : > { %4850 = vmatprep.subr.bf16.mxu0 %v4849_v32  ;;  %v517_v50 = vmul.f32 %v5859_v35, %v503_v41  ;;  %v518_v51 = vmul.f32 %v5862_v36, %v502_v40  ;;  %6825 = vst [vmem:[#allocation29_spill] sm:$0xff] %v5929_v25 }
 0x13c   : > { %4852 = vmatpush1.bf16.msra.mxu0 %v4851_v33  ;;  %6826 = vst [vmem:[#allocation30_spill] sm:$0xff] %v5936_v30 }
 0x13d   : > { %v522_v42 = vpop.permute.xlu1 %521  ;;  %v520_v43 = vpop.permute.xlu0 %519 }
 0x13e   : > { %v524_v46 = vsel %vm523_vm3, %v520_v43, %v522_v42  ;;  %v525_v47 = vsel %vm523_vm3, %v522_v42, %v520_v43  ;;  %v644_v42 = vld [vmem:[%s6761_s1] sm:$0xff] }
 0x13f   : > { %v539_v52 = vmul.f32 %v5865_v37, %v525_v47  ;;  %v540_v53 = vmul.f32 %v5868_v38, %v524_v46 }
 0x141   : > { %v559_v54 = vpop.permute.xlu1 %558  ;;  %v557_v55 = vpop.permute.xlu0 %556  ;;  %v4853_v56 = vpack.c.bf16 %v540_v53, %v518_v51  ;;  %v4855_v57 = vpack.c.bf16 %v539_v52, %v517_v50 }
 0x142   : > { %v561_v60 = vsel %vm560_vm4, %v557_v55, %v559_v54  ;;  %v562_v61 = vsel %vm560_vm4, %v559_v54, %v557_v55 }
 0x143   : > { %v576_v62 = vmul.f32 %v5886_v48, %v561_v60  ;;  %v577_v63 = vmul.f32 %v5889_v49, %v562_v61  ;;  %4854 = vmatprep.subr.bf16.mxu0 %v4853_v56 }
 0x144   : > { %4856 = vmatpush1.bf16.msra.mxu0 %v4855_v57 }
 0x145   : > { %v581_v5 = vpop.permute.xlu1 %580  ;;  %v579_v1 = vpop.permute.xlu0 %578  ;;  %v4857_v6 = vpack.c.bf16 %v577_v63, %v555_v58  ;;  %v4859_v0 = vpack.c.bf16 %v576_v62, %v554_v59 }
 0x146   : > { %v583_v19 = vsel %vm582_vm5, %v579_v1, %v581_v5  ;;  %v584_v20 = vsel %vm582_vm5, %v581_v5, %v579_v1  ;;  %v761_v5 = vld [vmem:[#allocation7 + $0x18] sm:$0x7]  ;;  %v758_v1 = vld [vmem:[#allocation7] sm:$0xff] }
 0x147   : > { %4858 = vmatprep.subr.bf16.mxu0 %v4857_v6  ;;  %v598_v26 = vmul.f32 %v5907_v10, %v583_v19  ;;  %v599_v27 = vmul.f32 %v5910_v11, %v584_v20  ;;  %v4865_v6 = vpack.c.bf16 %v761_v5, %v759_v4  ;;  %v966_v19 = vld [vmem:[#allocation7 + $0x48] sm:$0xff]  ;;  %v4868_v20 = vpack.c.bf16 %v760_v18, %v758_v1  ;;  %v1170_v4 = vld [vmem:[#allocation7 + $0x98] sm:$0x7] }
 0x148   : > { %4860 = vmatpush1.bf16.msra.mxu0 %v4859_v0  ;;  %v1268_v5 = vld [vmem:[#allocation7 + $0xa8] sm:$0xff]  ;;  %v1270_v1 = vld [vmem:[#allocation7 + $0xb8] sm:$0x7] }
 0x149   : > { %v603_v21 = vpop.permute.xlu1 %602  ;;  %v601_v22 = vpop.permute.xlu0 %600  ;;  %v3320_v0 = vld [vmem:[#allocation10 + $0x38] sm:$0x7f] }
 0x14a   : > { %v605_v23 = vsel %vm604_vm6, %v601_v22, %v603_v21  ;;  %v606_v24 = vsel %vm604_vm6, %v603_v21, %v601_v22  ;;  %v968_v21 = vld [vmem:[#allocation7 + $0x58] sm:$0x7]  ;;  %v965_v22 = vld [vmem:[#allocation7 + $0x40] sm:$0xff] }
 0x14b   : > { %v620_v28 = vmul.f32 %v5914_v12, %v605_v23  ;;  %v621_v29 = vmul.f32 %v5917_v13, %v606_v24  ;;  %v967_v23 = vld [vmem:[#allocation7 + $0x50] sm:$0x7]  ;;  %v4877_v24 = vpack.c.bf16 %v968_v21, %v966_v19  ;;  %v1167_v19 = vld [vmem:[#allocation7 + $0x80] sm:$0xff] }
 0x14c   : > { %v1267_v21 = vld [vmem:[#allocation7 + $0xa0] sm:$0xff] }
 0x14d   : > { %v625_v31 = vpop.permute.xlu1 %624  ;;  %v623_v32 = vpop.permute.xlu0 %622  ;;  %v4861_v33 = vpack.c.bf16 %v621_v29, %v599_v27  ;;  %v4863_v34 = vpack.c.bf16 %v620_v28, %v598_v26  ;;  %v4880_v26 = vpack.c.bf16 %v967_v23, %v965_v22  ;;  %v865_v27 = vld [vmem:[#allocation7 + $0x28] sm:$0xff]  ;;  %v867_v28 = vld [vmem:[#allocation7 + $0x38] sm:$0x7]  ;;  %4879 = vmatprep.subr.msk.bf16.mxu1 %vm5987_vm12, %v4877_v24  ;;  %v1269_v22 = vld [vmem:[#allocation7 + $0xb0] sm:$0x7] }
 0x14e   : > { %v627_v39 = vsel %vm6781_vm7, %v623_v32, %v625_v31  ;;  %v628_v9 = vsel %vm6781_vm7, %v625_v31, %v623_v32  ;;  %v4871_v29 = vpack.c.bf16 %v867_v28, %v865_v27  ;;  %v1067_v31 = vld [vmem:[#allocation7 + $0x68] sm:$0xff]  ;;  %v1069_v32 = vld [vmem:[#allocation7 + $0x78] sm:$0x7]  ;;  %vm1849_vm7 = vcmp.lt.s32.totalorder %v5824_v7, 123 }
 0x14f   : > { %v643_v40 = vmul.f32 %v5929_v25, %v628_v9  ;;  %4862 = vmatprep.subr.bf16.mxu0 %v4861_v33  ;;  %v642_v41 = vmul.f32 %v5936_v30, %v627_v39  ;;  %4882 = vmatpush1.bf16.msk.msra.mxu1 %vm5987_vm12, %v4880_v26  ;;  %v4883_v33 = vpack.c.bf16 %v1069_v32, %v1067_v31  ;;  %v1362_v27 = vld [vmem:[#allocation7 + $0xc8] sm:$0xff]  ;;  %v1364_v28 = vld [vmem:[#allocation7 + $0xd8] sm:$0x7] }
 0x150   : > { %4864 = vmatpush1.bf16.msra.mxu0 %v4863_v34  ;;  %v4895_v26 = vpack.c.bf16 %v1270_v1, %v1268_v5  ;;  %v1464_v31 = vld [vmem:[#allocation7 + $0xf8] sm:$0x7]  ;;  %v1764_v5 = vld [vmem:[#allocation7 + $0x140] sm:$0xff]  ;;  %v1766_v1 = vld [vmem:[#allocation7 + $0x150] sm:$0x7] }
 0x151   : > { %670 = vmatprep.subr.mxu0 %v643_v40  ;;  %4885 = vmatprep.subr.msk.bf16.mxu1 %vm5987_vm12, %v4883_v33  ;;  %v6010_v40 = vld [vmem:[%s6765_s5] sm:$0xf]  ;;  %v4898_v33 = vpack.c.bf16 %v1269_v22, %v1267_v21 }
 0x154   : > { %671 = vmatpush1.msra.mxu0 %v642_v41 }
 0x155   : > { %4728 = vmatmul.mubr.msk.f32.vlgmr.msra.gmra.mrb[0].mxu0 %vm6780_vm8, %v644_v42  ;;  %4867 = vmatprep.subr.msk.bf16.mxu0 %vm5987_vm12, %v4865_v6  ;;  %vm1546_vm8 = vcmp.lt.s32.totalorder %v5824_v7, 126 }
 0x156   : > { %837 = vmatprep.mubr.f32.mxu0 %v6782_v2  ;;  %4870 = vmatpush1.bf16.msk.msra.mxu0 %vm5987_vm12, %v4868_v20  ;;  %v1169_v20 = vld [vmem:[#allocation7 + $0x90] sm:$0x7] }
 0x157   : > { %4873 = vmatprep.subr.msk.bf16.mxu0 %vm5987_vm12, %v4871_v29  ;;  %v1462_v29 = vld [vmem:[#allocation7 + $0xe8] sm:$0xff]  ;;  %v4892_v32 = vpack.c.bf16 %v1169_v20, %v1167_v19 }
 0x15e   : > { %v648_v43 = vpop.permute.xlu0 %647 }
 0x228   : > { %v720_v46 = vpop.f32.mrb[0].mxu0 }
 0x229   : > { %v721_v47 = vadd.f32 %v720_v46, %v648_v43  ;;  %v722_v50 = vpop.f32.mrb[1].mxu0 }
 0x22a   : > { %v723_v51 = vadd.f32 %v722_v50, %v648_v43 }
 0x22b   : > { %v727_v52 = vmul.f32 0.70710677, %v721_v47  ;;  %v725_v56 = vmul.f32 0.5, %v721_v47 }
 0x22c   : > { %v728_v53 = vmul.f32 0.70710677, %v723_v51  ;;  %v726_v58 = vmul.f32 0.5, %v723_v51 }
 0x22d   : > { %5146 = verf.f32 %v727_v52 }
 0x22e   : > { %5148 = verf.f32 %v728_v53 }
 0x237   : > { %v5147_v54 = vpop.eup %5146 }
 0x238   : > { %v5149_v55 = vpop.eup %5148  ;;  %v731_v57 = vadd.f32 1.0, %v5147_v54 }
 0x239   : > { %v732_v59 = vadd.f32 1.0, %v5149_v55 }
 0x23a   : > { %v5949_v60 = vmul.f32 %v731_v57, %v725_v56 }
 0x23b   : > { %v5951_v61 = vmul.f32 %v732_v59, %v726_v58  ;;  %v864_v58 = vld [vmem:[#allocation7 + $0x20] sm:$0xff]  ;;  %v866_v59 = vld [vmem:[#allocation7 + $0x30] sm:$0x7] }
 0x23c   : > { %844 = vrot.lane.b32.xlu0 %v5949_v60, %s5438_s30  ;;  %v737_v62 = vsel %vm736_vm9, %v5949_v60, 0.0  ;;  %v2985_v34 = vsel %vm2984_vm13, %v5949_v60, 0.0  ;;  %v4874_v6 = vpack.c.bf16 %v866_v59, %v864_v58 }
 0x23d   : > { %v738_v63 = vsel %vm736_vm9, %v5951_v61, 0.0  ;;  %v2986_v39 = vsel %vm2984_vm13, %v5951_v61, 0.0  ;;  %vm1050_vm13 = vcmp.lt.s32.totalorder %v5824_v7, 3 }
 0x23e   : > { %v739_v3 = vadd.f32 %v738_v63, %v737_v62  ;;  %v2987_v9 = vadd.f32 %v2986_v39, %v2985_v34  ;;  %v1066_v62 = vld [vmem:[#allocation7 + $0x60] sm:$0xff]  ;;  %v1068_v63 = vld [vmem:[#allocation7 + $0x70] sm:$0x7] }
 0x23f   : > { %v4886_v18 = vpack.c.bf16 %v1068_v63, %v1066_v62  ;;  %v1361_v34 = vld [vmem:[#allocation7 + $0xc0] sm:$0xff]  ;;  %v1363_v39 = vld [vmem:[#allocation7 + $0xd0] sm:$0x7]  ;;  %v1765_v62 = vld [vmem:[#allocation7 + $0x148] sm:$0xff] }
 0x240   : > { %846 = vrot.lane.b32.xlu0 %v5951_v61, %s5438_s30  ;;  %740 = vadd.xlane.f32.xlu1 %v739_v3  ;;  %s5442_s30 = smov 126   ;;  %v1168_v3 = vld [vmem:[#allocation7 + $0x88] sm:$0xff]  ;;  %v1767_v63 = vld [vmem:[#allocation7 + $0x158] sm:$0x7] }
 0x241   : > { %v4889_v24 = vpack.c.bf16 %v1170_v4, %v1168_v3 }
 0x244   : > { %945 = vrot.lane.b32.xlu0 %v5949_v60, %s5439_s17 }
 0x248   : > { %947 = vrot.lane.b32.xlu0 %v5951_v61, %s5439_s17  ;;  %s5443_s17 = smov 125  }
 0x24c   : > { %1046 = vrot.lane.b32.xlu0 %v5949_v60, %s5440_s2 }
 0x250   : > { %1048 = vrot.lane.b32.xlu0 %v5951_v61, %s5440_s2 }
 0x251   : > { %1248 = vrot.lane.b32.xlu1 %v5949_v60, %s5431_s27 }
 0x254   : > { %1147 = vrot.lane.b32.xlu0 %v5949_v60, %s5441_s12 }
 0x255   : > { %1544 = vrot.lane.b32.xlu1 %v5951_v61, %s5442_s30 }
 0x258   : > { %1149 = vrot.lane.b32.xlu0 %v5951_v61, %s5441_s12 }
 0x259   : > { %1645 = vrot.lane.b32.xlu1 %v5951_v61, %s5443_s17 }
 0x25c   : > { %1250 = vrot.lane.b32.xlu0 %v5951_v61, %s5431_s27 }
 0x25d   : > { %1746 = vrot.lane.b32.xlu1 %v5951_v61, %s5444_s18 }
 0x260   : > { %1442 = vrot.lane.b32.xlu0 %v5949_v60, %s5432_s25 }
 0x261   : > { %1847 = vrot.lane.b32.xlu1 %v5951_v61, %s5445_s23 }
 0x264   : > { %1444 = vrot.lane.b32.xlu0 %v5951_v61, %s5432_s25 }
 0x268   : > { %1542 = vrot.lane.b32.xlu0 %v5949_v60, %s5442_s30 }
 0x26c   : > { %1643 = vrot.lane.b32.xlu0 %v5949_v60, %s5443_s17 }
 0x270   : > { %1744 = vrot.lane.b32.xlu0 %v5949_v60, %s5444_s18  ;;  %s5448_s18 = smov 117  }
 0x274   : > { %1845 = vrot.lane.b32.xlu0 %v5949_v60, %s5445_s23  ;;  %s5447_s23 = smov 106  }
 0x285   : > { %2988 = vadd.xlane.f32.xlu1 %v2987_v9  ;;  %v1461_v9 = vld [vmem:[#allocation7 + $0xe0] sm:$0xff] }
 0x2ae   : > { %v845_v19 = vpop.permute.xlu0 %844 }
 0x2b2   : > { %v847_v20 = vpop.permute.xlu0 %846 }
 0x2b6   : > { %v946_v21 = vpop.permute.xlu0 %945 }
 0x2ba   : > { %v948_v22 = vpop.permute.xlu0 %947 }
 0x2cd   : > { %v741_v41 = vpop.xlane.xlu1 %740 }
 0x2ce   : > { %v742_v42 = vmul.f32 0.00390625, %v741_v41  ;;  %v1463_v41 = vld [vmem:[#allocation7 + $0xf0] sm:$0x7] }
 0x2d0   : > { %v743_v43 = vmul.f32 %v742_v42, %v6010_v40  ;;  %v4901_v42 = vpack.c.bf16 %v1364_v28, %v1362_v27 }
 0x2d2   : > { %v745_v46 = vsel %vm744_vm14, %v743_v43, 0.0  ;;  %v4907_v43 = vpack.c.bf16 %v1464_v31, %v1462_v29  ;;  %vm1151_vm14 = vcmp.lt.s32.totalorder %v5824_v7, 2 }
 0x2d3   : > { %v746_v47 = vrot.slane %v745_v46, 4 }
 0x2d5   : > { %v747_v50 = vadd.f32 %v746_v47, %v745_v46  ;;  %v1563_v46 = vld [vmem:[#allocation7 + $0x108] sm:$0xff]  ;;  %v1565_v47 = vld [vmem:[#allocation7 + $0x118] sm:$0x7] }
 0x2d6   : > { %v4913_v58 = vpack.c.bf16 %v1565_v47, %v1563_v46 }
 0x2d7   : > { %v748_v51 = vrot.slane %v747_v50, 2 }
 0x2d9   : > { %v749_v52 = vadd.f32 %v748_v51, %v747_v50  ;;  %v1664_v50 = vld [vmem:[#allocation7 + $0x128] sm:$0xff]  ;;  %v1666_v51 = vld [vmem:[#allocation7 + $0x138] sm:$0x7] }
 0x2da   : > { %v4919_v59 = vpack.c.bf16 %v1666_v51, %v1664_v50  ;;  %v849_v51 = vsel %vm848_vm10, %v845_v19, %v847_v20 }
 0x2db   : > { %v750_v53 = vrot.slane %v749_v52, 1 }
 0x2dd   : > { %v751_v54 = vadd.f32 %v750_v53, %v749_v52  ;;  %v4904_v52 = vpack.c.bf16 %v1363_v39, %v1361_v34  ;;  %v4910_v53 = vpack.c.bf16 %v1463_v41, %v1461_v9 }
 0x2df   : > { %v4729_v55 = vmul.f32 -1.442695, %v751_v54  ;;  %v1562_v54 = vld [vmem:[#allocation7 + $0x100] sm:$0xff] }
 0x2e1   : > { %5150 = vpow2.f32 %v4729_v55  ;;  %v1564_v55 = vld [vmem:[#allocation7 + $0x110] sm:$0x7] }
 0x2e2   : > { %v4916_v3 = vpack.c.bf16 %v1564_v55, %v1562_v54 }
 0x2eb   : > { %v5151_v56 = vpop.eup %5150 }
 0x2ec   : > { %v755_v57 = vadd.f32 1.0, %v5151_v56  ;;  %v1663_v56 = vld [vmem:[#allocation7 + $0x120] sm:$0xff] }
 0x2ee   : > { %5152 = vrcp.f32 %v755_v57  ;;  %v1665_v57 = vld [vmem:[#allocation7 + $0x130] sm:$0x7] }
 0x2ef   : > { %v4922_v4 = vpack.c.bf16 %v1665_v57, %v1663_v56  ;;  %v850_v56 = vsel %vm848_vm10, %v847_v20, %v845_v19  ;;  %v951_v57 = vsel %vm949_vm11, %v948_v22, %v946_v21  ;;  %vm1647_vm10 = vcmp.lt.s32.totalorder %v5824_v7, 125 }
 0x2f8   : > { %v6013_v23 = vpop.eup %5152 }
 0x2f9   : > { %4732 = vmatmul.mubr.msk.f32.vlgmr.msra.gmra.mrb[2].mxu0 %vm762_vm15, %v6013_v23  ;;  %4738 = vmatmul.mubr.msk.f32.vlgmr.msra.gmra.mrb[0].mxu1 %vm762_vm15, %v6013_v23 }
 0x2fa   : > { %4876 = vmatpush1.bf16.msk.msra.mxu0 %vm5987_vm12, %v4874_v6  ;;  %4888 = vmatpush1.bf16.msk.msra.mxu1 %vm5987_vm12, %v4886_v18  ;;  %v4925_v6 = vpack.c.bf16 %v1767_v63, %v1765_v62  ;;  %v4928_v18 = vpack.c.bf16 %v1766_v1, %v1764_v5  ;;  %v950_v62 = vsel %vm949_vm11, %v946_v21, %v948_v22  ;;  %vm1748_vm11 = vcmp.lt.s32.totalorder %v5824_v7, 124 }
 0x2fb   : > { %938 = vmatprep.mubr.f32.mxu0 %v6782_v2  ;;  %1140 = vmatprep.mubr.f32.mxu1 %v6782_v2 }
 0x2fc   : > { %4891 = vmatprep.subr.msk.bf16.mxu1 %vm5987_vm12, %v4889_v24  ;;  %4897 = vmatprep.subr.msk.bf16.mxu0 %vm5987_vm12, %v4895_v26  ;;  %v1047_v24 = vpop.permute.xlu0 %1046 }
 0x2fd   : > { %4735 = vmatmul.mubr.msk.f32.vlgmr.msra.gmra.mrb[4].mxu0 %vm762_vm15, %v6013_v23  ;;  %4741 = vmatmul.mubr.msk.f32.vlgmr.msra.gmra.mrb[2].mxu1 %vm762_vm15, %v6013_v23 }
 0x2fe   : > { %4894 = vmatpush1.bf16.msk.msra.mxu1 %vm5987_vm12, %v4892_v32  ;;  %4900 = vmatpush1.bf16.msk.msra.mxu0 %vm5987_vm12, %v4898_v33  ;;  %v1249_v32 = vpop.permute.xlu1 %1248 }
 0x2ff   : > { %1241 = vmatprep.mubr.f32.mxu1 %v6782_v2  ;;  %1341 = vmatprep.mubr.f32.mxu0 %v6782_v2 }
 0x300   : > { %4903 = vmatprep.subr.msk.bf16.mxu1 %vm5987_vm12, %v4901_v42  ;;  %4909 = vmatprep.subr.msk.bf16.mxu0 %vm5987_vm12, %v4907_v43  ;;  %v1049_v26 = vpop.permute.xlu0 %1048 }
 0x301   : > { %4744 = vmatmul.mubr.msk.f32.vlgmr.msra.gmra.mrb[4].mxu1 %vm762_vm15, %v6013_v23  ;;  %4747 = vmatmul.mubr.msk.f32.vlgmr.msra.gmra.mrb[6].mxu0 %vm762_vm15, %v6013_v23  ;;  %v1051_v21 = vsel %vm1050_vm13, %v1047_v24, %v1049_v26 }
 0x302   : > { %4906 = vmatpush1.bf16.msk.msra.mxu1 %vm5987_vm12, %v4904_v52  ;;  %4912 = vmatpush1.bf16.msk.msra.mxu0 %vm5987_vm12, %v4910_v53  ;;  %v6084_v34 = vpop.permute.xlu1 %1544 }
 0x303   : > { %1435 = vmatprep.mubr.f32.mxu1 %v6782_v2  ;;  %1535 = vmatprep.mubr.f32.mxu0 %v6782_v2 }
 0x304   : > { %4915 = vmatprep.subr.msk.bf16.mxu1 %vm5987_vm12, %v4913_v58  ;;  %4921 = vmatprep.subr.msk.bf16.mxu0 %vm5987_vm12, %v4919_v59  ;;  %v1148_v27 = vpop.permute.xlu0 %1147 }
 0x305   : > { %4750 = vmatmul.mubr.msk.f32.vlgmr.msra.gmra.mrb[6].mxu1 %vm762_vm15, %v6013_v23  ;;  %4753 = vmatmul.mubr.msk.f32.vlgmr.msra.gmra.mrb[8].mxu0 %vm762_vm15, %v6013_v23 }
 0x306   : > { %4918 = vmatpush1.bf16.msk.msra.mxu1 %vm5987_vm12, %v4916_v3  ;;  %4924 = vmatpush1.bf16.msk.msra.mxu0 %vm5987_vm12, %v4922_v4  ;;  %v6102_v63 = vpop.permute.xlu1 %1645 }
 0x307   : > { %1636 = vmatprep.mubr.f32.mxu1 %v6782_v2  ;;  %1737 = vmatprep.mubr.f32.mxu0 %v6782_v2 }
 0x308   : > { %4927 = vmatprep.subr.msk.bf16.mxu1 %vm5987_vm12, %v4925_v6  ;;  %v1150_v28 = vpop.permute.xlu0 %1149  ;;  %v1052_v6 = vsel %vm1050_vm13, %v1049_v26, %v1047_v24 }
 0x309   : > { %4756 = vmatmul.mubr.msk.f32.vlgmr.msra.gmra.mrb[8].mxu1 %vm762_vm15, %v6013_v23  ;;  %4759 = vmatmul.mubr.msk.f32.vlgmr.msra.gmra.mrb[10].mxu0 %vm762_vm15, %v6013_v23 }
 0x30a   : > { %4930 = vmatpush1.bf16.msk.msra.mxu1 %vm5987_vm12, %v4928_v18  ;;  %1838 = vmatprep.mubr.f32.mxu1 %v6782_v2 }
 0x30b   : > { %1964 = vmatprep.mubr.f32.mxu0 %v6782_v2 }
 0x30c   : > { %v1251_v29 = vpop.permute.xlu0 %1250 }
 0x30d   : > { %4762 = vmatmul.mubr.msk.f32.vlgmr.msra.gmra.mrb[10].mxu1 %vm762_vm15, %v6013_v23 }
 0x30e   : > { %2065 = vmatprep.mubr.f32.mxu1 %v6782_v2 }
 0x310   : > { %v6080_v31 = vpop.permute.xlu0 %1442 }
 0x314   : > { %v6082_v33 = vpop.permute.xlu0 %1444 }
 0x318   : > { %v6086_v39 = vpop.permute.xlu0 %1542 }
 0x31c   : > { %v6105_v3 = vpop.permute.xlu0 %1643 }
 0x3cc   : > { %v839_v23 = vpop.f32.mrb[2].mxu0  ;;  %v1041_v9 = vpop.f32.mrb[0].mxu1 }
 0x3cd   : > { %v841_v41 = vpop.f32.mrb[3].mxu0  ;;  %v1043_v42 = vpop.f32.mrb[1].mxu1  ;;  %v854_v43 = vrot.slane %v839_v23, %v5826_v8  ;;  %v1056_v52 = vrot.slane %v1041_v9, %v5826_v8 }
 0x3ce   : > { %v858_v46 = vrot.slane %v841_v41, %v5826_v8  ;;  %v1060_v58 = vrot.slane %v1043_v42, %v5826_v8 }
 0x3cf   : > { %v859_v4 = vmul.f32 %v854_v43, %v850_v56  ;;  %v1061_v22 = vmul.f32 %v1056_v52, %v1052_v6  ;;  %v1253_v52 = vsel %vm523_vm3, %v1251_v29, %v1249_v32 }
 0x3d0   : > { %v940_v47 = vpop.f32.mrb[4].mxu0  ;;  %v1142_v50 = vpop.f32.mrb[2].mxu1  ;;  %v860_v18 = vmul.f32 %v858_v46, %v849_v51  ;;  %v1062_v46 = vmul.f32 %v1060_v58, %v1051_v21  ;;  %v1252_v58 = vsel %vm523_vm3, %v1249_v32, %v1251_v29  ;;  %v1446_v32 = vsel %vm560_vm4, %v6080_v31, %v6082_v33 }
 0x3d1   : > { %v955_v53 = vrot.slane %v940_v47, %v5826_v8  ;;  %v942_v54 = vpop.f32.mrb[5].mxu0  ;;  %v1144_v55 = vpop.f32.mrb[3].mxu1  ;;  %v1157_v1 = vrot.slane %v1142_v50, %v5826_v8  ;;  %v1153_v50 = vsel %vm1151_vm14, %v1150_v28, %v1148_v27 }
 0x3d2   : > { %v959_v59 = vrot.slane %v942_v54, %v5826_v8  ;;  %v1161_v20 = vrot.slane %v1144_v55, %v5826_v8  ;;  %v1152_v54 = vsel %vm1151_vm14, %v1148_v27, %v1150_v28 }
 0x3d3   : > { %v960_v5 = vmul.f32 %v955_v53, %v951_v57  ;;  %v1162_v24 = vmul.f32 %v1157_v1, %v1153_v50 }
 0x3d4   : > { %v961_v19 = vmul.f32 %v959_v59, %v950_v62  ;;  %v1243_v23 = vpop.f32.mrb[4].mxu1  ;;  %v1343_v9 = vpop.f32.mrb[6].mxu0  ;;  %v1163_v57 = vmul.f32 %v1161_v20, %v1152_v54 }
 0x3d5   : > { %v962_v41 = vadd.f32 %v960_v5, %v859_v4  ;;  %v1257_v42 = vrot.slane %v1243_v23, %v5826_v8  ;;  %v1245_v43 = vpop.f32.mrb[5].mxu1  ;;  %v1345_v47 = vpop.f32.mrb[7].mxu0  ;;  %v1351_v26 = vrot.slane %v1343_v9, %v5826_v8 }
 0x3d6   : > { %v963_v51 = vadd.f32 %v961_v19, %v860_v18  ;;  %v1261_v53 = vrot.slane %v1245_v43, %v5826_v8  ;;  %v1355_v59 = vrot.slane %v1345_v47, %v5826_v8  ;;  %v1747_v20 = vpop.permute.xlu1 %1746  ;;  %v1745_v9 = vpop.permute.xlu0 %1744 }
 0x3d7   : > { %v1063_v55 = vadd.f32 %v1061_v22, %v962_v41  ;;  %v1262_v6 = vmul.f32 %v1257_v42, %v1253_v52  ;;  %v1356_v22 = vmul.f32 %v1351_v26, %v5949_v60  ;;  %v1547_v26 = vsel %vm1546_vm8, %v6086_v39, %v6084_v34 }
 0x3d8   : > { %v1064_v56 = vadd.f32 %v1062_v46, %v963_v51  ;;  %v1437_v62 = vpop.f32.mrb[6].mxu1  ;;  %v1537_v4 = vpop.f32.mrb[8].mxu0  ;;  %v1263_v19 = vmul.f32 %v1261_v53, %v1252_v58  ;;  %v1357_v42 = vmul.f32 %v1355_v59, %v5951_v61  ;;  %v1447_v46 = vsel %vm560_vm4, %v6082_v33, %v6080_v31 }
 0x3d9   : > { %v1164_v5 = vadd.f32 %v1162_v24, %v1063_v55  ;;  %v1451_v27 = vrot.slane %v1437_v62, %v5826_v8  ;;  %v1439_v28 = vpop.f32.mrb[7].mxu1  ;;  %v1539_v1 = vpop.f32.mrb[9].mxu0  ;;  %v1552_v29 = vrot.slane %v1537_v4, %v5826_v8  ;;  %v1548_v31 = vsel %vm1546_vm8, %v6084_v34, %v6086_v39 }
 0x3da   : > { %v1165_v18 = vadd.f32 %v1163_v57, %v1064_v56  ;;  %v1455_v23 = vrot.slane %v1439_v28, %v5826_v8  ;;  %v1556_v43 = vrot.slane %v1539_v1, %v5826_v8  ;;  %v1648_v4 = vsel %vm1647_vm10, %v6105_v3, %v6102_v63  ;;  %v1846_v34 = vpop.permute.xlu0 %1845 }
 0x3db   : > { %v1264_v21 = vadd.f32 %v1262_v6, %v1164_v5  ;;  %v1456_v53 = vmul.f32 %v1451_v27, %v1446_v32  ;;  %v1557_v59 = vmul.f32 %v1552_v29, %v1547_v26  ;;  %v1649_v28 = vsel %vm1647_vm10, %v6102_v63, %v6105_v3  ;;  %v1848_v32 = vpop.permute.xlu1 %1847 }
 0x3dc   : > { %v1265_v41 = vadd.f32 %v1263_v19, %v1165_v18  ;;  %v1638_v47 = vpop.f32.mrb[8].mxu1  ;;  %v1739_v50 = vpop.f32.mrb[10].mxu0  ;;  %v1457_v56 = vmul.f32 %v1455_v23, %v1447_v46  ;;  %v1558_v5 = vmul.f32 %v1556_v43, %v1548_v31  ;;  %v1749_v23 = vsel %vm1748_vm11, %v1745_v9, %v1747_v20  ;;  %v1888_v31 = vld [vmem:[#allocation8 + $0x18] sm:$0x7] }
 0x3dd   : > { %v1358_v51 = vadd.f32 %v1356_v22, %v1264_v21  ;;  %v1653_v54 = vrot.slane %v1638_v47, %v5826_v8  ;;  %v1640_v55 = vpop.f32.mrb[9].mxu1  ;;  %v1741_v24 = vpop.f32.mrb[11].mxu0  ;;  %v1754_v62 = vrot.slane %v1739_v50, %v5826_v8  ;;  %v1850_v63 = vsel %vm1849_vm7, %v1846_v34, %v1848_v32 }
 0x3de   : > { %v1359_v52 = vadd.f32 %v1357_v42, %v1265_v41  ;;  %v1657_v57 = vrot.slane %v1640_v55, %v5826_v8  ;;  %v1758_v6 = vrot.slane %v1741_v24, %v5826_v8  ;;  %v1750_v41 = vsel %vm1748_vm11, %v1747_v20, %v1745_v9 }
 0x3df   : > { %v1458_v33 = vadd.f32 %v1456_v53, %v1358_v51  ;;  %v1658_v1 = vmul.f32 %v1653_v54, %v1648_v4  ;;  %v1759_v43 = vmul.f32 %v1754_v62, %v1749_v23  ;;  %v1851_v50 = vsel %vm1849_vm7, %v1848_v32, %v1846_v34  ;;  %v1887_v62 = vld [vmem:[#allocation8 + $0x10] sm:$0x7]  ;;  %v1992_v4 = vld [vmem:[#allocation8 + $0x28] sm:$0xff] }
 0x3e0   : > { %v1459_v58 = vadd.f32 %v1457_v56, %v1359_v52  ;;  %v1840_v27 = vpop.f32.mrb[10].mxu1  ;;  %v1659_v22 = vmul.f32 %v1657_v57, %v1649_v28  ;;  %v1760_v47 = vmul.f32 %v1758_v6, %v1750_v41  ;;  %v2992_v52 = vrot.slane %v6010_v40, 4  ;;  %v1886_v57 = vld [vmem:[#allocation8 + $0x8] sm:$0xff]  ;;  %v1993_v28 = vld [vmem:[#allocation8 + $0x30] sm:$0x7] }
 0x3e1   : > { %v1559_v39 = vadd.f32 %v1557_v59, %v1458_v33  ;;  %v1855_v18 = vrot.slane %v1840_v27, %v5826_v8  ;;  %v1842_v19 = vpop.f32.mrb[11].mxu1  ;;  %v3100_v56 = vrot.slane %v5949_v60, 4  ;;  %v1885_v33 = vld [vmem:[#allocation8] sm:$0xff]  ;;  %v4931_v59 = vpack.c.bf16 %v1888_v31, %v1886_v57  ;;  %v2093_v34 = vld [vmem:[#allocation8 + $0x48] sm:$0xff] }
 0x3e2   : > { %v1560_v21 = vadd.f32 %v1558_v5, %v1459_v58  ;;  %v1859_v29 = vrot.slane %v1842_v19, %v5826_v8  ;;  %v1994_v58 = vld [vmem:[#allocation8 + $0x38] sm:$0x7]  ;;  %v4934_v5 = vpack.c.bf16 %v1887_v62, %v1885_v33  ;;  %v1991_v27 = vld [vmem:[#allocation8 + $0x20] sm:$0xff]  ;;  %vm1871_vm7 = vcmask 175192  }
 0x3e3   : > { %v1660_v42 = vadd.f32 %v1658_v1, %v1559_v39  ;;  %v1860_v51 = vmul.f32 %v1855_v18, %v1850_v63  ;;  %v4937_v6 = vpack.c.bf16 %v1994_v58, %v1992_v4  ;;  %4933 = vmatprep.subr.msk.bf16.mxu0 %vm5987_vm12, %v4931_v59  ;;  %v4940_v39 = vpack.c.bf16 %v1993_v28, %v1991_v27  ;;  %v2095_v1 = vld [vmem:[#allocation8 + $0x58] sm:$0x7]  ;;  %v2094_v27 = vld [vmem:[#allocation8 + $0x50] sm:$0x7]  ;;  %v2193_v28 = vld [vmem:[#allocation8 + $0x60] sm:$0xff] }
 0x3e4   : > { %v1661_v3 = vadd.f32 %v1659_v22, %v1560_v21  ;;  %v1861_v54 = vmul.f32 %v1859_v29, %v1851_v50  ;;  %4936 = vmatpush1.bf16.msk.msra.mxu0 %vm5987_vm12, %v4934_v5  ;;  %v4943_v18 = vpack.c.bf16 %v2095_v1, %v2093_v34  ;;  %v2196_v50 = vld [vmem:[#allocation8 + $0x78] sm:$0x7]  ;;  %vm3000_vm11 = vcmask 52224   ;;  %v2195_v34 = vld [vmem:[#allocation8 + $0x70] sm:$0x7] }
 0x3e5   : > { %v1761_v46 = vadd.f32 %v1759_v43, %v1660_v42  ;;  %4939 = vmatprep.subr.msk.bf16.mxu1 %vm5987_vm12, %v4937_v6  ;;  %v2092_v6 = vld [vmem:[#allocation8 + $0x40] sm:$0xff]  ;;  %v2297_v1 = vld [vmem:[#allocation8 + $0x98] sm:$0x7] }
 0x3e6   : > { %v1762_v53 = vadd.f32 %v1760_v47, %v1661_v3  ;;  %4942 = vmatpush1.bf16.msk.msra.mxu1 %vm5987_vm12, %v4940_v39  ;;  %4945 = vmatprep.subr.msk.bf16.mxu0 %vm5987_vm12, %v4943_v18  ;;  %v2194_v47 = vld [vmem:[#allocation8 + $0x68] sm:$0xff] }
 0x3e7   : > { %v6172_v55 = vadd.f32 %v1860_v51, %v1761_v46  ;;  %v4949_v46 = vpack.c.bf16 %v2196_v50, %v2194_v47  ;;  %v2295_v39 = vld [vmem:[#allocation8 + $0x88] sm:$0xff]  ;;  %v2491_v47 = vld [vmem:[#allocation8 + $0xd8] sm:$0x7] }
 0x3e8   : > { %v6174_v24 = vadd.f32 %v1861_v54, %v1762_v53  ;;  %v2395_v18 = vld [vmem:[#allocation8 + $0xa8] sm:$0xff] }
 0x3e9   : > { %v1864_v20 = vsel %vm736_vm9, %v6172_v55, 0.0  ;;  %4951 = vmatprep.subr.msk.bf16.mxu1 %vm5987_vm12, %v4949_v46  ;;  %v2589_v50 = vld [vmem:[#allocation8 + $0xe8] sm:$0xff]  ;;  %v2591_v46 = vld [vmem:[#allocation8 + $0xf8] sm:$0x7] }
 0x3ea   : > { %v1865_v9 = vsel %vm736_vm9, %v6174_v24, 0.0 }
 0x3eb   : > { %v1866_v26 = vadd.f32 %v1865_v9, %v1864_v20  ;;  %v2989_v20 = vpop.xlane.xlu1 %2988 }
 0x3ed   : > { %1867 = vadd.xlane.f32.xlu0 %v1866_v26  ;;  %v2990_v26 = vmul.f32 0.00390625, %v2989_v20  ;;  %v2490_v20 = vld [vmem:[#allocation8 + $0xd0] sm:$0x7] }
 0x403   : > { %2993 = vrot.lane.b32.xlu0 %v2992_v52, %s5447_s23  ;;  %s5455_s23 = smov 64  }
 0x407   : > { %3104 = vrot.lane.b32.xlu0 %v3100_v56, %s5440_s2 }
 0x40b   : > { %3202 = vrot.lane.b32.xlu0 %v3100_v56, %s5441_s12 }
 0x40f   : > { %3300 = vrot.lane.b32.xlu0 %v3100_v56, %s5431_s27 }
 0x413   : > { %3496 = vrot.lane.b32.xlu0 %v3100_v56, %s5432_s25 }
 0x417   : > { %3594 = vrot.lane.b32.xlu0 %v3100_v56, %s5442_s30 }
 0x41b   : > { %3692 = vrot.lane.b32.xlu0 %v3100_v56, %s5443_s17 }
 0x47a   : > { %v1868_v19 = vpop.xlane.xlu0 %1867 }
 0x47b   : > { %v1869_v23 = vmul.f32 0.00390625, %v1868_v19  ;;  %v2397_v19 = vld [vmem:[#allocation8 + $0xb8] sm:$0x7] }
 0x47d   : > { %v1870_v21 = vmul.f32 %v1869_v23, %v6010_v40  ;;  %v3101_v40 = vrot.slane %v5951_v61, 4  ;;  %v4946_v23 = vpack.c.bf16 %v2094_v27, %v2092_v6  ;;  %v2691_v6 = vld [vmem:[#allocation8 + $0x110] sm:$0x7]  ;;  %v2783_v27 = vld [vmem:[#allocation8 + $0x120] sm:$0xff] }
 0x47e   : > { %v2994_v9 = vpop.permute.xlu0 %2993 }
 0x47f   : > { %v1872_v22 = vsel %vm1871_vm7, %v1870_v21, 0.0  ;;  %v2996_v52 = vmul.f32 %v2994_v9, %v2990_v26  ;;  %v4952_v21 = vpack.c.bf16 %v2195_v34, %v2193_v28  ;;  %v2588_v9 = vld [vmem:[#allocation8 + $0xe0] sm:$0xff]  ;;  %v2590_v26 = vld [vmem:[#allocation8 + $0xf0] sm:$0x7]  ;;  %vm3020_vm7 = vcmask 1046528  }
 0x480   : > { %v1873_v29 = vrot.slane %v1872_v22, 4  ;;  %v2785_v28 = vld [vmem:[#allocation8 + $0x130] sm:$0x7] }
 0x481   : > { %v2998_v56 = vrot.slane %v2996_v52, 4 }
 0x482   : > { %v1874_v32 = vadd.f32 %v1873_v29, %v1872_v22  ;;  %v2294_v22 = vld [vmem:[#allocation8 + $0x80] sm:$0xff]  ;;  %v2296_v29 = vld [vmem:[#allocation8 + $0x90] sm:$0x7] }
 0x483   : > { %v3001_v57 = vsel %vm3000_vm11, %v2998_v56, 0.0  ;;  %v4973_v56 = vpack.c.bf16 %v2591_v46, %v2589_v50  ;;  %vm3016_vm11 = vcmask 56320   ;;  %v3221_v46 = vld [vmem:[#allocation10 + $0x20] sm:$0x7f] }
 0x484   : > { %v1875_v41 = vrot.slane %v1874_v32, 2  ;;  %v3002_v31 = vrot.slane %v3001_v57, 4 }
 0x486   : > { %v1876_v42 = vadd.f32 %v1875_v41, %v1874_v32  ;;  %v3003_v33 = vadd.f32 %v3002_v31, %v3001_v57  ;;  %v2394_v32 = vld [vmem:[#allocation8 + $0xa0] sm:$0xff]  ;;  %v2396_v41 = vld [vmem:[#allocation8 + $0xb0] sm:$0x7]  ;;  %v2690_v57 = vld [vmem:[#allocation8 + $0x108] sm:$0xff] }
 0x487   : > { %v2692_v31 = vld [vmem:[#allocation8 + $0x118] sm:$0x7] }
 0x488   : > { %v1877_v43 = vrot.slane %v1876_v42, 1  ;;  %v3004_v59 = vrot.slane %v3003_v33, 2  ;;  %v4979_v34 = vpack.c.bf16 %v2692_v31, %v2690_v57 }
 0x48a   : > { %v1878_v63 = vadd.f32 %v1877_v43, %v1876_v42  ;;  %v3005_v62 = vadd.f32 %v3004_v59, %v3003_v33  ;;  %v4955_v43 = vpack.c.bf16 %v2297_v1, %v2295_v39  ;;  %v2784_v33 = vld [vmem:[#allocation8 + $0x128] sm:$0xff]  ;;  %v2786_v59 = vld [vmem:[#allocation8 + $0x138] sm:$0x7] }
 0x48b   : > { %v4985_v39 = vpack.c.bf16 %v2786_v59, %v2784_v33  ;;  %v2878_v1 = vld [vmem:[#allocation8 + $0x148] sm:$0xff] }
 0x48c   : > { %v4763_v3 = vmul.f32 -1.442695, %v1878_v63  ;;  %v3006_v4 = vrot.slane %v3005_v62, 1  ;;  %v4961_v63 = vpack.c.bf16 %v2397_v19, %v2395_v18  ;;  %v2880_v18 = vld [vmem:[#allocation8 + $0x158] sm:$0x7] }
 0x48e   : > { %5154 = vpow2.f32 %v4763_v3  ;;  %v3007_v58 = vadd.f32 %v3006_v4, %v3005_v62  ;;  %v2489_v3 = vld [vmem:[#allocation8 + $0xc8] sm:$0xff] }
 0x48f   : > { %v4967_v52 = vpack.c.bf16 %v2491_v47, %v2489_v3  ;;  %v3222_v3 = vld [vmem:[#allocation10 + $0x28] sm:$0x7f]  ;;  %v3123_v47 = vld [vmem:[#allocation10 + $0x10] sm:$0x7f] }
 0x490   : > { %v4797_v5 = vmul.f32 -1.442695, %v3007_v58  ;;  %v4976_v58 = vpack.c.bf16 %v2590_v26, %v2588_v9  ;;  %v3613_v9 = vld [vmem:[#allocation10 + $0x60] sm:$0x7f]  ;;  %v5449_v26 = vmov 3  }
 0x491   : > { %5144 = vset.pattern.permute.xlu0 %v5449_v26 }
 0x498   : > { %v5155_v51 = vpop.eup %5154 }
 0x499   : > { %v1882_v53 = vadd.f32 1.0, %v5155_v51  ;;  %v4958_v51 = vpack.c.bf16 %v2296_v29, %v2294_v22  ;;  %v2879_v22 = vld [vmem:[#allocation8 + $0x150] sm:$0x7]  ;;  %v4991_v29 = vpack.c.bf16 %v2880_v18, %v2878_v1 }
 0x49b   : > { %5156 = vrcp.f32 %v1882_v53  ;;  %v4964_v53 = vpack.c.bf16 %v2396_v41, %v2394_v32  ;;  %v3015_v32 = vld [vmem:[#allocation10 + $0x8] sm:$0x7f] }
 0x49c   : > { %5158 = vpow2.f32 %v4797_v5  ;;  %v2689_v5 = vld [vmem:[#allocation8 + $0x100] sm:$0xff] }
 0x49d   : > { %v4982_v19 = vpack.c.bf16 %v2691_v6, %v2689_v5 }
 0x4a5   : > { %v5157_v54 = vpop.eup %5156 }
 0x4a6   : > { %1890 = vrot.lane.b32.xlu1 %v5157_v54, %s5448_s18  ;;  %v2488_v54 = vld [vmem:[#allocation8 + $0xc0] sm:$0xff]  ;;  %s5456_s18 = smov 48  }
 0x4a7   : > { %v4970_v4 = vpack.c.bf16 %v2490_v20, %v2488_v54  ;;  %v3417_v54 = vld [vmem:[#allocation10 + $0x40] sm:$0x7f]  ;;  %v3515_v20 = vld [vmem:[#allocation10 + $0x50] sm:$0x7f] }
 0x4aa   : > { %3106 = vrot.lane.b32.xlu1 %v3101_v40, %s5440_s2  ;;  %s5451_s2 = smov 96  }
 0x4ae   : > { %3204 = vrot.lane.b32.xlu1 %v3101_v40, %s5441_s12  ;;  %s5450_s12 = smov 32  }
 0x4b2   : > { %3302 = vrot.lane.b32.xlu1 %v3101_v40, %s5431_s27 }
 0x4b6   : > { %3498 = vrot.lane.b32.xlu1 %v3101_v40, %s5432_s25 }
 0x4ba   : > { %3596 = vrot.lane.b32.xlu1 %v3101_v40, %s5442_s30  ;;  %s5453_s30 = smov 99  }
 0x4be   : > { %3694 = vrot.lane.b32.xlu1 %v3101_v40, %s5443_s17  ;;  %v5159_v40 = vpop.eup %5158  ;;  %s5454_s17 = smov 80  }
 0x4bf   : > { %v3011_v62 = vadd.f32 1.0, %v5159_v40  ;;  %v3614_v40 = vld [vmem:[#allocation10 + $0x68] sm:$0x7f] }
 0x4c1   : > { %5160 = vrcp.f32 %v3011_v62 }
 0x4cb   : > { %v5161_v50 = vpop.eup %5160 }
 0x518   : > { %v6208_v42 = vpop.permute.xlu1 %1890 }
 0x519   : > { %4766 = vmatmul.mubr.msk.f32.vlgmr.msra.gmra.mrb[12].mxu0 %vm762_vm15, %v6208_v42  ;;  %4769 = vmatmul.mubr.msk.f32.vlgmr.msra.gmra.mrb[12].mxu1 %vm762_vm15, %v6208_v42 }
 0x51a   : > { %4948 = vmatpush1.bf16.msk.msra.mxu0 %vm5987_vm12, %v4946_v23  ;;  %4954 = vmatpush1.bf16.msk.msra.mxu1 %vm5987_vm12, %v4952_v21  ;;  %v4988_v23 = vpack.c.bf16 %v2785_v28, %v2783_v27  ;;  %v2877_v21 = vld [vmem:[#allocation8 + $0x140] sm:$0xff] }
 0x51b   : > { %2166 = vmatprep.mubr.f32.mxu0 %v6782_v2  ;;  %2267 = vmatprep.mubr.f32.mxu1 %v6782_v2  ;;  %v4994_v41 = vpack.c.bf16 %v2879_v22, %v2877_v21 }
 0x51c   : > { %4957 = vmatprep.subr.msk.bf16.mxu0 %vm5987_vm12, %v4955_v43  ;;  %4963 = vmatprep.subr.msk.bf16.mxu1 %vm5987_vm12, %v4961_v63  ;;  %v3014_v43 = vld [vmem:[#allocation10] sm:$0x7f]  ;;  %v3124_v63 = vld [vmem:[#allocation10 + $0x18] sm:$0x7f] }
 0x51d   : > { %4772 = vmatmul.mubr.msk.f32.vlgmr.msra.gmra.mrb[14].mxu0 %vm762_vm15, %v6208_v42  ;;  %4775 = vmatmul.mubr.msk.f32.vlgmr.msra.gmra.mrb[14].mxu1 %vm762_vm15, %v6208_v42 }
 0x51e   : > { %4960 = vmatpush1.bf16.msk.msra.mxu0 %vm5987_vm12, %v4958_v51  ;;  %4966 = vmatpush1.bf16.msk.msra.mxu1 %vm5987_vm12, %v4964_v53  ;;  %v3418_v51 = vld [vmem:[#allocation10 + $0x48] sm:$0x7f]  ;;  %v3319_v53 = vld [vmem:[#allocation10 + $0x30] sm:$0x7f] }
 0x51f   : > { %2368 = vmatprep.mubr.f32.mxu0 %v6782_v2  ;;  %2468 = vmatprep.mubr.f32.mxu1 %v6782_v2 }
 0x520   : > { %4969 = vmatprep.subr.msk.bf16.mxu0 %vm5987_vm12, %v4967_v52  ;;  %4975 = vmatprep.subr.msk.bf16.mxu1 %vm5987_vm12, %v4973_v56  ;;  %v3107_v52 = vpop.permute.xlu1 %3106  ;;  %v3105_v56 = vpop.permute.xlu0 %3104 }
 0x521   : > { %4778 = vmatmul.mubr.msk.f32.vlgmr.msra.gmra.mrb[16].mxu0 %vm762_vm15, %v6208_v42  ;;  %4781 = vmatmul.mubr.msk.f32.vlgmr.msra.gmra.mrb[16].mxu1 %vm762_vm15, %v6208_v42  ;;  %v3109_v30 = vsel %vm1050_vm13, %v3107_v52, %v3105_v56 }
 0x522   : > { %4972 = vmatpush1.bf16.msk.msra.mxu0 %vm5987_vm12, %v4970_v4  ;;  %4978 = vmatpush1.bf16.msk.msra.mxu1 %vm5987_vm12, %v4976_v58 }
 0x523   : > { %2562 = vmatprep.mubr.f32.mxu0 %v6782_v2  ;;  %2662 = vmatprep.mubr.f32.mxu1 %v6782_v2 }
 0x524   : > { %4981 = vmatprep.subr.msk.bf16.mxu0 %vm5987_vm12, %v4979_v34  ;;  %4987 = vmatprep.subr.msk.bf16.mxu1 %vm5987_vm12, %v4985_v39  ;;  %v3205_v62 = vpop.permute.xlu1 %3204  ;;  %v3203_v27 = vpop.permute.xlu0 %3202 }
 0x525   : > { %4784 = vmatmul.mubr.msk.f32.vlgmr.msra.gmra.mrb[18].mxu0 %vm762_vm15, %v6208_v42  ;;  %4787 = vmatmul.mubr.msk.f32.vlgmr.msra.gmra.mrb[18].mxu1 %vm762_vm15, %v6208_v42  ;;  %v3207_v25 = vsel %vm1151_vm14, %v3205_v62, %v3203_v27 }
 0x526   : > { %4984 = vmatpush1.bf16.msk.msra.mxu0 %vm5987_vm12, %v4982_v19  ;;  %4990 = vmatpush1.bf16.msk.msra.mxu1 %vm5987_vm12, %v4988_v23 }
 0x527   : > { %2763 = vmatprep.mubr.f32.mxu0 %v6782_v2  ;;  %2857 = vmatprep.mubr.f32.mxu1 %v6782_v2 }
 0x528   : > { %4993 = vmatprep.subr.msk.bf16.mxu0 %vm5987_vm12, %v4991_v29  ;;  %4798 = vmatprep.subr.msk.mxu1 %vm3020_vm7, %v3015_v32  ;;  %v3303_v18 = vpop.permute.xlu1 %3302  ;;  %v3301_v29 = vpop.permute.xlu0 %3300 }
 0x529   : > { %4790 = vmatmul.mubr.msk.f32.vlgmr.msra.gmra.mrb[20].mxu0 %vm762_vm15, %v6208_v42  ;;  %4793 = vmatmul.mubr.msk.f32.vlgmr.msra.gmra.mrb[20].mxu1 %vm762_vm15, %v6208_v42  ;;  %v3305_v10 = vsel %vm523_vm3, %v3303_v18, %v3301_v29 }
 0x52a   : > { %4996 = vmatpush1.bf16.msk.msra.mxu0 %vm5987_vm12, %v4994_v41  ;;  %2951 = vmatprep.mubr.f32.mxu0 %v6782_v2  ;;  %vm1975_vm12 = vcmp.lt.s32.totalorder %v5824_v7, 80 }
 0x52b   : > { %4799 = vmatpush1.msk.msra.mxu1 %vm3020_vm7, %v3014_v43  ;;  %3091 = vmatprep.mubr.f32.mxu1 %v6782_v2 }
 0x52c   : > { %4801 = vmatprep.subr.msk.mxu0 %vm3020_vm7, %v3124_v63  ;;  %4804 = vmatprep.subr.msk.mxu1 %vm3020_vm7, %v3222_v3  ;;  %v3499_v3 = vpop.permute.xlu1 %3498 }
 0x52d   : > { %4796 = vmatmul.mubr.msk.f32.vlgmr.msra.gmra.mrb[22].mxu0 %vm762_vm15, %v6208_v42  ;;  %4800 = vmatmul.mubr.msk.f32.vlgmr.msra.gmra.mrb[22].mxu1 %vm3016_vm11, %v5161_v50  ;;  %v3516_v42 = vld [vmem:[#allocation10 + $0x58] sm:$0x7f]  ;;  %vm2076_vm15 = vcmp.lt.s32.totalorder %v5824_v7, 64 }
 0x52e   : > { %4802 = vmatpush1.msk.msra.mxu0 %vm3020_vm7, %v3123_v47  ;;  %3195 = vmatprep.mubr.f32.mxu0 %v6782_v2 }
 0x52f   : > { %4805 = vmatpush1.msk.msra.mxu1 %vm3020_vm7, %v3221_v46  ;;  %3293 = vmatprep.mubr.f32.mxu1 %v6782_v2 }
 0x530   : > { %4807 = vmatprep.subr.msk.mxu0 %vm3020_vm7, %v3320_v0  ;;  %4810 = vmatprep.subr.msk.mxu1 %vm3020_vm7, %v3418_v51  ;;  %v3497_v51 = vpop.permute.xlu0 %3496  ;;  %v3597_v12 = vpop.permute.xlu1 %3596 }
 0x531   : > { %4803 = vmatmul.mubr.msk.f32.vlgmr.msra.gmra.mrb[24].mxu0 %vm3016_vm11, %v5161_v50  ;;  %4806 = vmatmul.mubr.msk.f32.vlgmr.msra.gmra.mrb[24].mxu1 %vm3016_vm11, %v5161_v50 }
 0x532   : > { %4808 = vmatpush1.msk.msra.mxu0 %vm3020_vm7, %v3319_v53  ;;  %3391 = vmatprep.mubr.f32.mxu0 %v6782_v2 }
 0x533   : > { %4811 = vmatpush1.msk.msra.mxu1 %vm3020_vm7, %v3417_v54  ;;  %3489 = vmatprep.mubr.f32.mxu1 %v6782_v2 }
 0x534   : > { %4813 = vmatprep.subr.msk.mxu0 %vm3020_vm7, %v3516_v42  ;;  %4816 = vmatprep.subr.msk.mxu1 %vm3020_vm7, %v3614_v40 }
 0x535   : > { %4809 = vmatmul.mubr.msk.f32.vlgmr.msra.gmra.mrb[26].mxu0 %vm3016_vm11, %v5161_v50  ;;  %4812 = vmatmul.mubr.msk.f32.vlgmr.msra.gmra.mrb[26].mxu1 %vm3016_vm11, %v5161_v50 }
 0x536   : > { %4814 = vmatpush1.msk.msra.mxu0 %vm3020_vm7, %v3515_v20  ;;  %3587 = vmatprep.mubr.f32.mxu0 %v6782_v2 }
 0x537   : > { %4817 = vmatpush1.msk.msra.mxu1 %vm3020_vm7, %v3613_v9  ;;  %3685 = vmatprep.mubr.f32.mxu1 %v6782_v2 }
 0x539   : > { %4815 = vmatmul.mubr.msk.f32.vlgmr.msra.gmra.mrb[28].mxu0 %vm3016_vm11, %v5161_v50  ;;  %4818 = vmatmul.mubr.msk.f32.vlgmr.msra.gmra.mrb[28].mxu1 %vm3016_vm11, %v5161_v50 }
 0x53a   : > { %3808 = vmatprep.mubr.f32.mxu0 %v6782_v2  ;;  %3906 = vmatprep.mubr.f32.mxu1 %v6782_v2 }
 0x5ec   : > { %v6303_v57 = vpop.f32.mrb[12].mxu0  ;;  %v6305_v31 = vpop.f32.mrb[12].mxu1 }
 0x5ed   : > { %v6307_v33 = vpop.f32.mrb[13].mxu0  ;;  %v6309_v59 = vpop.f32.mrb[13].mxu1 }
 0x5f0   : > { %v6311_v4 = vpop.f32.mrb[14].mxu0  ;;  %v6313_v58 = vpop.f32.mrb[14].mxu1 }
 0x5f1   : > { %v6315_v5 = vpop.f32.mrb[15].mxu0  ;;  %v6317_v6 = vpop.f32.mrb[15].mxu1 }
 0x5f4   : > { %v6319_v28 = vpop.f32.mrb[16].mxu0  ;;  %v6321_v34 = vpop.f32.mrb[16].mxu1 }
 0x5f5   : > { %v6323_v39 = vpop.f32.mrb[17].mxu0  ;;  %v6325_v1 = vpop.f32.mrb[17].mxu1 }
 0x5f8   : > { %v6327_v19 = vpop.f32.mrb[18].mxu0  ;;  %v6329_v23 = vpop.f32.mrb[18].mxu1 }
 0x5f9   : > { %v6331_v21 = vpop.f32.mrb[19].mxu0  ;;  %v6333_v22 = vpop.f32.mrb[19].mxu1 }
 0x5fc   : > { %v6335_v32 = vpop.f32.mrb[20].mxu0  ;;  %v6337_v41 = vpop.f32.mrb[20].mxu1 }
 0x5fd   : > { %v6339_v43 = vpop.f32.mrb[21].mxu0  ;;  %v6341_v63 = vpop.f32.mrb[21].mxu1 }
 0x600   : > { %v6343_v47 = vpop.f32.mrb[22].mxu0  ;;  %v3093_v50 = vpop.f32.mrb[22].mxu1 }
 0x601   : > { %v6345_v46 = vpop.f32.mrb[23].mxu0  ;;  %v3095_v0 = vpop.f32.mrb[23].mxu1  ;;  %v3113_v53 = vrot.slane %v3093_v50, %v5826_v8 }
 0x602   : > { %v3117_v54 = vrot.slane %v3095_v0, %v5826_v8  ;;  %v3108_v0 = vsel %vm1050_vm13, %v3105_v56, %v3107_v52  ;;  %vm2177_vm13 = vcmp.lt.s32.totalorder %v5824_v7, 48 }
 0x604   : > { %v3197_v42 = vpop.f32.mrb[24].mxu0  ;;  %v3295_v40 = vpop.f32.mrb[24].mxu1  ;;  %v3119_v44 = vmul.f32 %v3117_v54, %v3108_v0 }
 0x605   : > { %v3211_v20 = vrot.slane %v3197_v42, %v5826_v8  ;;  %v3309_v9 = vrot.slane %v3295_v40, %v5826_v8  ;;  %v3199_v26 = vpop.f32.mrb[25].mxu0  ;;  %v3297_v2 = vpop.f32.mrb[25].mxu1  ;;  %v3206_v42 = vsel %vm1151_vm14, %v3203_v27, %v3205_v62  ;;  %v3118_v40 = vmul.f32 %v3113_v53, %v3109_v30 }
 0x606   : > { %v3215_v13 = vrot.slane %v3199_v26, %v5826_v8  ;;  %v3313_v50 = vrot.slane %v3297_v2, %v5826_v8  ;;  %v3304_v26 = vsel %vm523_vm3, %v3301_v29, %v3303_v18  ;;  %v3595_v30 = vpop.permute.xlu0 %3594  ;;  %vm2278_vm14 = vcmp.lt.s32.totalorder %v5824_v7, 32 }
 0x607   : > { %v3216_v11 = vmul.f32 %v3211_v20, %v3207_v25  ;;  %v3314_v38 = vmul.f32 %v3309_v9, %v3305_v10  ;;  %v3500_v9 = vsel %vm560_vm4, %v3497_v51, %v3499_v3 }
 0x608   : > { %v3217_v49 = vmul.f32 %v3215_v13, %v3206_v42  ;;  %v3393_v48 = vpop.f32.mrb[26].mxu0  ;;  %v3491_v45 = vpop.f32.mrb[26].mxu1  ;;  %v3315_v27 = vmul.f32 %v3313_v50, %v3304_v26 }
 0x609   : > { %v3218_v2 = vadd.f32 %v3216_v11, %v3118_v40  ;;  %v3401_v52 = vrot.slane %v3393_v48, %v5826_v8  ;;  %v3395_v56 = vpop.f32.mrb[27].mxu0  ;;  %v3493_v37 = vpop.f32.mrb[27].mxu1  ;;  %v3505_v13 = vrot.slane %v3491_v45, %v5826_v8  ;;  %v3501_v45 = vsel %vm560_vm4, %v3499_v3, %v3497_v51 }
 0x60a   : > { %v3219_v62 = vadd.f32 %v3217_v49, %v3119_v44  ;;  %v3405_v25 = vrot.slane %v3395_v56, %v5826_v8  ;;  %v3509_v11 = vrot.slane %v3493_v37, %v5826_v8  ;;  %v3695_v42 = vpop.permute.xlu1 %3694 }
 0x60b   : > { %v3316_v53 = vadd.f32 %v3314_v38, %v3218_v2  ;;  %v3406_v54 = vmul.f32 %v3401_v52, %v5949_v60  ;;  %v3510_v26 = vmul.f32 %v3505_v13, %v3500_v9  ;;  %v3598_v2 = vsel %vm1546_vm8, %v3595_v30, %v3597_v12 }
 0x60c   : > { %v3317_v20 = vadd.f32 %v3315_v27, %v3219_v62  ;;  %v3407_v0 = vmul.f32 %v3405_v25, %v5951_v61  ;;  %v3589_v10 = vpop.f32.mrb[28].mxu0  ;;  %v3687_v18 = vpop.f32.mrb[28].mxu1  ;;  %v3511_v56 = vmul.f32 %v3509_v11, %v3501_v45  ;;  %v3599_v25 = vsel %vm1546_vm8, %v3597_v12, %v3595_v30  ;;  %v3835_v45 = vld [vmem:[#allocation11 + $0x18] sm:$0x7f] }
 0x60d   : > { %v3410_v48 = vrot.slane %v3406_v54, 4  ;;  %v3603_v29 = vrot.slane %v3589_v10, %v5826_v8  ;;  %v3591_v44 = vpop.f32.mrb[29].mxu0  ;;  %v3689_v49 = vpop.f32.mrb[29].mxu1  ;;  %v3701_v37 = vrot.slane %v3687_v18, %v5826_v8  ;;  %v5452_v9 = vmov 2   ;;  %4823 = vmatprep.subr.msk.mxu1 %vm3020_vm7, %v3835_v45 }
 0x60e   : > { %v3411_v38 = vrot.slane %v3407_v0, 4  ;;  %v3607_v50 = vrot.slane %v3591_v44, %v5826_v8  ;;  %v3705_v62 = vrot.slane %v3689_v49, %v5826_v8  ;;  %v3693_v27 = vpop.permute.xlu0 %3692  ;;  %v6412_v49 = vld [vmem:[%s6763_s3] sm:$0xff]  ;;  %5143 = vset.pattern.permute.xlu1 %v5452_v9  ;;  %vm3717_vm8 = vcmask 290024  }
 0x60f   : > { %v3414_v40 = vadd.f32 %v3410_v48, %v3316_v53  ;;  %v3608_v0 = vmul.f32 %v3603_v29, %v3598_v2  ;;  %v3696_v3 = vsel %vm1647_vm10, %v3693_v27, %v3695_v42  ;;  %v3697_v13 = vsel %vm1647_vm10, %v3695_v42, %v3693_v27  ;;  %v3834_v42 = vld [vmem:[#allocation11 + $0x10] sm:$0x7f] }
 0x610   : > { %v3415_v52 = vadd.f32 %v3411_v38, %v3317_v20  ;;  %v3609_v53 = vmul.f32 %v3607_v50, %v3599_v25  ;;  %v3706_v18 = vmul.f32 %v3701_v37, %v3696_v3  ;;  %v3707_v11 = vmul.f32 %v3705_v62, %v3697_v13  ;;  %v3732_v38 = vld [vmem:[#allocation11 + $0x8] sm:$0x7f]  ;;  %v3731_v50 = vld [vmem:[#allocation11] sm:$0x7f]  ;;  %4824 = vmatpush1.msk.msra.mxu1 %vm3020_vm7, %v3834_v42  ;;  %v5167_v2 = vld [vmem:[%s6765_s5] sm:$0xf] }
 0x611   : > { %v3512_v54 = vadd.f32 %v3510_v26, %v3414_v40  ;;  %4820 = vmatprep.subr.msk.mxu0 %vm3020_vm7, %v3732_v38  ;;  %v3933_v40 = vld [vmem:[#allocation11 + $0x28] sm:$0x7f]  ;;  %v6829_v9 = vmov 0.0   ;;  %v4122_v38 = vld [vmem:[#allocation11 + $0x40] sm:$0x7f]  ;;  %vm2673_vm10 = vcmp.lt.s32.totalorder %v5824_v7, 96 }
 0x612   : > { %v3513_v51 = vadd.f32 %v3511_v56, %v3415_v52  ;;  %4821 = vmatpush1.msk.msra.mxu0 %vm3020_vm7, %v3731_v50  ;;  %v4220_v50 = vld [vmem:[#allocation11 + $0x50] sm:$0x7f]  ;;  %v4319_v42 = vld [vmem:[#allocation11 + $0x68] sm:$0x7f] }
 0x613   : > { %v3610_v10 = vadd.f32 %v3608_v0, %v3512_v54  ;;  %4826 = vmatprep.subr.msk.mxu0 %vm3020_vm7, %v3933_v40  ;;  %v4318_v40 = vld [vmem:[#allocation11 + $0x60] sm:$0x7f] }
 0x614   : > { %v3611_v20 = vadd.f32 %v3609_v53, %v3513_v51 }
 0x615   : > { %v6387_v48 = vadd.f32 %v3706_v18, %v3610_v10  ;;  %v4031_v10 = vld [vmem:[#allocation11 + $0x38] sm:$0x7f] }
 0x616   : > { %v6389_v44 = vadd.f32 %v3707_v11, %v3611_v20  ;;  %4829 = vmatprep.subr.msk.mxu1 %vm3020_vm7, %v4031_v10  ;;  %v3932_v20 = vld [vmem:[#allocation11 + $0x20] sm:$0x7f]  ;;  %v4030_v11 = vld [vmem:[#allocation11 + $0x30] sm:$0x7f] }
 0x617   : > { %v3710_v12 = vsel %vm736_vm9, %v6387_v48, 0.0 }
 0x618   : > { %v3711_v30 = vsel %vm736_vm9, %v6389_v44, 0.0 }
 0x619   : > { %v3712_v29 = vadd.f32 %v3711_v30, %v3710_v12  ;;  %v4123_v30 = vld [vmem:[#allocation11 + $0x48] sm:$0x7f] }
 0x61b   : > { %3713 = vadd.xlane.f32.xlu0 %v3712_v29  ;;  %v4221_v29 = vld [vmem:[#allocation11 + $0x58] sm:$0x7f] }
 0x631   : > { %2276 = vrot.lane.b32.xlu0 %v6174_v24, %s5450_s12 }
 0x635   : > { %3915 = vrot.lane.b32.xlu0 %v6389_v44, %s5450_s12 }
 0x639   : > { %4013 = vrot.lane.b32.xlu0 %v6389_v44, %s5428_s20 }
 0x63d   : > { %2571 = vrot.lane.b32.xlu0 %v6174_v24, %s5436_s26 }
 0x641   : > { %2671 = vrot.lane.b32.xlu0 %v6174_v24, %s5451_s2 }
 0x645   : > { %4203 = vrot.lane.b32.xlu0 %v6389_v44, %s5436_s26 }
 0x649   : > { %4301 = vrot.lane.b32.xlu0 %v6389_v44, %s5451_s2 }
 0x64d   : > { %2977 = vperm.xlu0 %5144, %v6412_v49  }
 0x6a8   : > { %v3714_v26 = vpop.xlane.xlu0 %3713 }
 0x6a9   : > { %v3715_v37 = vmul.f32 0.00390625, %v3714_v26 }
 0x6ab   : > { %v3716_v52 = vmul.f32 %v5167_v2, %v3715_v37 }
 0x6ad   : > { %v3718_v56 = vsel %vm3717_vm8, %v3716_v52, 0.0 }
 0x6ae   : > { %v3719_v62 = vrot.slane %v3718_v56, 4 }
 0x6b0   : > { %v3720_v27 = vadd.f32 %v3719_v62, %v3718_v56  ;;  %v1981_v56 = vrot.slane %v6303_v57, %v5826_v8  ;;  %v2082_v62 = vrot.slane %v6305_v31, %v5826_v8 }
 0x6b2   : > { %v3721_v25 = vrot.slane %v3720_v27, 2 }
 0x6b4   : > { %v3722_v54 = vadd.f32 %v3721_v25, %v3720_v27  ;;  %v1985_v27 = vrot.slane %v6307_v33, %v5826_v8  ;;  %v2086_v25 = vrot.slane %v6309_v59, %v5826_v8  ;;  %v2183_v33 = vrot.slane %v6311_v4, %v5826_v8 }
 0x6b5   : > { %v2187_v59 = vrot.slane %v6315_v5, %v5826_v8  ;;  %v2284_v4 = vrot.slane %v6313_v58, %v5826_v8  ;;  %v2288_v5 = vrot.slane %v6317_v6, %v5826_v8  ;;  %v2384_v58 = vrot.slane %v6319_v28, %v5826_v8 }
 0x6b6   : > { %v3723_v0 = vrot.slane %v3722_v54, 1  ;;  %v2478_v6 = vrot.slane %v6321_v34, %v5826_v8 }
 0x6b8   : > { %v3724_v3 = vadd.f32 %v3723_v0, %v3722_v54  ;;  %v2483_v28 = vmul.f32 %v2478_v6, %v6172_v55  ;;  %v2777_v6 = vrot.slane %v6339_v43, %v5826_v8  ;;  %v2965_v43 = vrot.slane %v6345_v46, %v5826_v8 }
 0x6ba   : > { %v4819_v51 = vmul.f32 -1.442695, %v3724_v3 }
 0x6bc   : > { %5162 = vpow2.f32 %v4819_v51 }
 0x6c6   : > { %v5163_v53 = vpop.eup %5162 }
 0x6c7   : > { %v3728_v13 = vadd.f32 1.0, %v5163_v53 }
 0x6c9   : > { %5164 = vrcp.f32 %v3728_v13 }
 0x6d3   : > { %v5165_v18 = vpop.eup %5164 }
 0x6d4   : > { %3734 = vrot.lane.b32.xlu1 %v5165_v18, %s5453_s30 }
 0x6d8   : > { %1971 = vrot.lane.b32.xlu1 %v6172_v55, %s5454_s17 }
 0x6dc   : > { %1973 = vrot.lane.b32.xlu1 %v6174_v24, %s5454_s17 }
 0x6e0   : > { %2072 = vrot.lane.b32.xlu1 %v6172_v55, %s5455_s23 }
 0x6e4   : > { %2074 = vrot.lane.b32.xlu1 %v6174_v24, %s5455_s23 }
 0x6e8   : > { %2173 = vrot.lane.b32.xlu1 %v6172_v55, %s5456_s18 }
 0x6ec   : > { %2175 = vrot.lane.b32.xlu1 %v6174_v24, %s5456_s18 }
 0x6f0   : > { %2274 = vrot.lane.b32.xlu1 %v6172_v55, %s5450_s12 }
 0x6f4   : > { %2375 = vrot.lane.b32.xlu1 %v6172_v55, %s5428_s20 }
 0x6f8   : > { %2377 = vrot.lane.b32.xlu1 %v6174_v24, %s5428_s20 }
 0x6fc   : > { %3815 = vrot.lane.b32.xlu1 %v6387_v48, %s5456_s18 }
 0x700   : > { %3817 = vrot.lane.b32.xlu1 %v6389_v44, %s5456_s18  ;;  %s6849_s18 = sld [smem:[#allocation33_spill]] }
 0x704   : > { %3913 = vrot.lane.b32.xlu1 %v6387_v48, %s5450_s12  ;;  %s6830_s12 = smov 113  }
 0x708   : > { %4011 = vrot.lane.b32.xlu1 %v6387_v48, %s5428_s20 }
 0x70c   : > { %2569 = vrot.lane.b32.xlu1 %v6172_v55, %s5436_s26 }
 0x710   : > { %2669 = vrot.lane.b32.xlu1 %v6172_v55, %s5451_s2  ;;  %v2582_v55 = vrot.slane %v6331_v21, %v5826_v8 }
 0x714   : > { %4201 = vrot.lane.b32.xlu1 %v6387_v48, %s5436_s26 }
 0x718   : > { %4299 = vrot.lane.b32.xlu1 %v6387_v48, %s5451_s2 }
 0x71c   : > { %2971 = vperm.xlu1 %5143, %v6412_v49  }
 0x720   : > { %4397 = vrot.lane.b32.xlu1 %v6387_v48, %s5454_s17 }
 0x724   : > { %4399 = vrot.lane.b32.xlu1 %v6389_v44, %s5454_s17 }
 0x746   : > { %v3735_v12 = vpop.permute.xlu1 %3734 }
 0x747   : > { %4822 = vmatmul.mubr.msk.f32.vlgmr.msra.gmra.mrb[30].mxu0 %vm3016_vm11, %v3735_v12  ;;  %4825 = vmatmul.mubr.msk.f32.vlgmr.msra.gmra.mrb[30].mxu1 %vm3016_vm11, %v3735_v12 }
 0x748   : > { %4827 = vmatpush1.msk.msra.mxu0 %vm3020_vm7, %v3932_v20  ;;  %4830 = vmatpush1.msk.msra.mxu1 %vm3020_vm7, %v4030_v11 }
 0x749   : > { %4004 = vmatprep.mubr.f32.mxu0 %v6829_v9  ;;  %4102 = vmatprep.mubr.f32.mxu1 %v6829_v9 }
 0x74a   : > { %4832 = vmatprep.subr.msk.mxu0 %vm3020_vm7, %v4123_v30  ;;  %v1972_v45 = vpop.permute.xlu1 %1971  ;;  %4835 = vmatprep.subr.msk.mxu1 %vm3020_vm7, %v4221_v29 }
 0x74b   : > { %4828 = vmatmul.mubr.msk.f32.vlgmr.msra.gmra.mrb[32].mxu0 %vm3016_vm11, %v3735_v12  ;;  %4831 = vmatmul.mubr.msk.f32.vlgmr.msra.gmra.mrb[32].mxu1 %vm3016_vm11, %v3735_v12 }
 0x74c   : > { %4833 = vmatpush1.msk.msra.mxu0 %vm3020_vm7, %v4122_v38  ;;  %4836 = vmatpush1.msk.msra.mxu1 %vm3020_vm7, %v4220_v50 }
 0x74d   : > { %4194 = vmatprep.mubr.f32.mxu0 %v6829_v9  ;;  %4292 = vmatprep.mubr.f32.mxu1 %v6829_v9 }
 0x74e   : > { %4838 = vmatprep.subr.msk.mxu0 %vm3020_vm7, %v4319_v42  ;;  %v1974_v26 = vpop.permute.xlu1 %1973 }
 0x74f   : > { %4834 = vmatmul.mubr.msk.f32.vlgmr.msra.gmra.mrb[34].mxu0 %vm3016_vm11, %v3735_v12  ;;  %4837 = vmatmul.mubr.msk.f32.vlgmr.msra.gmra.mrb[34].mxu1 %vm3016_vm11, %v3735_v12  ;;  %v6478_v2 = vsel %vm1975_vm12, %v1972_v45, %v1974_v26  ;;  %v6482_v52 = vsel %vm1975_vm12, %v1974_v26, %v1972_v45 }
 0x750   : > { %4839 = vmatpush1.msk.msra.mxu0 %vm3020_vm7, %v4318_v40  ;;  %4390 = vmatprep.mubr.f32.mxu0 %v6829_v9  ;;  %v1986_v51 = vmul.f32 %v1981_v56, %v6482_v52  ;;  %v1987_v53 = vmul.f32 %v1985_v27, %v6478_v2 }
 0x751   : > { %4565 = vmatprep.mubr.f32.mxu1 %v6829_v9  ;;  %v2277_v9 = vpop.permute.xlu0 %2276 }
 0x752   : > { %v2073_v37 = vpop.permute.xlu1 %2072 }
 0x753   : > { %4840 = vmatmul.mubr.msk.f32.vlgmr.msra.gmra.mrb[36].mxu0 %vm3016_vm11, %v3735_v12 }
 0x756   : > { %v2075_v54 = vpop.permute.xlu1 %2074 }
 0x757   : > { %v6492_v0 = vsel %vm2076_vm15, %v2073_v37, %v2075_v54  ;;  %v6494_v3 = vsel %vm2076_vm15, %v2075_v54, %v2073_v37  ;;  %v2482_v54 = vrot.slane %v6325_v1, %v5826_v8 }
 0x758   : > { %v2087_v57 = vmul.f32 %v2082_v62, %v6494_v3  ;;  %v2088_v13 = vmul.f32 %v2086_v25, %v6492_v0  ;;  %v2388_v25 = vrot.slane %v6323_v39, %v5826_v8  ;;  %v3916_v39 = vpop.permute.xlu0 %3915 }
 0x75a   : > { %v2089_v31 = vadd.f32 %v2087_v57, %v1986_v51  ;;  %v2090_v10 = vadd.f32 %v2088_v13, %v1987_v53  ;;  %v2174_v18 = vpop.permute.xlu1 %2173 }
 0x75e   : > { %v2176_v20 = vpop.permute.xlu1 %2175 }
 0x75f   : > { %v6507_v11 = vsel %vm2177_vm13, %v2174_v18, %v2176_v20  ;;  %v6511_v12 = vsel %vm2177_vm13, %v2176_v20, %v2174_v18 }
 0x760   : > { %v2188_v30 = vmul.f32 %v2183_v33, %v6511_v12  ;;  %v2189_v29 = vmul.f32 %v2187_v59, %v6507_v11 }
 0x762   : > { %v2190_v38 = vadd.f32 %v2188_v30, %v2089_v31  ;;  %v2191_v50 = vadd.f32 %v2189_v29, %v2090_v10  ;;  %v2275_v45 = vpop.permute.xlu1 %2274  ;;  %v2484_v10 = vmul.f32 %v2482_v54, %v6174_v24  ;;  %v6538_v30 = vpop.permute.xlu0 %4013  ;;  %v2871_v54 = vrot.slane %v6341_v63, %v5826_v8 }
 0x763   : > { %v2279_v42 = vsel %vm2278_vm14, %v2275_v45, %v2277_v9  ;;  %v2280_v40 = vsel %vm2278_vm14, %v2277_v9, %v2275_v45  ;;  %v2578_v9 = vrot.slane %v6327_v19, %v5826_v8  ;;  %v2683_v19 = vrot.slane %v6333_v22, %v5826_v8 }
 0x764   : > { %v2289_v26 = vmul.f32 %v2284_v4, %v2280_v40  ;;  %v2290_v37 = vmul.f32 %v2288_v5, %v2279_v42  ;;  %v2679_v40 = vrot.slane %v6329_v23, %v5826_v8  ;;  %v2867_v22 = vrot.slane %v6337_v41, %v5826_v8 }
 0x766   : > { %v2291_v56 = vadd.f32 %v2289_v26, %v2190_v38  ;;  %v2292_v62 = vadd.f32 %v2290_v37, %v2191_v50  ;;  %v2376_v27 = vpop.permute.xlu1 %2375  ;;  %v2572_v5 = vpop.permute.xlu0 %2571 }
 0x76a   : > { %v2378_v51 = vpop.permute.xlu1 %2377  ;;  %v2672_v26 = vpop.permute.xlu0 %2671 }
 0x76b   : > { %v2379_v53 = vsel %vm479_vm0, %v2376_v27, %v2378_v51  ;;  %v2380_v57 = vsel %vm479_vm0, %v2378_v51, %v2376_v27 }
 0x76c   : > { %v2389_v13 = vmul.f32 %v2384_v58, %v2380_v57  ;;  %v2390_v31 = vmul.f32 %v2388_v25, %v2379_v53  ;;  %v2773_v58 = vrot.slane %v6335_v32, %v5826_v8  ;;  %v2779_v53 = vmul.f32 %v2777_v6, %v6482_v52 }
 0x76d   : > { %v2961_v32 = vrot.slane %v6343_v47, %v5826_v8 }
 0x76e   : > { %v2391_v34 = vadd.f32 %v2389_v13, %v2291_v56  ;;  %v2392_v18 = vadd.f32 %v2390_v31, %v2292_v62  ;;  %v3816_v33 = vpop.permute.xlu1 %3815  ;;  %v2778_v51 = vmul.f32 %v2773_v58, %v6478_v2  ;;  %v2872_v31 = vmul.f32 %v2867_v22, %v6492_v0 }
 0x76f   : > { %v2966_v63 = vmul.f32 %v2961_v32, %v6507_v11  ;;  %v2967_v2 = vmul.f32 %v2965_v43, %v6511_v12 }
 0x770   : > { %v2485_v59 = vadd.f32 %v2483_v28, %v2391_v34  ;;  %v2486_v20 = vadd.f32 %v2484_v10, %v2392_v18  ;;  %v2873_v28 = vmul.f32 %v2871_v54, %v6494_v3 }
 0x772   : > { %v3818_v1 = vpop.permute.xlu1 %3817 }
 0x773   : > { %v3820_v12 = vsel %vm2177_vm13, %v3818_v1, %v3816_v33 }
 0x776   : > { %v3914_v29 = vpop.permute.xlu1 %3913 }
 0x77a   : > { %v6540_v4 = vpop.permute.xlu1 %4011 }
 0x77b   : > { %v4015_v54 = vsel %vm479_vm0, %v6540_v4, %v6538_v30 }
 0x77e   : > { %v2570_v24 = vpop.permute.xlu1 %2569 }
 0x77f   : > { %v2573_v38 = vsel %vm604_vm6, %v2570_v24, %v2572_v5  ;;  %v2574_v50 = vsel %vm604_vm6, %v2572_v5, %v2570_v24  ;;  %v3918_v24 = vsel %vm2278_vm14, %v3916_v39, %v3914_v29 }
 0x780   : > { %v2583_v45 = vmul.f32 %v2578_v9, %v2573_v38  ;;  %v2584_v42 = vmul.f32 %v2582_v55, %v2574_v50 }
 0x782   : > { %v2585_v37 = vadd.f32 %v2583_v45, %v2485_v59  ;;  %v2586_v21 = vadd.f32 %v2584_v42, %v2486_v20  ;;  %v2670_v56 = vpop.permute.xlu1 %2669  ;;  %v4204_v45 = vpop.permute.xlu0 %4203  ;;  %v3819_v42 = vsel %vm2177_vm13, %v3816_v33, %v3818_v1  ;;  %v4016_v33 = vsel %vm479_vm0, %v6538_v30, %v6540_v4 }
 0x783   : > { %v2674_v62 = vsel %vm2673_vm10, %v2670_v56, %v2672_v26  ;;  %v2675_v27 = vsel %vm2673_vm10, %v2672_v26, %v2670_v56 }
 0x784   : > { %v2684_v23 = vmul.f32 %v2679_v40, %v2674_v62  ;;  %v2685_v25 = vmul.f32 %v2683_v19, %v2675_v27  ;;  %v3917_v40 = vsel %vm2278_vm14, %v3914_v29, %v3916_v39 }
 0x786   : > { %v2686_v57 = vadd.f32 %v2684_v23, %v2585_v37  ;;  %v2687_v13 = vadd.f32 %v2685_v25, %v2586_v21  ;;  %v4202_v47 = vpop.permute.xlu1 %4201 }
 0x788   : > { %v2780_v41 = vadd.f32 %v2778_v51, %v2686_v57  ;;  %v2781_v10 = vadd.f32 %v2779_v53, %v2687_v13  ;;  %v4205_v53 = vsel %vm604_vm6, %v4202_v47, %v4204_v45 }
 0x78a   : > { %v2874_v34 = vadd.f32 %v2872_v31, %v2780_v41  ;;  %v2875_v52 = vadd.f32 %v2873_v28, %v2781_v10  ;;  %v4300_v20 = vpop.permute.xlu1 %4299 }
 0x78c   : > { %v6577_v18 = vadd.f32 %v2966_v63, %v2874_v34  ;;  %v6579_v59 = vadd.f32 %v2967_v2, %v2875_v52  ;;  %v4302_v52 = vpop.permute.xlu0 %4301 }
 0x79b   : > { %v6581_v5 = vpop.permute.xlu1 %2971 }
 0x79f   : > { %v4398_v19 = vpop.permute.xlu1 %4397 }
 0x81a   : > { %v3810_v46 = vpop.f32.mrb[30].mxu0  ;;  %v3908_v0 = vpop.f32.mrb[30].mxu1 }
 0x81b   : > { %v3824_v3 = vrot.slane %v3810_v46, %v5826_v8  ;;  %v3922_v9 = vrot.slane %v3908_v0, %v5826_v8  ;;  %v3812_v55 = vpop.f32.mrb[31].mxu0  ;;  %v3910_v11 = vpop.f32.mrb[31].mxu1  ;;  %v4206_v46 = vsel %vm604_vm6, %v4204_v45, %v4202_v47 }
 0x81c   : > { %v3828_v38 = vrot.slane %v3812_v55, %v5826_v8  ;;  %v3926_v50 = vrot.slane %v3910_v11, %v5826_v8  ;;  %v4400_v0 = vpop.permute.xlu1 %4399 }
 0x81d   : > { %v3829_v26 = vmul.f32 %v3824_v3, %v3820_v12  ;;  %v3927_v37 = vmul.f32 %v3922_v9, %v3918_v24  ;;  %v4303_v9 = vsel %vm2673_vm10, %v4300_v20, %v4302_v52  ;;  %v4401_v47 = vsel %vm1975_vm12, %v4398_v19, %v4400_v0 }
 0x81e   : > { %v3830_v21 = vmul.f32 %v3828_v38, %v3819_v42  ;;  %v3928_v56 = vmul.f32 %v3926_v50, %v3917_v40  ;;  %v4006_v62 = vpop.f32.mrb[32].mxu0  ;;  %v4104_v27 = vpop.f32.mrb[32].mxu1 }
 0x81f   : > { %v3929_v58 = vadd.f32 %v3927_v37, %v3829_v26  ;;  %v4020_v6 = vrot.slane %v4006_v62, %v5826_v8  ;;  %v4112_v23 = vrot.slane %v4104_v27, %v5826_v8  ;;  %v4008_v25 = vpop.f32.mrb[33].mxu0  ;;  %v4106_v22 = vpop.f32.mrb[33].mxu1  ;;  %v4402_v37 = vsel %vm1975_vm12, %v4400_v0, %v4398_v19 }
 0x820   : > { %v3930_v39 = vadd.f32 %v3928_v56, %v3830_v21  ;;  %v4024_v1 = vrot.slane %v4008_v25, %v5826_v8  ;;  %v4116_v29 = vrot.slane %v4106_v22, %v5826_v8  ;;  %v2975_v22 = vmul.f32 %v6581_v5, %v6579_v59 }
 0x821   : > { %v4025_v51 = vmul.f32 %v4020_v6, %v4016_v33  ;;  %v4117_v31 = vmul.f32 %v4112_v23, %v6387_v48  ;;  %v2974_v23 = vmul.f32 %v6581_v5, %v6577_v18 }
 0x822   : > { %v4026_v57 = vmul.f32 %v4024_v1, %v4015_v54  ;;  %v4196_v13 = vpop.f32.mrb[34].mxu0  ;;  %v4294_v32 = vpop.f32.mrb[34].mxu1  ;;  %v4118_v34 = vmul.f32 %v4116_v29, %v6389_v44  ;;  %v4304_v44 = vsel %vm2673_vm10, %v4302_v52, %v4300_v20 }
 0x823   : > { %v4027_v43 = vadd.f32 %v4025_v51, %v3929_v58  ;;  %v4210_v28 = vrot.slane %v4196_v13, %v5826_v8  ;;  %v4308_v41 = vrot.slane %v4294_v32, %v5826_v8  ;;  %v4198_v10 = vpop.f32.mrb[35].mxu0  ;;  %v4296_v63 = vpop.f32.mrb[35].mxu1 }
 0x824   : > { %v4028_v2 = vadd.f32 %v4026_v57, %v3930_v39  ;;  %v4214_v30 = vrot.slane %v4198_v10, %v5826_v8  ;;  %v4312_v4 = vrot.slane %v4296_v63, %v5826_v8  ;;  %v2978_v58 = vpop.permute.xlu0 %2977 }
 0x825   : > { %v4119_v3 = vadd.f32 %v4117_v31, %v4027_v43  ;;  %v4215_v48 = vmul.f32 %v4210_v28, %v4205_v53  ;;  %v4313_v38 = vmul.f32 %v4308_v41, %v4303_v9  ;;  %v2981_v19 = vmul.f32 %v2978_v58, %v5951_v61 }
 0x826   : > { %v4120_v55 = vadd.f32 %v4118_v34, %v4028_v2  ;;  %v4216_v11 = vmul.f32 %v4214_v30, %v4206_v46  ;;  %v4392_v12 = vpop.f32.mrb[36].mxu0  ;;  %v4314_v40 = vmul.f32 %v4312_v4, %v4304_v44 }
 0x827   : > { %v4217_v24 = vadd.f32 %v4215_v48, %v4119_v3  ;;  %v4406_v50 = vrot.slane %v4392_v12, %v5826_v8  ;;  %v4394_v42 = vpop.f32.mrb[37].mxu0  ;;  %v2983_v51 = vadd.f32 %v2981_v19, %v2975_v22  ;;  %v6832_v48 = vld [vmem:[#allocation19_spill] sm:$0xff] }
 0x828   : > { %v4218_v45 = vadd.f32 %v4216_v11, %v4120_v55  ;;  %v4410_v26 = vrot.slane %v4394_v42, %v5826_v8  ;;  %v2980_v8 = vmul.f32 %v2978_v58, %v5949_v60  ;;  %v5457_v60 = vmov 1   ;;  %v6833_v55 = vld [vmem:[#allocation20_spill] sm:$0xff] }
 0x829   : > { %v4315_v21 = vadd.f32 %v4313_v38, %v4217_v24  ;;  %v4411_v56 = vmul.f32 %v4406_v50, %v4401_v47  ;;  %5145 = vset.pattern.permute.xlu0 %v5457_v60  ;;  %v6834_v47 = vld [vmem:[#allocation22_spill] sm:$0xff] }
 0x82a   : > { %v4316_v62 = vadd.f32 %v4314_v40, %v4218_v45  ;;  %v4412_v27 = vmul.f32 %v4410_v26, %v4402_v37  ;;  %v2982_v29 = vadd.f32 %v2980_v8, %v2974_v23  ;;  %v6835_v40 = vld [vmem:[#allocation23_spill] sm:$0xff]  ;;  %v6836_v26 = vld [vmem:[#allocation24_spill] sm:$0xff]  ;;  %v6837_v37 = vld [vmem:[#allocation21_spill] sm:$0xff] }
 0x82b   : > { %v4413_v20 = vadd.f32 %v4411_v56, %v4315_v21 }
 0x82c   : > { %v4414_v6 = vadd.f32 %v4412_v27, %v4316_v62 }
 0x82d   : > { %v4417_v25 = vrot.slane %v4413_v20, 4 }
 0x82e   : > { %v4418_v33 = vrot.slane %v4414_v6, 4 }
 0x82f   : > { %v4421_v39 = vmul.f32 %v4417_v25, %v6581_v5 }
 0x830   : > { %v4422_v1 = vmul.f32 %v4418_v33, %v6581_v5 }
 0x831   : > { %v4423_v54 = vadd.f32 %v4421_v39, %v2980_v8  ;;  %v6838_v8 = vld [vmem:[#allocation25_spill] sm:$0xff] }
 0x832   : > { %v4424_v53 = vadd.f32 %v4422_v1, %v2981_v19  ;;  %v6839_v19 = vld [vmem:[#allocation26_spill] sm:$0xff] }
 0x833   : > { %v4425_v57 = vsel %vm736_vm9, %v2982_v29, %v4423_v54  ;;  %v6840_v29 = vld [vmem:[#allocation27_spill] sm:$0xff] }
 0x834   : > { %v4426_v18 = vsel %vm736_vm9, %v2983_v51, %v4424_v53  ;;  %4427 = vrot.lane.b32.xlu0 %v4425_v57, %s5429_s28  ;;  %v4459_v45 = vmul.f32 %v4425_v57, %v6834_v47  ;;  %v6841_v51 = vld [vmem:[#allocation28_spill] sm:$0xff] }
 0x835   : > { %4429 = vrot.lane.b32.xlu1 %v4426_v18, %s5429_s28  ;;  %v4460_v21 = vmul.f32 %v4426_v18, %v6837_v37 }
 0x838   : > { %4435 = vrot.lane.b32.xlu0 %v4425_v57, %s5428_s20 }
 0x839   : > { %4437 = vrot.lane.b32.xlu1 %v4426_v18, %s5428_s20  ;;  %s6831_s20 = smov 111  }
 0x83c   : > { %4443 = vrot.lane.b32.xlu0 %v4425_v57, %s5430_s22 }
 0x83d   : > { %4445 = vrot.lane.b32.xlu1 %v4426_v18, %s5430_s22 }
 0x840   : > { %4451 = vrot.lane.b32.xlu0 %v4425_v57, %s5431_s27 }
 0x841   : > { %4453 = vrot.lane.b32.xlu1 %v4426_v18, %s5431_s27  ;;  %s6846_s27 = sld [smem:[#allocation31_spill]] }
 0x844   : > { %4461 = vrot.lane.b32.xlu0 %v4425_v57, %s5432_s25 }
 0x845   : > { %4463 = vrot.lane.b32.xlu1 %v4426_v18, %s5432_s25  ;;  %s4848_s25 = sshll.u32 %s5535_s19, 8  ;;  %s4577_s19 = scalar_lea.sflag [#allocation4], %s5757_s4 }
 0x848   : > { %4469 = vrot.lane.b32.xlu0 %v4425_v57, %s6830_s12 }
 0x849   : > { %4471 = vrot.lane.b32.xlu1 %v4426_v18, %s6830_s12  ;;  %s6716_s12 = scalar_lea.hbm %s6849_s18, %s4848_s25 }
 0x84c   : > { %4477 = vrot.lane.b32.xlu0 %v4425_v57, %s5436_s26 }
 0x84d   : > { %4479 = vrot.lane.b32.xlu1 %v4426_v18, %s5436_s26  ;;  %s6848_s26 = sshll.u32 %s5757_s4, 4 }
 0x84e   : > { %s448_s2 = scalar_lea.vmem [#allocation13], %s6848_s26 }
 0x84f   : > { %s4591_s30 = sshll.u32 %s448_s2, 4  ;;  %s6718_s30 = int_to_ptr.vmem [resolvable:$true] %s4591_s30 }
 0x850   : > { %4485 = vrot.lane.b32.xlu0 %v4425_v57, %s6831_s20 }
 0x851   : > { %4487 = vrot.lane.b32.xlu1 %v4426_v18, %s6831_s20  ;;  %s5340_s20 = scalar_lea.vmem %s6718_s30, 256 }
 0x852   : > { %p5341_p7 = scmp.ne.s32.totalorder %s6718_s30, %s5340_s20 }
 0x854   : > { %4495 = vperm.xlu0 %5145, %v6412_v49   ;;  %p5342_p12 = pnand %p5341_p7, %p6850_p4 }
 0x856   : > { %p5343_p1 = pneg %p5342_p12 }
 0x8a6   : > { %v4428_v61 = vpop.permute.xlu0 %4427 }
 0x8a7   : > { %v4430_v59 = vpop.permute.xlu1 %4429 }
 0x8a8   : > { %v4431_v5 = vsel %vm458_vm1, %v4428_v61, %v4430_v59  ;;  %v4432_v13 = vsel %vm458_vm1, %v4430_v59, %v4428_v61 }
 0x8a9   : > { %v4433_v41 = vmul.f32 %v4432_v13, %v5833_v14  ;;  %v4434_v49 = vmul.f32 %v4431_v5, %v5836_v15  ;;  %v6844_v13 = vld [vmem:[#allocation29_spill] sm:$0xff] }
 0x8aa   : > { %v4436_v32 = vpop.permute.xlu0 %4435 }
 0x8ab   : > { %v4438_v43 = vpop.permute.xlu1 %4437 }
 0x8ac   : > { %v4439_v31 = vsel %vm479_vm0, %v4436_v32, %v4438_v43  ;;  %v4440_v28 = vsel %vm479_vm0, %v4438_v43, %v4436_v32  ;;  %vm6842_vm0 = vcmp.lt.s32.totalorder %v5824_v7, 111  ;;  %v6845_v43 = vld [vmem:[#allocation30_spill] sm:$0xff] }
 0x8ad   : > { %v4441_v10 = vmul.f32 %v4440_v28, %v5842_v17  ;;  %v4442_v63 = vmul.f32 %v4439_v31, %v5839_v16  ;;  %vm6843_vm1 = vmmov %vm6842_vm0  ;;  %v4493_v28 = vld [vmem:[%s6846_s27] sm:$0xff] }
 0x8ae   : > { %v4444_v2 = vpop.permute.xlu0 %4443 }
 0x8af   : > { %v4999_v34 = vpack.c.bf16 %v4441_v10, %v4433_v41  ;;  %v4446_v30 = vpop.permute.xlu1 %4445  ;;  %v4997_v4 = vpack.c.bf16 %v4442_v63, %v4434_v49 }
 0x8b0   : > { %v4447_v52 = vsel %vm501_vm2, %v4444_v2, %v4446_v30  ;;  %v4448_v46 = vsel %vm501_vm2, %v4446_v30, %v4444_v2  ;;  %vm6847_vm2 = vcmask 588800   ;;  %v5168_v2 = vld [vmem:[%s5763_s21] sm:$0xff]  ;;  %v5169_v30 = vld [vmem:[%s5763_s21 + $0x8] sm:$0xff]  ;;  %s5458_s21 = smov [#allocation13]  }
 0x8b1   : > { %4998 = vmatprep.subr.bf16.mxu1 %v4997_v4  ;;  %v4449_v17 = vmul.f32 %v4448_v46, %v5859_v35  ;;  %v4450_v3 = vmul.f32 %v4447_v52, %v5862_v36  ;;  %s5344_s28 = sshll.u32 %s5458_s21, 4  ;;  %s5345_s28 = int_to_ptr.vmem [resolvable:$false] %s5344_s28 }
 0x8b2   : > { %5000 = vmatpush1.bf16.msra.mxu1 %v4999_v34  ;;  %v4452_v0 = vpop.permute.xlu0 %4451  ;;  %s5346_s22 = scalar_lea.vmem %s5345_s28, 512  ;;  %p5347_p13 = scmp.lt.s32.totalorder %s6718_s30, %s5345_s28 }
 0x8b3   : > { %v4454_v14 = vpop.permute.xlu1 %4453  ;;  %p5348_p0 = scmp.lt.s32.totalorder %s5346_s22, %s5340_s20 }
 0x8b4   : > { %v4455_v15 = vsel %vm523_vm3, %v4452_v0, %v4454_v14  ;;  %v4456_v16 = vsel %vm523_vm3, %v4454_v14, %v4452_v0 }
 0x8b5   : > { %v4457_v9 = vmul.f32 %v4456_v16, %v6832_v48  ;;  %v4458_v11 = vmul.f32 %v4455_v15, %v6833_v55  ;;  %p5349_p2 = por %p5348_p0, %p5347_p13 }
 0x8b6   : > { %v4462_v12 = vpop.permute.xlu0 %4461 }
 0x8b7   : > { %v5003_v44 = vpack.c.bf16 %v4457_v9, %v4449_v17  ;;  %v4464_v24 = vpop.permute.xlu1 %4463  ;;  %v5001_v38 = vpack.c.bf16 %v4458_v11, %v4450_v3  ;;  %p5350_p3 = pnand %p5349_p2, %p5343_p1 }
 0x8b8   : > { %v4465_v50 = vsel %vm560_vm4, %v4462_v12, %v4464_v24  ;;  %v4466_v42 = vsel %vm560_vm4, %v4464_v24, %v4462_v12 }
 0x8b9   : > { %v4467_v35 = vmul.f32 %v4465_v50, %v6835_v40  ;;  %v4468_v36 = vmul.f32 %v4466_v42, %v6836_v26  ;;  %5002 = vmatprep.subr.bf16.mxu1 %v5001_v38 }
 0x8ba   : > { %5004 = vmatpush1.bf16.msra.mxu1 %v5003_v44  ;;  %v4470_v56 = vpop.permute.xlu0 %4469 }
 0x8bb   : > { %v5007_v62 = vpack.c.bf16 %v4467_v35, %v4459_v45  ;;  %v4472_v27 = vpop.permute.xlu1 %4471  ;;  %v5005_v20 = vpack.c.bf16 %v4468_v36, %v4460_v21 }
 0x8bc   : > { %v4473_v58 = vsel %vm582_vm5, %v4470_v56, %v4472_v27  ;;  %v4474_v6 = vsel %vm582_vm5, %v4472_v27, %v4470_v56 }
 0x8bd   : > { %5006 = vmatprep.subr.bf16.mxu1 %v5005_v20  ;;  %v4475_v39 = vmul.f32 %v4473_v58, %v6838_v8  ;;  %v4476_v1 = vmul.f32 %v4474_v6, %v6839_v19 }
 0x8be   : > { %v4478_v23 = vpop.permute.xlu0 %4477  ;;  %5008 = vmatpush1.bf16.msra.mxu1 %v5007_v62 }
 0x8bf   : > { %v4480_v25 = vpop.permute.xlu1 %4479 }
 0x8c0   : > { %v4481_v22 = vsel %vm604_vm6, %v4478_v23, %v4480_v25  ;;  %v4482_v33 = vsel %vm604_vm6, %v4480_v25, %v4478_v23 }
 0x8c1   : > { %v4483_v54 = vmul.f32 %v4481_v22, %v6840_v29  ;;  %v4484_v53 = vmul.f32 %v4482_v33, %v6841_v51 }
 0x8c2   : > { %v4486_v57 = vpop.permute.xlu0 %4485 }
 0x8c3   : > { %v5011_v18 = vpack.c.bf16 %v4483_v54, %v4475_v39  ;;  %v4488_v60 = vpop.permute.xlu1 %4487  ;;  %v5009_v61 = vpack.c.bf16 %v4484_v53, %v4476_v1 }
 0x8c4   : > { %v4490_v59 = vsel %vm6842_vm0, %v4488_v60, %v4486_v57  ;;  %v4489_v5 = vsel %vm6843_vm1, %v4486_v57, %v4488_v60 }
 0x8c5   : > { %v4492_v32 = vmul.f32 %v4490_v59, %v6844_v13  ;;  %5010 = vmatprep.subr.bf16.mxu1 %v5009_v61  ;;  %v4491_v31 = vmul.f32 %v4489_v5, %v6845_v43 }
 0x8c6   : > { %5012 = vmatpush1.bf16.msra.mxu1 %v5011_v18 }
 0x8c7   : > { %4517 = vmatprep.subr.mxu1 %v4492_v32 }
 0x8ca   : > { %4518 = vmatpush1.msra.mxu1 %v4491_v31 }
 0x8cb   : > { %4841 = vmatmul.mubr.msk.f32.vlgmr.msra.gmra.mrb[36].mxu1 %vm6847_vm2, %v4493_v28 }
 0x8d3   : > { %v4496_v41 = vpop.permute.xlu0 %4495 }
 0x99e   : > { %v4567_v7 = vpop.f32.mrb[36].mxu1 }
 0x99f   : > { %v4568_v49 = vadd.f32 %v4567_v7, %v4496_v41  ;;  %v4569_v10 = vpop.f32.mrb[37].mxu1 }
 0x9a0   : > { %v4570_v63 = vadd.f32 %v4569_v10, %v4496_v41 }
 0x9a1   : > { %v4572_v34 = vadd.f32 %v5168_v2, %v4568_v49 }
 0x9a2   : > { %v4573_v4 = vadd.f32 %v5169_v30, %v4570_v63 }
 0x9a3   : > { %4574 = vst [vmem:[%s448_s2] sm:$0xff] %v4572_v34 }
 0x9a4   : > { %4575 = vst [vmem:[%s448_s2 + $0x8] sm:$0xff] %v4573_v4 }
 0x9a5   : > { %5353 = shalt.err (!%p5350_p3)
}
 0x9a6   : > { %s5354_s4 = scalar_lea.hbm %s6716_s12, 256  ;;  %s5358_s26 = scalar_lea.hbm %s6849_s18, 512 }
 0x9a7   : > { %p5355_p6 = scmp.ne.s32.totalorder %s6716_s12, %s5354_s4  ;;  %p5359_p8 = scmp.lt.u32.totalorder %s6716_s12, %s6849_s18 }
 0x9a8   : > { %p5360_p5 = scmp.lt.u32.totalorder %s5358_s26, %s5354_s4  ;;  %p5362_p7 = scmp.lt.u32.totalorder %s5354_s4, %s6716_s12 }
 0x9a9   : > { %p5356_p10 = pnand %p5355_p6, %p6850_p4 }
 0x9aa   : > { %p5361_p9 = por %p5360_p5, %p5359_p8 }
 0x9ab   : > { %p5357_p11 = pneg %p5356_p10 }
 0x9ac   : > { %p5363_p12 = por %p5362_p7, %p5361_p9 }
 0x9ae   : > { %p5364_p1 = pnand %p5363_p12, %p5357_p11 }
 0x9b0   : > { %5367 = shalt.err (!%p5364_p1)
}
 0x9b1   : > { %5035 = dma.vmem_to_hbm [thread:$0]  (%p6850_p4), %s6718_s30, 256, %s6716_s12, %s4577_s19  }
 0x9b2 PF: > { %s4603_s23 = sand.u32 1, %s5406_s13   ;;  %p6851_p13 = scmp.ne.s32.totalorder %s6806_s29, 0 }
 0x9b3   : > { %p6852_p0 = scmp.ge.s32.totalorder %s5418_s16, 2  ;;  %s4604_s20 = scalar_lea.sflag [#allocation4], %s4603_s23 }
 0x9b5   : > { %p5058_p2 = pnand %p6852_p0, %p6851_p13 }
 0x9b7   : > { %5401 = dma.done.wait (!%p5058_p2), %s4604_s20, 256  }
 0x9b8   : > { %5403 = vsyncadd (!%p5058_p2), %s4604_s20, 4294967040  ;;  %p26_p3 = scmp.ge.s32.totalorder %s5687_s11, 4   ;;  %s6853_s13 = smov %s5410_s14 }
 0x9b9   : > { %s6854_s14 = smov %s5414_s15  ;;  %s6855_s15 = smov %s5699_s10 }
 0x9ba   : > { %s6856_s16 = smov %s5687_s11  ;;  %28 = sbr.rel (!%p26_p3) target bundleno = 12 (0xc), region = 165 }
 0x9c1   :  { %4609 = vsyncpa [#allocation3], 1 }
 0x9c2   :  { %4611 = vsyncpa [#allocation3 + $0x1], 1 }
 0x9c3   :  { %4612 = vsyncpa [#allocation6], 1 }
 0x9c4   :  { %4613 = vsyncpa [#allocation9], 1 }
 0x9c5   :  { %4614 = vsyncpa [#allocation12], 1 }
 0x9c6   :  { %4615 = vsyncpa [#allocation4], 1 }
 0x9c7   :  { %4617 = vsyncpa [#allocation4 + $0x1], 1 }

</bundles_post_ra>
